<compile_context>
chip_gen: v6e
topology: v6e:2x2x1
jax: 0.10.0
libtpu: 0.0.40
codegen_flags: <defaults>
</compile_context>

<pallas_src>
import jax
import jax.numpy as jnp
from jax import lax
from jax.experimental import pallas as pl
from jax.experimental.pallas import tpu as pltpu

# ---------------- scaled-down config (real module: D=768, LSTM hidden=256) ----
VOCAB = 100
D_MODEL = 128            # stands in for EMBEDDING_DIM = 768
N_HEADS = 4
D_HEAD = D_MODEL // N_HEADS
D_FFN = 256
N_LAYERS = 2
HIDDEN_DIM_LSTM = 64     # stands in for 256
GATE_PAD = 128           # each LSTM gate zero-padded to a full 128-lane block
N_CLASSES = 3
LOGIT_PAD = 128          # lane-dense logits slab, sliced to N_CLASSES outside
LN_EPS = 1e-12
PDTYPE = jnp.float32     # master / elementwise dtype
CDTYPE = jnp.bfloat16    # MXU operand dtype


def _full_spec(shape):
    # One block == the whole (small) array; grid is (1,).
    return pl.BlockSpec(shape, lambda *_: (0,) * len(shape))


def _layernorm(x, g, b):
    mu = jnp.mean(x, axis=-1, keepdims=True)
    var = jnp.mean(jnp.square(x - mu), axis=-1, keepdims=True)
    return (x - mu) * lax.rsqrt(var + LN_EPS) * g + b


# ------------------------- single fused forward kernel -------------------------
def _fused_forward_kernel(
        h0_ref, mask_ref,
        emb_g_ref, emb_b_ref,
        wqkv_ref, bqkv_ref, wo_ref, bo_ref,
        ln1_g_ref, ln1_b_ref, w1_ref, b1_ref, w2_ref, b2_ref,
        ln2_g_ref, ln2_b_ref,
        wih_ref, lstm_b_ref, whh_ref, wout_ref, bout_ref,
        o_ref):
    B, S = mask_ref.shape
    D = h0_ref.shape[1]
    dh = D_HEAD
    scale = 1.0 / (dh ** 0.5)

    # additive key mask, broadcast ONCE (hoisted out of layer/head loops)
    neg_mask = jnp.broadcast_to(
        ((1.0 - mask_ref[...]) * -1e9)[:, None, :], (B, S, S))    # (B, S, S) f32

    # ---- embedding LayerNorm ----
    x = _layernorm(h0_ref[...].astype(jnp.float32),
                   emb_g_ref[...], emb_b_ref[...])                # (B*S, D) f32

    # ---- transformer layers (static unroll, weights stacked on leading L axis) ----
    for l in range(N_LAYERS):
        qkv = (jnp.dot(x.astype(CDTYPE), wqkv_ref[l],
                       preferred_element_type=jnp.float32)
               + bqkv_ref[l])                                     # (B*S, 3D) f32

        # 128-lane-aligned splits of the fused QKV slab; bf16 MXU operands
        q = qkv[:, 0:D].astype(CDTYPE)                            # (B*S, 128)
        k = qkv[:, D:2 * D].astype(CDTYPE)
        v = qkv[:, 2 * D:3 * D].astype(CDTYPE)

        ctx_heads = []
        for h in range(N_HEADS):
            # TODO(synk): per-head 32-lane slices are still sub-vreg extracts;
            # fully removing them needs a head-batched einsum / 4-D transpose
            # layout that Mosaic handles poorly at this tiny size.
            qh = q[:, h * dh:(h + 1) * dh].reshape(B, S, dh)
            kh = k[:, h * dh:(h + 1) * dh].reshape(B, S, dh)
            vh = v[:, h * dh:(h + 1) * dh].reshape(B, S, dh)
            s = jnp.einsum('bqd,bkd->bqk', qh, kh,
                           preferred_element_type=jnp.float32) * scale
            s = s + neg_mask
            # explicit softmax: f32 stats, divide goes to the EUP reciprocal
            m = jnp.max(s, axis=-1, keepdims=True)
            e = jnp.exp(s - m)
            p = e * pl.reciprocal(jnp.sum(e, axis=-1, keepdims=True), approx=True)
            oh = jnp.einsum('bqk,bkd->bqd', p.astype(CDTYPE), vh,
                            preferred_element_type=jnp.float32)   # (B, S, dh)
            ctx_heads.append(oh.reshape(B * S, dh))

        # one lane-dense (B*S,128) context -> single K=128 output projection
        ctx = jnp.concatenate(ctx_heads, axis=-1)                 # (B*S, D)
        attn = (jnp.dot(ctx.astype(CDTYPE), wo_ref[l],
                        preferred_element_type=jnp.float32) + bo_ref[l])
        x = _layernorm(x + attn, ln1_g_ref[l], ln1_b_ref[l])

        ff = (jnp.dot(x.astype(CDTYPE), w1_ref[l],
                      preferred_element_type=jnp.float32) + b1_ref[l])
        # TODO(synk): HF BERT uses exact erf GELU; tanh approximation used here.
        ff = jax.nn.gelu(ff, approximate=True)
        ff = (jnp.dot(ff.astype(CDTYPE), w2_ref[l],
                      preferred_element_type=jnp.float32) + b2_ref[l])
        x = _layernorm(x + ff, ln2_g_ref[l], ln2_b_ref[l])

    # ---- LSTM (stored gate order i, f, o, g; each gate padded to GP=128 lanes) ----
    GP = GATE_PAD
    # input projection for ALL timesteps hoisted out of the recurrence (bias folded in)
    xg = (jnp.dot(x.astype(CDTYPE), wih_ref[...],
                  preferred_element_type=jnp.float32)
          + lstm_b_ref[...])                                      # (B*S, 4*GP) f32
    xg = xg.reshape(B, S, 4 * GP)

    h_t = jnp.zeros((B, GP), jnp.float32)
    c_t = jnp.zeros((B, GP), jnp.float32)
    for t in range(S):                                            # fully unrolled, S static
        g = xg[:, t, :] + jnp.dot(h_t.astype(CDTYPE), whh_ref[...],
                                  preferred_element_type=jnp.float32)
        sg = jax.nn.sigmoid(g[:, 0:3 * GP])   # i|f|o gates fused into one EUP call
        i_g = sg[:, 0:GP]                     # all slice offsets 128-aligned
        f_g = sg[:, GP:2 * GP]
        o_g = sg[:, 2 * GP:3 * GP]
        g_g = jnp.tanh(g[:, 3 * GP:4 * GP])
        c_t = f_g * c_t + i_g * g_g           # padded lanes stay exactly 0
        h_t = o_g * jnp.tanh(c_t)

    # nn.Dropout(p=0.3): identity in eval mode.
    # TODO(synk): training-mode dropout would need pltpu.prng_seed/prng_random_bits.
    logits = (jnp.dot(h_t.astype(CDTYPE), wout_ref[...],
                      preferred_element_type=jnp.float32) + bout_ref[...])
    o_ref[...] = logits.astype(o_ref.dtype)                       # (B, 128) lane-dense


# ------------------------------ full model forward -----------------------------
def _cost_estimate(B, S, arg_bytes, out_bytes):
    BS, L, D, F, GP = B * S, N_LAYERS, D_MODEL, D_FFN, GATE_PAD
    flops = 0
    flops += L * 2 * BS * D * (3 * D)                       # fused QKV
    flops += L * N_HEADS * 2 * (2 * B * S * S * D_HEAD)     # scores + context
    flops += L * 2 * BS * D * D                             # output projection
    flops += L * 2 * (BS * D * F + BS * F * D)              # FFN
    flops += 2 * BS * D * (4 * GP)                          # LSTM input projection
    flops += S * 2 * B * GP * (4 * GP)                      # LSTM recurrence
    flops += 2 * B * GP * LOGIT_PAD                         # classifier
    trans = (L * (N_HEADS * B * S * S + BS * F)             # exp + gelu
             + S * B * (4 * GP + GP))                       # sigmoid/tanh per step
    return pl.CostEstimate(flops=int(flops), transcendentals=int(trans),
                           bytes_accessed=int(arg_bytes + out_bytes))


def bert_lstm_classifier(params, input_ids, attention_mask):
    B, S = input_ids.shape
    p = params
    # embedding gather / sum = glue
    # TODO(synk): pos_emb has 32 rows and type 0 is assumed for all tokens (S <= 32).
    tok = jnp.take(p["tok_emb"], input_ids, axis=0)               # (B, S, D)
    pos = p["pos_emb"][:S][None, :, :]
    typ = p["type_emb"][0][None, None, :]
    h0 = (tok + pos + typ).astype(jnp.float32).reshape(B * S, D_MODEL)
    mask = attention_mask.astype(jnp.float32)                     # (B, S)

    args = (h0, mask,
            p["emb_ln_g"], p["emb_ln_b"],
            p["wqkv"], p["bqkv"], p["wo"], p["bo"],
            p["ln1_g"], p["ln1_b"], p["w1"], p["b1"], p["w2"], p["b2"],
            p["ln2_g"], p["ln2_b"],
            p["lstm_wih"], p["lstm_b"], p["lstm_whh"],
            p["out_w_pad"], p["out_b_pad"])

    arg_bytes = sum(int(a.size) * a.dtype.itemsize for a in args)
    out_bytes = B * LOGIT_PAD * 4

    logits_pad = pl.pallas_call(
        _fused_forward_kernel,
        grid=(1,),
        in_specs=[_full_spec(a.shape) for a in args],
        out_specs=_full_spec((B, LOGIT_PAD)),
        out_shape=jax.ShapeDtypeStruct((B, LOGIT_PAD), jnp.float32),
        cost_estimate=_cost_estimate(B, S, arg_bytes, out_bytes),
        compiler_params=pltpu.CompilerParams(
            dimension_semantics=("arbitrary",)),
    )(*args)
    return logits_pad[:, :N_CLASSES]


# ------------------------------ deterministic parameter init -------------------
def init_params(key):
    keys = iter(jax.random.split(key, 64))

    def nrm(shape, dtype, scale=0.02):
        return (scale * jax.random.normal(next(keys), shape, jnp.float32)).astype(dtype)

    def zeros(shape, dtype=PDTYPE):
        return jnp.zeros(shape, dtype)

    def ones(shape, dtype=PDTYPE):
        return jnp.ones(shape, dtype)

    L, D, F, H, GP = N_LAYERS, D_MODEL, D_FFN, HIDDEN_DIM_LSTM, GATE_PAD

    # PyTorch stores W_ih (4H,E) / W_hh (4H,H), gate order i,f,g,o; stored here
    # pre-transposed, gate order (i,f,o,g) so the sigmoid gates form one
    # contiguous 3*GP lane block, and each gate is zero-padded H -> GP=128
    # lanes so every in-kernel gate slice is 128-lane aligned. Zero padding is
    # mathematically inert (padded h/c lanes remain exactly 0).
    wih_real = nrm((D, 4 * H), jnp.float32)
    whh_real = nrm((H, 4 * H), jnp.float32)
    wih_pad = jnp.zeros((D, 4 * GP), jnp.float32)
    whh_pad = jnp.zeros((GP, 4 * GP), jnp.float32)
    for gi in range(4):
        wih_pad = wih_pad.at[:, gi * GP:gi * GP + H].set(wih_real[:, gi * H:(gi + 1) * H])
        whh_pad = whh_pad.at[:H, gi * GP:gi * GP + H].set(whh_real[:, gi * H:(gi + 1) * H])

    out_w = nrm((H, N_CLASSES), jnp.float32)
    out_w_pad = (jnp.zeros((GP, LOGIT_PAD), jnp.float32)
                 .at[:H, :N_CLASSES].set(out_w))

    return dict(
        tok_emb=nrm((VOCAB, D), PDTYPE),
        pos_emb=nrm((32, D), PDTYPE),
        type_emb=nrm((2, D), PDTYPE),
        emb_ln_g=ones((1, D)), emb_ln_b=zeros((1, D)),
        # per-layer weights stacked on a leading L axis; Q|K|V pre-concatenated
        wqkv=nrm((L, D, 3 * D), CDTYPE), bqkv=zeros((L, 1, 3 * D)),
        wo=nrm((L, D, D), CDTYPE), bo=zeros((L, 1, D)),
        ln1_g=ones((L, 1, D)), ln1_b=zeros((L, 1, D)),
        w1=nrm((L, D, F), CDTYPE), b1=zeros((L, 1, F)),
        w2=nrm((L, F, D), CDTYPE), b2=zeros((L, 1, D)),
        ln2_g=ones((L, 1, D)), ln2_b=zeros((L, 1, D)),
        lstm_wih=wih_pad.astype(CDTYPE),
        lstm_whh=whh_pad.astype(CDTYPE),
        lstm_b=zeros((1, 4 * GP)),
        out_w_pad=out_w_pad.astype(CDTYPE),
        out_b_pad=jnp.zeros((1, LOGIT_PAD), jnp.float32),
    )


# ------------------------------ main --------------------------------------------
if __name__ == "__main__":
    B, S = 2, 8
    key = jax.random.PRNGKey(0)
    k_par, k_ids = jax.random.split(key)
    params = init_params(k_par)
    input_ids = jax.random.randint(k_ids, (B, S), 0, VOCAB, dtype=jnp.int32)
    attention_mask = jnp.ones((B, S), dtype=jnp.int32)

    fwd = jax.jit(bert_lstm_classifier)
    logits = fwd(params, input_ids, attention_mask)
    jax.block_until_ready(logits)
    assert logits.shape == (B, N_CLASSES), logits.shape
    print("KERNEL_OK")
</pallas_src>

<mosaic_0001>
module attributes {stable_mosaic.version = 11 : i64} {
  func.func @_fused_forward_kernel(%arg0: i32, %arg1: memref<16x128xf32, #tpu.memory_space<vmem>>, %arg2: memref<2x8xf32, #tpu.memory_space<vmem>>, %arg3: memref<1x128xf32, #tpu.memory_space<vmem>>, %arg4: memref<1x128xf32, #tpu.memory_space<vmem>>, %arg5: memref<2x128x384xbf16, #tpu.memory_space<vmem>>, %arg6: memref<2x1x384xf32, #tpu.memory_space<vmem>>, %arg7: memref<2x128x128xbf16, #tpu.memory_space<vmem>>, %arg8: memref<2x1x128xf32, #tpu.memory_space<vmem>>, %arg9: memref<2x1x128xf32, #tpu.memory_space<vmem>>, %arg10: memref<2x1x128xf32, #tpu.memory_space<vmem>>, %arg11: memref<2x128x256xbf16, #tpu.memory_space<vmem>>, %arg12: memref<2x1x256xf32, #tpu.memory_space<vmem>>, %arg13: memref<2x256x128xbf16, #tpu.memory_space<vmem>>, %arg14: memref<2x1x128xf32, #tpu.memory_space<vmem>>, %arg15: memref<2x1x128xf32, #tpu.memory_space<vmem>>, %arg16: memref<2x1x128xf32, #tpu.memory_space<vmem>>, %arg17: memref<128x512xbf16, #tpu.memory_space<vmem>>, %arg18: memref<1x512xf32, #tpu.memory_space<vmem>>, %arg19: memref<128x512xbf16, #tpu.memory_space<vmem>>, %arg20: memref<128x128xbf16, #tpu.memory_space<vmem>>, %arg21: memref<1x128xf32, #tpu.memory_space<vmem>>, %arg22: memref<2x128xf32, #tpu.memory_space<vmem>>) attributes {dimension_semantics = [#tpu.dimension_semantics<arbitrary>], iteration_bounds = array<i64: 1>, scalar_prefetch = 0 : i64, scratch_operands = 0 : i64, tpu.core_type = #tpu.core_type<tc>, window_params = [{pipeline_mode = #tpu.pipeline_mode<synchronous>, transform_indices = @transform_0, window_bounds = array<i64: 16, 128>}, {pipeline_mode = #tpu.pipeline_mode<synchronous>, transform_indices = @transform_1, window_bounds = array<i64: 2, 8>}, {pipeline_mode = #tpu.pipeline_mode<synchronous>, transform_indices = @transform_2, window_bounds = array<i64: 1, 128>}, {pipeline_mode = #tpu.pipeline_mode<synchronous>, transform_indices = @transform_3, window_bounds = array<i64: 1, 128>}, {pipeline_mode = #tpu.pipeline_mode<synchronous>, transform_indices = @transform_4, window_bounds = array<i64: 2, 128, 384>}, {pipeline_mode = #tpu.pipeline_mode<synchronous>, transform_indices = @transform_5, window_bounds = array<i64: 2, 1, 384>}, {pipeline_mode = #tpu.pipeline_mode<synchronous>, transform_indices = @transform_6, window_bounds = array<i64: 2, 128, 128>}, {pipeline_mode = #tpu.pipeline_mode<synchronous>, transform_indices = @transform_7, window_bounds = array<i64: 2, 1, 128>}, {pipeline_mode = #tpu.pipeline_mode<synchronous>, transform_indices = @transform_8, window_bounds = array<i64: 2, 1, 128>}, {pipeline_mode = #tpu.pipeline_mode<synchronous>, transform_indices = @transform_9, window_bounds = array<i64: 2, 1, 128>}, {pipeline_mode = #tpu.pipeline_mode<synchronous>, transform_indices = @transform_10, window_bounds = array<i64: 2, 128, 256>}, {pipeline_mode = #tpu.pipeline_mode<synchronous>, transform_indices = @transform_11, window_bounds = array<i64: 2, 1, 256>}, {pipeline_mode = #tpu.pipeline_mode<synchronous>, transform_indices = @transform_12, window_bounds = array<i64: 2, 256, 128>}, {pipeline_mode = #tpu.pipeline_mode<synchronous>, transform_indices = @transform_13, window_bounds = array<i64: 2, 1, 128>}, {pipeline_mode = #tpu.pipeline_mode<synchronous>, transform_indices = @transform_14, window_bounds = array<i64: 2, 1, 128>}, {pipeline_mode = #tpu.pipeline_mode<synchronous>, transform_indices = @transform_15, window_bounds = array<i64: 2, 1, 128>}, {pipeline_mode = #tpu.pipeline_mode<synchronous>, transform_indices = @transform_16, window_bounds = array<i64: 128, 512>}, {pipeline_mode = #tpu.pipeline_mode<synchronous>, transform_indices = @transform_17, window_bounds = array<i64: 1, 512>}, {pipeline_mode = #tpu.pipeline_mode<synchronous>, transform_indices = @transform_18, window_bounds = array<i64: 128, 512>}, {pipeline_mode = #tpu.pipeline_mode<synchronous>, transform_indices = @transform_19, window_bounds = array<i64: 128, 128>}, {pipeline_mode = #tpu.pipeline_mode<synchronous>, transform_indices = @transform_20, window_bounds = array<i64: 1, 128>}, {pipeline_mode = #tpu.pipeline_mode<synchronous>, transform_indices = @transform_21, window_bounds = array<i64: 2, 128>}]} {
    %c0 = arith.constant 0 : index
    %c0_0 = arith.constant 0 : index
    %0 = vector.load %arg2[%c0, %c0_0] : memref<2x8xf32, #tpu.memory_space<vmem>>, vector<2x8xf32>
    %cst = arith.constant 1.000000e+00 : f32
    %1 = vector.broadcast %cst : f32 to vector<2x8xf32>
    %2 = arith.subf %1, %0 : vector<2x8xf32>
    %cst_1 = arith.constant -1.000000e+09 : f32
    %3 = vector.broadcast %cst_1 : f32 to vector<2x8xf32>
    %4 = arith.mulf %2, %3 : vector<2x8xf32>
    %5 = vector.shape_cast %4 : vector<2x8xf32> to vector<2x1x8xf32>
    %6 = vector.shape_cast %5 : vector<2x1x8xf32> to vector<2x1x8xf32>
    %7 = vector.broadcast %6 : vector<2x1x8xf32> to vector<2x8x8xf32>
    %c0_2 = arith.constant 0 : index
    %c0_3 = arith.constant 0 : index
    %8 = vector.load %arg1[%c0_2, %c0_3] : memref<16x128xf32, #tpu.memory_space<vmem>>, vector<16x128xf32>
    %c0_4 = arith.constant 0 : index
    %c0_5 = arith.constant 0 : index
    %9 = vector.load %arg3[%c0_4, %c0_5] : memref<1x128xf32, #tpu.memory_space<vmem>>, vector<1x128xf32>
    %c0_6 = arith.constant 0 : index
    %c0_7 = arith.constant 0 : index
    %10 = vector.load %arg4[%c0_6, %c0_7] : memref<1x128xf32, #tpu.memory_space<vmem>>, vector<1x128xf32>
    %cst_8 = arith.constant dense<0.000000e+00> : vector<16xf32>
    %11 = vector.multi_reduction <add>, %8, %cst_8 [1] : vector<16x128xf32> to vector<16xf32>
    %12 = vector.shape_cast %11 : vector<16xf32> to vector<16x1xf32>
    %cst_9 = arith.constant 1.280000e+02 : f32
    %13 = vector.broadcast %cst_9 : f32 to vector<16x1xf32>
    %14 = arith.divf %12, %13 : vector<16x1xf32>
    %15 = vector.broadcast %14 : vector<16x1xf32> to vector<16x128xf32>
    %16 = arith.subf %8, %15 : vector<16x128xf32>
    %17 = arith.mulf %16, %16 : vector<16x128xf32>
    %cst_10 = arith.constant dense<0.000000e+00> : vector<16xf32>
    %18 = vector.multi_reduction <add>, %17, %cst_10 [1] : vector<16x128xf32> to vector<16xf32>
    %19 = vector.shape_cast %18 : vector<16xf32> to vector<16x1xf32>
    %cst_11 = arith.constant 1.280000e+02 : f32
    %20 = vector.broadcast %cst_11 : f32 to vector<16x1xf32>
    %21 = arith.divf %19, %20 : vector<16x1xf32>
    %22 = vector.broadcast %14 : vector<16x1xf32> to vector<16x128xf32>
    %23 = arith.subf %8, %22 : vector<16x128xf32>
    %cst_12 = arith.constant 9.99999996E-13 : f32
    %24 = vector.broadcast %cst_12 : f32 to vector<16x1xf32>
    %25 = arith.addf %21, %24 : vector<16x1xf32>
    %26 = math.rsqrt %25 : vector<16x1xf32>
    %27 = vector.broadcast %26 : vector<16x1xf32> to vector<16x128xf32>
    %28 = arith.mulf %23, %27 : vector<16x128xf32>
    %29 = vector.broadcast %9 : vector<1x128xf32> to vector<16x128xf32>
    %30 = arith.mulf %28, %29 : vector<16x128xf32>
    %31 = vector.broadcast %10 : vector<1x128xf32> to vector<16x128xf32>
    %32 = arith.addf %30, %31 : vector<16x128xf32>
    %33 = arith.truncf %32 : vector<16x128xf32> to vector<16x128xbf16>
    %c0_13 = arith.constant 0 : index
    %c0_14 = arith.constant 0 : index
    %c0_15 = arith.constant 0 : index
    %34 = vector.load %arg5[%c0_13, %c0_14, %c0_15] : memref<2x128x384xbf16, #tpu.memory_space<vmem>>, vector<1x128x384xbf16>
    %35 = vector.shape_cast %34 : vector<1x128x384xbf16> to vector<128x384xbf16>
    %cst_16 = arith.constant dense<0.000000e+00> : vector<16x384xf32>
    %36 = tpu.matmul %33, %35, %cst_16 {dimension_numbers = #tpu.dot_dimension_numbers<[1], [0], [0], [1], [0, 0, 1, 1], [], []>} : vector<16x128xbf16>, vector<128x384xbf16>, vector<16x384xf32> -> vector<16x384xf32>
    %c0_17 = arith.constant 0 : index
    %c0_18 = arith.constant 0 : index
    %c0_19 = arith.constant 0 : index
    %37 = vector.load %arg6[%c0_17, %c0_18, %c0_19] : memref<2x1x384xf32, #tpu.memory_space<vmem>>, vector<1x1x384xf32>
    %38 = vector.shape_cast %37 : vector<1x1x384xf32> to vector<1x384xf32>
    %39 = vector.broadcast %38 : vector<1x384xf32> to vector<16x384xf32>
    %40 = arith.addf %36, %39 : vector<16x384xf32>
    %41 = vector.extract_strided_slice %40 {offsets = [0, 0], sizes = [16, 128], strides = [1, 1]} : vector<16x384xf32> to vector<16x128xf32>
    %42 = arith.truncf %41 : vector<16x128xf32> to vector<16x128xbf16>
    %43 = vector.extract_strided_slice %40 {offsets = [0, 128], sizes = [16, 128], strides = [1, 1]} : vector<16x384xf32> to vector<16x128xf32>
    %44 = arith.truncf %43 : vector<16x128xf32> to vector<16x128xbf16>
    %45 = vector.extract_strided_slice %40 {offsets = [0, 256], sizes = [16, 128], strides = [1, 1]} : vector<16x384xf32> to vector<16x128xf32>
    %46 = arith.truncf %45 : vector<16x128xf32> to vector<16x128xbf16>
    %47 = vector.extract_strided_slice %42 {offsets = [0, 0], sizes = [16, 32], strides = [1, 1]} : vector<16x128xbf16> to vector<16x32xbf16>
    %48 = vector.shape_cast %47 : vector<16x32xbf16> to vector<2x8x32xbf16>
    %49 = vector.extract_strided_slice %44 {offsets = [0, 0], sizes = [16, 32], strides = [1, 1]} : vector<16x128xbf16> to vector<16x32xbf16>
    %50 = vector.shape_cast %49 : vector<16x32xbf16> to vector<2x8x32xbf16>
    %51 = vector.extract_strided_slice %46 {offsets = [0, 0], sizes = [16, 32], strides = [1, 1]} : vector<16x128xbf16> to vector<16x32xbf16>
    %52 = vector.shape_cast %51 : vector<16x32xbf16> to vector<2x8x32xbf16>
    "tpu.trace_start"() <{level = 10 : i32, message = "bqd,bkd->bqk"}> : () -> ()
    %cst_20 = arith.constant dense<0.000000e+00> : vector<2x8x8xf32>
    %53 = tpu.matmul %48, %50, %cst_20 {dimension_numbers = #tpu.dot_dimension_numbers<[2], [2], [1], [1], [0, 0, 0, 1, 1, 1], [0], [0]>} : vector<2x8x32xbf16>, vector<2x8x32xbf16>, vector<2x8x8xf32> -> vector<2x8x8xf32>
    "tpu.trace_stop"() : () -> ()
    %cst_21 = arith.constant 0.176776692 : f32
    %54 = vector.broadcast %cst_21 : f32 to vector<2x8x8xf32>
    %55 = arith.mulf %53, %54 : vector<2x8x8xf32>
    %56 = arith.addf %55, %7 : vector<2x8x8xf32>
    %cst_22 = arith.constant dense<0xFF800000> : vector<2x8xf32>
    %57 = vector.multi_reduction <maximumf>, %56, %cst_22 [2] : vector<2x8x8xf32> to vector<2x8xf32>
    %58 = vector.shape_cast %57 : vector<2x8xf32> to vector<2x8x1xf32>
    %59 = vector.broadcast %58 : vector<2x8x1xf32> to vector<2x8x8xf32>
    %60 = arith.subf %56, %59 : vector<2x8x8xf32>
    %61 = math.exp %60 : vector<2x8x8xf32>
    %cst_23 = arith.constant dense<0.000000e+00> : vector<2x8xf32>
    %62 = vector.multi_reduction <add>, %61, %cst_23 [2] : vector<2x8x8xf32> to vector<2x8xf32>
    %63 = vector.shape_cast %62 : vector<2x8xf32> to vector<2x8x1xf32>
    %64 = tpu.reciprocal %63 {approx = true} : vector<2x8x1xf32> -> vector<2x8x1xf32>
    %65 = vector.broadcast %64 : vector<2x8x1xf32> to vector<2x8x8xf32>
    %66 = arith.mulf %61, %65 : vector<2x8x8xf32>
    %67 = arith.truncf %66 : vector<2x8x8xf32> to vector<2x8x8xbf16>
    "tpu.trace_start"() <{level = 10 : i32, message = "bqk,bkd->bqd"}> : () -> ()
    %cst_24 = arith.constant dense<0.000000e+00> : vector<2x8x32xf32>
    %68 = tpu.matmul %67, %52, %cst_24 {dimension_numbers = #tpu.dot_dimension_numbers<[2], [1], [1], [2], [0, 0, 0, 1, 1, 2], [0], [0]>} : vector<2x8x8xbf16>, vector<2x8x32xbf16>, vector<2x8x32xf32> -> vector<2x8x32xf32>
    "tpu.trace_stop"() : () -> ()
    %69 = vector.shape_cast %68 : vector<2x8x32xf32> to vector<16x32xf32>
    %70 = vector.extract_strided_slice %42 {offsets = [0, 32], sizes = [16, 32], strides = [1, 1]} : vector<16x128xbf16> to vector<16x32xbf16>
    %71 = vector.shape_cast %70 : vector<16x32xbf16> to vector<2x8x32xbf16>
    %72 = vector.extract_strided_slice %44 {offsets = [0, 32], sizes = [16, 32], strides = [1, 1]} : vector<16x128xbf16> to vector<16x32xbf16>
    %73 = vector.shape_cast %72 : vector<16x32xbf16> to vector<2x8x32xbf16>
    %74 = vector.extract_strided_slice %46 {offsets = [0, 32], sizes = [16, 32], strides = [1, 1]} : vector<16x128xbf16> to vector<16x32xbf16>
    %75 = vector.shape_cast %74 : vector<16x32xbf16> to vector<2x8x32xbf16>
    "tpu.trace_start"() <{level = 10 : i32, message = "bqd,bkd->bqk"}> : () -> ()
    %cst_25 = arith.constant dense<0.000000e+00> : vector<2x8x8xf32>
    %76 = tpu.matmul %71, %73, %cst_25 {dimension_numbers = #tpu.dot_dimension_numbers<[2], [2], [1], [1], [0, 0, 0, 1, 1, 1], [0], [0]>} : vector<2x8x32xbf16>, vector<2x8x32xbf16>, vector<2x8x8xf32> -> vector<2x8x8xf32>
    "tpu.trace_stop"() : () -> ()
    %cst_26 = arith.constant 0.176776692 : f32
    %77 = vector.broadcast %cst_26 : f32 to vector<2x8x8xf32>
    %78 = arith.mulf %76, %77 : vector<2x8x8xf32>
    %79 = arith.addf %78, %7 : vector<2x8x8xf32>
    %cst_27 = arith.constant dense<0xFF800000> : vector<2x8xf32>
    %80 = vector.multi_reduction <maximumf>, %79, %cst_27 [2] : vector<2x8x8xf32> to vector<2x8xf32>
    %81 = vector.shape_cast %80 : vector<2x8xf32> to vector<2x8x1xf32>
    %82 = vector.broadcast %81 : vector<2x8x1xf32> to vector<2x8x8xf32>
    %83 = arith.subf %79, %82 : vector<2x8x8xf32>
    %84 = math.exp %83 : vector<2x8x8xf32>
    %cst_28 = arith.constant dense<0.000000e+00> : vector<2x8xf32>
    %85 = vector.multi_reduction <add>, %84, %cst_28 [2] : vector<2x8x8xf32> to vector<2x8xf32>
    %86 = vector.shape_cast %85 : vector<2x8xf32> to vector<2x8x1xf32>
    %87 = tpu.reciprocal %86 {approx = true} : vector<2x8x1xf32> -> vector<2x8x1xf32>
    %88 = vector.broadcast %87 : vector<2x8x1xf32> to vector<2x8x8xf32>
    %89 = arith.mulf %84, %88 : vector<2x8x8xf32>
    %90 = arith.truncf %89 : vector<2x8x8xf32> to vector<2x8x8xbf16>
    "tpu.trace_start"() <{level = 10 : i32, message = "bqk,bkd->bqd"}> : () -> ()
    %cst_29 = arith.constant dense<0.000000e+00> : vector<2x8x32xf32>
    %91 = tpu.matmul %90, %75, %cst_29 {dimension_numbers = #tpu.dot_dimension_numbers<[2], [1], [1], [2], [0, 0, 0, 1, 1, 2], [0], [0]>} : vector<2x8x8xbf16>, vector<2x8x32xbf16>, vector<2x8x32xf32> -> vector<2x8x32xf32>
    "tpu.trace_stop"() : () -> ()
    %92 = vector.shape_cast %91 : vector<2x8x32xf32> to vector<16x32xf32>
    %93 = vector.extract_strided_slice %42 {offsets = [0, 64], sizes = [16, 32], strides = [1, 1]} : vector<16x128xbf16> to vector<16x32xbf16>
    %94 = vector.shape_cast %93 : vector<16x32xbf16> to vector<2x8x32xbf16>
    %95 = vector.extract_strided_slice %44 {offsets = [0, 64], sizes = [16, 32], strides = [1, 1]} : vector<16x128xbf16> to vector<16x32xbf16>
    %96 = vector.shape_cast %95 : vector<16x32xbf16> to vector<2x8x32xbf16>
    %97 = vector.extract_strided_slice %46 {offsets = [0, 64], sizes = [16, 32], strides = [1, 1]} : vector<16x128xbf16> to vector<16x32xbf16>
    %98 = vector.shape_cast %97 : vector<16x32xbf16> to vector<2x8x32xbf16>
    "tpu.trace_start"() <{level = 10 : i32, message = "bqd,bkd->bqk"}> : () -> ()
    %cst_30 = arith.constant dense<0.000000e+00> : vector<2x8x8xf32>
    %99 = tpu.matmul %94, %96, %cst_30 {dimension_numbers = #tpu.dot_dimension_numbers<[2], [2], [1], [1], [0, 0, 0, 1, 1, 1], [0], [0]>} : vector<2x8x32xbf16>, vector<2x8x32xbf16>, vector<2x8x8xf32> -> vector<2x8x8xf32>
    "tpu.trace_stop"() : () -> ()
    %cst_31 = arith.constant 0.176776692 : f32
    %100 = vector.broadcast %cst_31 : f32 to vector<2x8x8xf32>
    %101 = arith.mulf %99, %100 : vector<2x8x8xf32>
    %102 = arith.addf %101, %7 : vector<2x8x8xf32>
    %cst_32 = arith.constant dense<0xFF800000> : vector<2x8xf32>
    %103 = vector.multi_reduction <maximumf>, %102, %cst_32 [2] : vector<2x8x8xf32> to vector<2x8xf32>
    %104 = vector.shape_cast %103 : vector<2x8xf32> to vector<2x8x1xf32>
    %105 = vector.broadcast %104 : vector<2x8x1xf32> to vector<2x8x8xf32>
    %106 = arith.subf %102, %105 : vector<2x8x8xf32>
    %107 = math.exp %106 : vector<2x8x8xf32>
    %cst_33 = arith.constant dense<0.000000e+00> : vector<2x8xf32>
    %108 = vector.multi_reduction <add>, %107, %cst_33 [2] : vector<2x8x8xf32> to vector<2x8xf32>
    %109 = vector.shape_cast %108 : vector<2x8xf32> to vector<2x8x1xf32>
    %110 = tpu.reciprocal %109 {approx = true} : vector<2x8x1xf32> -> vector<2x8x1xf32>
    %111 = vector.broadcast %110 : vector<2x8x1xf32> to vector<2x8x8xf32>
    %112 = arith.mulf %107, %111 : vector<2x8x8xf32>
    %113 = arith.truncf %112 : vector<2x8x8xf32> to vector<2x8x8xbf16>
    "tpu.trace_start"() <{level = 10 : i32, message = "bqk,bkd->bqd"}> : () -> ()
    %cst_34 = arith.constant dense<0.000000e+00> : vector<2x8x32xf32>
    %114 = tpu.matmul %113, %98, %cst_34 {dimension_numbers = #tpu.dot_dimension_numbers<[2], [1], [1], [2], [0, 0, 0, 1, 1, 2], [0], [0]>} : vector<2x8x8xbf16>, vector<2x8x32xbf16>, vector<2x8x32xf32> -> vector<2x8x32xf32>
    "tpu.trace_stop"() : () -> ()
    %115 = vector.shape_cast %114 : vector<2x8x32xf32> to vector<16x32xf32>
    %116 = vector.extract_strided_slice %42 {offsets = [0, 96], sizes = [16, 32], strides = [1, 1]} : vector<16x128xbf16> to vector<16x32xbf16>
    %117 = vector.shape_cast %116 : vector<16x32xbf16> to vector<2x8x32xbf16>
    %118 = vector.extract_strided_slice %44 {offsets = [0, 96], sizes = [16, 32], strides = [1, 1]} : vector<16x128xbf16> to vector<16x32xbf16>
    %119 = vector.shape_cast %118 : vector<16x32xbf16> to vector<2x8x32xbf16>
    %120 = vector.extract_strided_slice %46 {offsets = [0, 96], sizes = [16, 32], strides = [1, 1]} : vector<16x128xbf16> to vector<16x32xbf16>
    %121 = vector.shape_cast %120 : vector<16x32xbf16> to vector<2x8x32xbf16>
    "tpu.trace_start"() <{level = 10 : i32, message = "bqd,bkd->bqk"}> : () -> ()
    %cst_35 = arith.constant dense<0.000000e+00> : vector<2x8x8xf32>
    %122 = tpu.matmul %117, %119, %cst_35 {dimension_numbers = #tpu.dot_dimension_numbers<[2], [2], [1], [1], [0, 0, 0, 1, 1, 1], [0], [0]>} : vector<2x8x32xbf16>, vector<2x8x32xbf16>, vector<2x8x8xf32> -> vector<2x8x8xf32>
    "tpu.trace_stop"() : () -> ()
    %cst_36 = arith.constant 0.176776692 : f32
    %123 = vector.broadcast %cst_36 : f32 to vector<2x8x8xf32>
    %124 = arith.mulf %122, %123 : vector<2x8x8xf32>
    %125 = arith.addf %124, %7 : vector<2x8x8xf32>
    %cst_37 = arith.constant dense<0xFF800000> : vector<2x8xf32>
    %126 = vector.multi_reduction <maximumf>, %125, %cst_37 [2] : vector<2x8x8xf32> to vector<2x8xf32>
    %127 = vector.shape_cast %126 : vector<2x8xf32> to vector<2x8x1xf32>
    %128 = vector.broadcast %127 : vector<2x8x1xf32> to vector<2x8x8xf32>
    %129 = arith.subf %125, %128 : vector<2x8x8xf32>
    %130 = math.exp %129 : vector<2x8x8xf32>
    %cst_38 = arith.constant dense<0.000000e+00> : vector<2x8xf32>
    %131 = vector.multi_reduction <add>, %130, %cst_38 [2] : vector<2x8x8xf32> to vector<2x8xf32>
    %132 = vector.shape_cast %131 : vector<2x8xf32> to vector<2x8x1xf32>
    %133 = tpu.reciprocal %132 {approx = true} : vector<2x8x1xf32> -> vector<2x8x1xf32>
    %134 = vector.broadcast %133 : vector<2x8x1xf32> to vector<2x8x8xf32>
    %135 = arith.mulf %130, %134 : vector<2x8x8xf32>
    %136 = arith.truncf %135 : vector<2x8x8xf32> to vector<2x8x8xbf16>
    "tpu.trace_start"() <{level = 10 : i32, message = "bqk,bkd->bqd"}> : () -> ()
    %cst_39 = arith.constant dense<0.000000e+00> : vector<2x8x32xf32>
    %137 = tpu.matmul %136, %121, %cst_39 {dimension_numbers = #tpu.dot_dimension_numbers<[2], [1], [1], [2], [0, 0, 0, 1, 1, 2], [0], [0]>} : vector<2x8x8xbf16>, vector<2x8x32xbf16>, vector<2x8x32xf32> -> vector<2x8x32xf32>
    "tpu.trace_stop"() : () -> ()
    %138 = vector.shape_cast %137 : vector<2x8x32xf32> to vector<16x32xf32>
    %139 = tpu.concatenate %69, %92, %115, %138 in 1 : vector<16x32xf32>, vector<16x32xf32>, vector<16x32xf32>, vector<16x32xf32> -> vector<16x128xf32>
    %140 = arith.truncf %139 : vector<16x128xf32> to vector<16x128xbf16>
    %c0_40 = arith.constant 0 : index
    %c0_41 = arith.constant 0 : index
    %c0_42 = arith.constant 0 : index
    %141 = vector.load %arg7[%c0_40, %c0_41, %c0_42] : memref<2x128x128xbf16, #tpu.memory_space<vmem>>, vector<1x128x128xbf16>
    %142 = vector.shape_cast %141 : vector<1x128x128xbf16> to vector<128x128xbf16>
    %cst_43 = arith.constant dense<0.000000e+00> : vector<16x128xf32>
    %143 = tpu.matmul %140, %142, %cst_43 {dimension_numbers = #tpu.dot_dimension_numbers<[1], [0], [0], [1], [0, 0, 1, 1], [], []>} : vector<16x128xbf16>, vector<128x128xbf16>, vector<16x128xf32> -> vector<16x128xf32>
    %c0_44 = arith.constant 0 : index
    %c0_45 = arith.constant 0 : index
    %c0_46 = arith.constant 0 : index
    %144 = vector.load %arg8[%c0_44, %c0_45, %c0_46] : memref<2x1x128xf32, #tpu.memory_space<vmem>>, vector<1x1x128xf32>
    %145 = vector.shape_cast %144 : vector<1x1x128xf32> to vector<1x128xf32>
    %146 = vector.broadcast %145 : vector<1x128xf32> to vector<16x128xf32>
    %147 = arith.addf %143, %146 : vector<16x128xf32>
    %148 = arith.addf %32, %147 : vector<16x128xf32>
    %c0_47 = arith.constant 0 : index
    %c0_48 = arith.constant 0 : index
    %c0_49 = arith.constant 0 : index
    %149 = vector.load %arg9[%c0_47, %c0_48, %c0_49] : memref<2x1x128xf32, #tpu.memory_space<vmem>>, vector<1x1x128xf32>
    %150 = vector.shape_cast %149 : vector<1x1x128xf32> to vector<1x128xf32>
    %c0_50 = arith.constant 0 : index
    %c0_51 = arith.constant 0 : index
    %c0_52 = arith.constant 0 : index
    %151 = vector.load %arg10[%c0_50, %c0_51, %c0_52] : memref<2x1x128xf32, #tpu.memory_space<vmem>>, vector<1x1x128xf32>
    %152 = vector.shape_cast %151 : vector<1x1x128xf32> to vector<1x128xf32>
    %cst_53 = arith.constant dense<0.000000e+00> : vector<16xf32>
    %153 = vector.multi_reduction <add>, %148, %cst_53 [1] : vector<16x128xf32> to vector<16xf32>
    %154 = vector.shape_cast %153 : vector<16xf32> to vector<16x1xf32>
    %cst_54 = arith.constant 1.280000e+02 : f32
    %155 = vector.broadcast %cst_54 : f32 to vector<16x1xf32>
    %156 = arith.divf %154, %155 : vector<16x1xf32>
    %157 = vector.broadcast %156 : vector<16x1xf32> to vector<16x128xf32>
    %158 = arith.subf %148, %157 : vector<16x128xf32>
    %159 = arith.mulf %158, %158 : vector<16x128xf32>
    %cst_55 = arith.constant dense<0.000000e+00> : vector<16xf32>
    %160 = vector.multi_reduction <add>, %159, %cst_55 [1] : vector<16x128xf32> to vector<16xf32>
    %161 = vector.shape_cast %160 : vector<16xf32> to vector<16x1xf32>
    %cst_56 = arith.constant 1.280000e+02 : f32
    %162 = vector.broadcast %cst_56 : f32 to vector<16x1xf32>
    %163 = arith.divf %161, %162 : vector<16x1xf32>
    %164 = vector.broadcast %156 : vector<16x1xf32> to vector<16x128xf32>
    %165 = arith.subf %148, %164 : vector<16x128xf32>
    %cst_57 = arith.constant 9.99999996E-13 : f32
    %166 = vector.broadcast %cst_57 : f32 to vector<16x1xf32>
    %167 = arith.addf %163, %166 : vector<16x1xf32>
    %168 = math.rsqrt %167 : vector<16x1xf32>
    %169 = vector.broadcast %168 : vector<16x1xf32> to vector<16x128xf32>
    %170 = arith.mulf %165, %169 : vector<16x128xf32>
    %171 = vector.broadcast %150 : vector<1x128xf32> to vector<16x128xf32>
    %172 = arith.mulf %170, %171 : vector<16x128xf32>
    %173 = vector.broadcast %152 : vector<1x128xf32> to vector<16x128xf32>
    %174 = arith.addf %172, %173 : vector<16x128xf32>
    %175 = arith.truncf %174 : vector<16x128xf32> to vector<16x128xbf16>
    %c0_58 = arith.constant 0 : index
    %c0_59 = arith.constant 0 : index
    %c0_60 = arith.constant 0 : index
    %176 = vector.load %arg11[%c0_58, %c0_59, %c0_60] : memref<2x128x256xbf16, #tpu.memory_space<vmem>>, vector<1x128x256xbf16>
    %177 = vector.shape_cast %176 : vector<1x128x256xbf16> to vector<128x256xbf16>
    %cst_61 = arith.constant dense<0.000000e+00> : vector<16x256xf32>
    %178 = tpu.matmul %175, %177, %cst_61 {dimension_numbers = #tpu.dot_dimension_numbers<[1], [0], [0], [1], [0, 0, 1, 1], [], []>} : vector<16x128xbf16>, vector<128x256xbf16>, vector<16x256xf32> -> vector<16x256xf32>
    %c0_62 = arith.constant 0 : index
    %c0_63 = arith.constant 0 : index
    %c0_64 = arith.constant 0 : index
    %179 = vector.load %arg12[%c0_62, %c0_63, %c0_64] : memref<2x1x256xf32, #tpu.memory_space<vmem>>, vector<1x1x256xf32>
    %180 = vector.shape_cast %179 : vector<1x1x256xf32> to vector<1x256xf32>
    %181 = vector.broadcast %180 : vector<1x256xf32> to vector<16x256xf32>
    %182 = arith.addf %178, %181 : vector<16x256xf32>
    %183 = arith.mulf %182, %182 : vector<16x256xf32>
    %184 = arith.mulf %182, %183 : vector<16x256xf32>
    %cst_65 = arith.constant 4.471500e-02 : f32
    %185 = vector.broadcast %cst_65 : f32 to vector<16x256xf32>
    %186 = arith.mulf %185, %184 : vector<16x256xf32>
    %187 = arith.addf %182, %186 : vector<16x256xf32>
    %cst_66 = arith.constant 0.797884583 : f32
    %188 = vector.broadcast %cst_66 : f32 to vector<16x256xf32>
    %189 = arith.mulf %188, %187 : vector<16x256xf32>
    %190 = math.tanh %189 : vector<16x256xf32>
    %cst_67 = arith.constant 1.000000e+00 : f32
    %191 = vector.broadcast %cst_67 : f32 to vector<16x256xf32>
    %192 = arith.addf %191, %190 : vector<16x256xf32>
    %cst_68 = arith.constant 5.000000e-01 : f32
    %193 = vector.broadcast %cst_68 : f32 to vector<16x256xf32>
    %194 = arith.mulf %193, %192 : vector<16x256xf32>
    %195 = arith.mulf %182, %194 : vector<16x256xf32>
    %196 = arith.truncf %195 : vector<16x256xf32> to vector<16x256xbf16>
    %c0_69 = arith.constant 0 : index
    %c0_70 = arith.constant 0 : index
    %c0_71 = arith.constant 0 : index
    %197 = vector.load %arg13[%c0_69, %c0_70, %c0_71] : memref<2x256x128xbf16, #tpu.memory_space<vmem>>, vector<1x256x128xbf16>
    %198 = vector.shape_cast %197 : vector<1x256x128xbf16> to vector<256x128xbf16>
    %cst_72 = arith.constant dense<0.000000e+00> : vector<16x128xf32>
    %199 = tpu.matmul %196, %198, %cst_72 {dimension_numbers = #tpu.dot_dimension_numbers<[1], [0], [0], [1], [0, 0, 1, 1], [], []>} : vector<16x256xbf16>, vector<256x128xbf16>, vector<16x128xf32> -> vector<16x128xf32>
    %c0_73 = arith.constant 0 : index
    %c0_74 = arith.constant 0 : index
    %c0_75 = arith.constant 0 : index
    %200 = vector.load %arg14[%c0_73, %c0_74, %c0_75] : memref<2x1x128xf32, #tpu.memory_space<vmem>>, vector<1x1x128xf32>
    %201 = vector.shape_cast %200 : vector<1x1x128xf32> to vector<1x128xf32>
    %202 = vector.broadcast %201 : vector<1x128xf32> to vector<16x128xf32>
    %203 = arith.addf %199, %202 : vector<16x128xf32>
    %204 = arith.addf %174, %203 : vector<16x128xf32>
    %c0_76 = arith.constant 0 : index
    %c0_77 = arith.constant 0 : index
    %c0_78 = arith.constant 0 : index
    %205 = vector.load %arg15[%c0_76, %c0_77, %c0_78] : memref<2x1x128xf32, #tpu.memory_space<vmem>>, vector<1x1x128xf32>
    %206 = vector.shape_cast %205 : vector<1x1x128xf32> to vector<1x128xf32>
    %c0_79 = arith.constant 0 : index
    %c0_80 = arith.constant 0 : index
    %c0_81 = arith.constant 0 : index
    %207 = vector.load %arg16[%c0_79, %c0_80, %c0_81] : memref<2x1x128xf32, #tpu.memory_space<vmem>>, vector<1x1x128xf32>
    %208 = vector.shape_cast %207 : vector<1x1x128xf32> to vector<1x128xf32>
    %cst_82 = arith.constant dense<0.000000e+00> : vector<16xf32>
    %209 = vector.multi_reduction <add>, %204, %cst_82 [1] : vector<16x128xf32> to vector<16xf32>
    %210 = vector.shape_cast %209 : vector<16xf32> to vector<16x1xf32>
    %cst_83 = arith.constant 1.280000e+02 : f32
    %211 = vector.broadcast %cst_83 : f32 to vector<16x1xf32>
    %212 = arith.divf %210, %211 : vector<16x1xf32>
    %213 = vector.broadcast %212 : vector<16x1xf32> to vector<16x128xf32>
    %214 = arith.subf %204, %213 : vector<16x128xf32>
    %215 = arith.mulf %214, %214 : vector<16x128xf32>
    %cst_84 = arith.constant dense<0.000000e+00> : vector<16xf32>
    %216 = vector.multi_reduction <add>, %215, %cst_84 [1] : vector<16x128xf32> to vector<16xf32>
    %217 = vector.shape_cast %216 : vector<16xf32> to vector<16x1xf32>
    %cst_85 = arith.constant 1.280000e+02 : f32
    %218 = vector.broadcast %cst_85 : f32 to vector<16x1xf32>
    %219 = arith.divf %217, %218 : vector<16x1xf32>
    %220 = vector.broadcast %212 : vector<16x1xf32> to vector<16x128xf32>
    %221 = arith.subf %204, %220 : vector<16x128xf32>
    %cst_86 = arith.constant 9.99999996E-13 : f32
    %222 = vector.broadcast %cst_86 : f32 to vector<16x1xf32>
    %223 = arith.addf %219, %222 : vector<16x1xf32>
    %224 = math.rsqrt %223 : vector<16x1xf32>
    %225 = vector.broadcast %224 : vector<16x1xf32> to vector<16x128xf32>
    %226 = arith.mulf %221, %225 : vector<16x128xf32>
    %227 = vector.broadcast %206 : vector<1x128xf32> to vector<16x128xf32>
    %228 = arith.mulf %226, %227 : vector<16x128xf32>
    %229 = vector.broadcast %208 : vector<1x128xf32> to vector<16x128xf32>
    %230 = arith.addf %228, %229 : vector<16x128xf32>
    %231 = arith.truncf %230 : vector<16x128xf32> to vector<16x128xbf16>
    %c1 = arith.constant 1 : index
    %c0_87 = arith.constant 0 : index
    %c0_88 = arith.constant 0 : index
    %232 = vector.load %arg5[%c1, %c0_87, %c0_88] : memref<2x128x384xbf16, #tpu.memory_space<vmem>>, vector<1x128x384xbf16>
    %233 = vector.shape_cast %232 : vector<1x128x384xbf16> to vector<128x384xbf16>
    %cst_89 = arith.constant dense<0.000000e+00> : vector<16x384xf32>
    %234 = tpu.matmul %231, %233, %cst_89 {dimension_numbers = #tpu.dot_dimension_numbers<[1], [0], [0], [1], [0, 0, 1, 1], [], []>} : vector<16x128xbf16>, vector<128x384xbf16>, vector<16x384xf32> -> vector<16x384xf32>
    %c1_90 = arith.constant 1 : index
    %c0_91 = arith.constant 0 : index
    %c0_92 = arith.constant 0 : index
    %235 = vector.load %arg6[%c1_90, %c0_91, %c0_92] : memref<2x1x384xf32, #tpu.memory_space<vmem>>, vector<1x1x384xf32>
    %236 = vector.shape_cast %235 : vector<1x1x384xf32> to vector<1x384xf32>
    %237 = vector.broadcast %236 : vector<1x384xf32> to vector<16x384xf32>
    %238 = arith.addf %234, %237 : vector<16x384xf32>
    %239 = vector.extract_strided_slice %238 {offsets = [0, 0], sizes = [16, 128], strides = [1, 1]} : vector<16x384xf32> to vector<16x128xf32>
    %240 = arith.truncf %239 : vector<16x128xf32> to vector<16x128xbf16>
    %241 = vector.extract_strided_slice %238 {offsets = [0, 128], sizes = [16, 128], strides = [1, 1]} : vector<16x384xf32> to vector<16x128xf32>
    %242 = arith.truncf %241 : vector<16x128xf32> to vector<16x128xbf16>
    %243 = vector.extract_strided_slice %238 {offsets = [0, 256], sizes = [16, 128], strides = [1, 1]} : vector<16x384xf32> to vector<16x128xf32>
    %244 = arith.truncf %243 : vector<16x128xf32> to vector<16x128xbf16>
    %245 = vector.extract_strided_slice %240 {offsets = [0, 0], sizes = [16, 32], strides = [1, 1]} : vector<16x128xbf16> to vector<16x32xbf16>
    %246 = vector.shape_cast %245 : vector<16x32xbf16> to vector<2x8x32xbf16>
    %247 = vector.extract_strided_slice %242 {offsets = [0, 0], sizes = [16, 32], strides = [1, 1]} : vector<16x128xbf16> to vector<16x32xbf16>
    %248 = vector.shape_cast %247 : vector<16x32xbf16> to vector<2x8x32xbf16>
    %249 = vector.extract_strided_slice %244 {offsets = [0, 0], sizes = [16, 32], strides = [1, 1]} : vector<16x128xbf16> to vector<16x32xbf16>
    %250 = vector.shape_cast %249 : vector<16x32xbf16> to vector<2x8x32xbf16>
    "tpu.trace_start"() <{level = 10 : i32, message = "bqd,bkd->bqk"}> : () -> ()
    %cst_93 = arith.constant dense<0.000000e+00> : vector<2x8x8xf32>
    %251 = tpu.matmul %246, %248, %cst_93 {dimension_numbers = #tpu.dot_dimension_numbers<[2], [2], [1], [1], [0, 0, 0, 1, 1, 1], [0], [0]>} : vector<2x8x32xbf16>, vector<2x8x32xbf16>, vector<2x8x8xf32> -> vector<2x8x8xf32>
    "tpu.trace_stop"() : () -> ()
    %cst_94 = arith.constant 0.176776692 : f32
    %252 = vector.broadcast %cst_94 : f32 to vector<2x8x8xf32>
    %253 = arith.mulf %251, %252 : vector<2x8x8xf32>
    %254 = arith.addf %253, %7 : vector<2x8x8xf32>
    %cst_95 = arith.constant dense<0xFF800000> : vector<2x8xf32>
    %255 = vector.multi_reduction <maximumf>, %254, %cst_95 [2] : vector<2x8x8xf32> to vector<2x8xf32>
    %256 = vector.shape_cast %255 : vector<2x8xf32> to vector<2x8x1xf32>
    %257 = vector.broadcast %256 : vector<2x8x1xf32> to vector<2x8x8xf32>
    %258 = arith.subf %254, %257 : vector<2x8x8xf32>
    %259 = math.exp %258 : vector<2x8x8xf32>
    %cst_96 = arith.constant dense<0.000000e+00> : vector<2x8xf32>
    %260 = vector.multi_reduction <add>, %259, %cst_96 [2] : vector<2x8x8xf32> to vector<2x8xf32>
    %261 = vector.shape_cast %260 : vector<2x8xf32> to vector<2x8x1xf32>
    %262 = tpu.reciprocal %261 {approx = true} : vector<2x8x1xf32> -> vector<2x8x1xf32>
    %263 = vector.broadcast %262 : vector<2x8x1xf32> to vector<2x8x8xf32>
    %264 = arith.mulf %259, %263 : vector<2x8x8xf32>
    %265 = arith.truncf %264 : vector<2x8x8xf32> to vector<2x8x8xbf16>
    "tpu.trace_start"() <{level = 10 : i32, message = "bqk,bkd->bqd"}> : () -> ()
    %cst_97 = arith.constant dense<0.000000e+00> : vector<2x8x32xf32>
    %266 = tpu.matmul %265, %250, %cst_97 {dimension_numbers = #tpu.dot_dimension_numbers<[2], [1], [1], [2], [0, 0, 0, 1, 1, 2], [0], [0]>} : vector<2x8x8xbf16>, vector<2x8x32xbf16>, vector<2x8x32xf32> -> vector<2x8x32xf32>
    "tpu.trace_stop"() : () -> ()
    %267 = vector.shape_cast %266 : vector<2x8x32xf32> to vector<16x32xf32>
    %268 = vector.extract_strided_slice %240 {offsets = [0, 32], sizes = [16, 32], strides = [1, 1]} : vector<16x128xbf16> to vector<16x32xbf16>
    %269 = vector.shape_cast %268 : vector<16x32xbf16> to vector<2x8x32xbf16>
    %270 = vector.extract_strided_slice %242 {offsets = [0, 32], sizes = [16, 32], strides = [1, 1]} : vector<16x128xbf16> to vector<16x32xbf16>
    %271 = vector.shape_cast %270 : vector<16x32xbf16> to vector<2x8x32xbf16>
    %272 = vector.extract_strided_slice %244 {offsets = [0, 32], sizes = [16, 32], strides = [1, 1]} : vector<16x128xbf16> to vector<16x32xbf16>
    %273 = vector.shape_cast %272 : vector<16x32xbf16> to vector<2x8x32xbf16>
    "tpu.trace_start"() <{level = 10 : i32, message = "bqd,bkd->bqk"}> : () -> ()
    %cst_98 = arith.constant dense<0.000000e+00> : vector<2x8x8xf32>
    %274 = tpu.matmul %269, %271, %cst_98 {dimension_numbers = #tpu.dot_dimension_numbers<[2], [2], [1], [1], [0, 0, 0, 1, 1, 1], [0], [0]>} : vector<2x8x32xbf16>, vector<2x8x32xbf16>, vector<2x8x8xf32> -> vector<2x8x8xf32>
    "tpu.trace_stop"() : () -> ()
    %cst_99 = arith.constant 0.176776692 : f32
    %275 = vector.broadcast %cst_99 : f32 to vector<2x8x8xf32>
    %276 = arith.mulf %274, %275 : vector<2x8x8xf32>
    %277 = arith.addf %276, %7 : vector<2x8x8xf32>
    %cst_100 = arith.constant dense<0xFF800000> : vector<2x8xf32>
    %278 = vector.multi_reduction <maximumf>, %277, %cst_100 [2] : vector<2x8x8xf32> to vector<2x8xf32>
    %279 = vector.shape_cast %278 : vector<2x8xf32> to vector<2x8x1xf32>
    %280 = vector.broadcast %279 : vector<2x8x1xf32> to vector<2x8x8xf32>
    %281 = arith.subf %277, %280 : vector<2x8x8xf32>
    %282 = math.exp %281 : vector<2x8x8xf32>
    %cst_101 = arith.constant dense<0.000000e+00> : vector<2x8xf32>
    %283 = vector.multi_reduction <add>, %282, %cst_101 [2] : vector<2x8x8xf32> to vector<2x8xf32>
    %284 = vector.shape_cast %283 : vector<2x8xf32> to vector<2x8x1xf32>
    %285 = tpu.reciprocal %284 {approx = true} : vector<2x8x1xf32> -> vector<2x8x1xf32>
    %286 = vector.broadcast %285 : vector<2x8x1xf32> to vector<2x8x8xf32>
    %287 = arith.mulf %282, %286 : vector<2x8x8xf32>
    %288 = arith.truncf %287 : vector<2x8x8xf32> to vector<2x8x8xbf16>
    "tpu.trace_start"() <{level = 10 : i32, message = "bqk,bkd->bqd"}> : () -> ()
    %cst_102 = arith.constant dense<0.000000e+00> : vector<2x8x32xf32>
    %289 = tpu.matmul %288, %273, %cst_102 {dimension_numbers = #tpu.dot_dimension_numbers<[2], [1], [1], [2], [0, 0, 0, 1, 1, 2], [0], [0]>} : vector<2x8x8xbf16>, vector<2x8x32xbf16>, vector<2x8x32xf32> -> vector<2x8x32xf32>
    "tpu.trace_stop"() : () -> ()
    %290 = vector.shape_cast %289 : vector<2x8x32xf32> to vector<16x32xf32>
    %291 = vector.extract_strided_slice %240 {offsets = [0, 64], sizes = [16, 32], strides = [1, 1]} : vector<16x128xbf16> to vector<16x32xbf16>
    %292 = vector.shape_cast %291 : vector<16x32xbf16> to vector<2x8x32xbf16>
    %293 = vector.extract_strided_slice %242 {offsets = [0, 64], sizes = [16, 32], strides = [1, 1]} : vector<16x128xbf16> to vector<16x32xbf16>
    %294 = vector.shape_cast %293 : vector<16x32xbf16> to vector<2x8x32xbf16>
    %295 = vector.extract_strided_slice %244 {offsets = [0, 64], sizes = [16, 32], strides = [1, 1]} : vector<16x128xbf16> to vector<16x32xbf16>
    %296 = vector.shape_cast %295 : vector<16x32xbf16> to vector<2x8x32xbf16>
    "tpu.trace_start"() <{level = 10 : i32, message = "bqd,bkd->bqk"}> : () -> ()
    %cst_103 = arith.constant dense<0.000000e+00> : vector<2x8x8xf32>
    %297 = tpu.matmul %292, %294, %cst_103 {dimension_numbers = #tpu.dot_dimension_numbers<[2], [2], [1], [1], [0, 0, 0, 1, 1, 1], [0], [0]>} : vector<2x8x32xbf16>, vector<2x8x32xbf16>, vector<2x8x8xf32> -> vector<2x8x8xf32>
    "tpu.trace_stop"() : () -> ()
    %cst_104 = arith.constant 0.176776692 : f32
    %298 = vector.broadcast %cst_104 : f32 to vector<2x8x8xf32>
    %299 = arith.mulf %297, %298 : vector<2x8x8xf32>
    %300 = arith.addf %299, %7 : vector<2x8x8xf32>
    %cst_105 = arith.constant dense<0xFF800000> : vector<2x8xf32>
    %301 = vector.multi_reduction <maximumf>, %300, %cst_105 [2] : vector<2x8x8xf32> to vector<2x8xf32>
    %302 = vector.shape_cast %301 : vector<2x8xf32> to vector<2x8x1xf32>
    %303 = vector.broadcast %302 : vector<2x8x1xf32> to vector<2x8x8xf32>
    %304 = arith.subf %300, %303 : vector<2x8x8xf32>
    %305 = math.exp %304 : vector<2x8x8xf32>
    %cst_106 = arith.constant dense<0.000000e+00> : vector<2x8xf32>
    %306 = vector.multi_reduction <add>, %305, %cst_106 [2] : vector<2x8x8xf32> to vector<2x8xf32>
    %307 = vector.shape_cast %306 : vector<2x8xf32> to vector<2x8x1xf32>
    %308 = tpu.reciprocal %307 {approx = true} : vector<2x8x1xf32> -> vector<2x8x1xf32>
    %309 = vector.broadcast %308 : vector<2x8x1xf32> to vector<2x8x8xf32>
    %310 = arith.mulf %305, %309 : vector<2x8x8xf32>
    %311 = arith.truncf %310 : vector<2x8x8xf32> to vector<2x8x8xbf16>
    "tpu.trace_start"() <{level = 10 : i32, message = "bqk,bkd->bqd"}> : () -> ()
    %cst_107 = arith.constant dense<0.000000e+00> : vector<2x8x32xf32>
    %312 = tpu.matmul %311, %296, %cst_107 {dimension_numbers = #tpu.dot_dimension_numbers<[2], [1], [1], [2], [0, 0, 0, 1, 1, 2], [0], [0]>} : vector<2x8x8xbf16>, vector<2x8x32xbf16>, vector<2x8x32xf32> -> vector<2x8x32xf32>
    "tpu.trace_stop"() : () -> ()
    %313 = vector.shape_cast %312 : vector<2x8x32xf32> to vector<16x32xf32>
    %314 = vector.extract_strided_slice %240 {offsets = [0, 96], sizes = [16, 32], strides = [1, 1]} : vector<16x128xbf16> to vector<16x32xbf16>
    %315 = vector.shape_cast %314 : vector<16x32xbf16> to vector<2x8x32xbf16>
    %316 = vector.extract_strided_slice %242 {offsets = [0, 96], sizes = [16, 32], strides = [1, 1]} : vector<16x128xbf16> to vector<16x32xbf16>
    %317 = vector.shape_cast %316 : vector<16x32xbf16> to vector<2x8x32xbf16>
    %318 = vector.extract_strided_slice %244 {offsets = [0, 96], sizes = [16, 32], strides = [1, 1]} : vector<16x128xbf16> to vector<16x32xbf16>
    %319 = vector.shape_cast %318 : vector<16x32xbf16> to vector<2x8x32xbf16>
    "tpu.trace_start"() <{level = 10 : i32, message = "bqd,bkd->bqk"}> : () -> ()
    %cst_108 = arith.constant dense<0.000000e+00> : vector<2x8x8xf32>
    %320 = tpu.matmul %315, %317, %cst_108 {dimension_numbers = #tpu.dot_dimension_numbers<[2], [2], [1], [1], [0, 0, 0, 1, 1, 1], [0], [0]>} : vector<2x8x32xbf16>, vector<2x8x32xbf16>, vector<2x8x8xf32> -> vector<2x8x8xf32>
    "tpu.trace_stop"() : () -> ()
    %cst_109 = arith.constant 0.176776692 : f32
    %321 = vector.broadcast %cst_109 : f32 to vector<2x8x8xf32>
    %322 = arith.mulf %320, %321 : vector<2x8x8xf32>
    %323 = arith.addf %322, %7 : vector<2x8x8xf32>
    %cst_110 = arith.constant dense<0xFF800000> : vector<2x8xf32>
    %324 = vector.multi_reduction <maximumf>, %323, %cst_110 [2] : vector<2x8x8xf32> to vector<2x8xf32>
    %325 = vector.shape_cast %324 : vector<2x8xf32> to vector<2x8x1xf32>
    %326 = vector.broadcast %325 : vector<2x8x1xf32> to vector<2x8x8xf32>
    %327 = arith.subf %323, %326 : vector<2x8x8xf32>
    %328 = math.exp %327 : vector<2x8x8xf32>
    %cst_111 = arith.constant dense<0.000000e+00> : vector<2x8xf32>
    %329 = vector.multi_reduction <add>, %328, %cst_111 [2] : vector<2x8x8xf32> to vector<2x8xf32>
    %330 = vector.shape_cast %329 : vector<2x8xf32> to vector<2x8x1xf32>
    %331 = tpu.reciprocal %330 {approx = true} : vector<2x8x1xf32> -> vector<2x8x1xf32>
    %332 = vector.broadcast %331 : vector<2x8x1xf32> to vector<2x8x8xf32>
    %333 = arith.mulf %328, %332 : vector<2x8x8xf32>
    %334 = arith.truncf %333 : vector<2x8x8xf32> to vector<2x8x8xbf16>
    "tpu.trace_start"() <{level = 10 : i32, message = "bqk,bkd->bqd"}> : () -> ()
    %cst_112 = arith.constant dense<0.000000e+00> : vector<2x8x32xf32>
    %335 = tpu.matmul %334, %319, %cst_112 {dimension_numbers = #tpu.dot_dimension_numbers<[2], [1], [1], [2], [0, 0, 0, 1, 1, 2], [0], [0]>} : vector<2x8x8xbf16>, vector<2x8x32xbf16>, vector<2x8x32xf32> -> vector<2x8x32xf32>
    "tpu.trace_stop"() : () -> ()
    %336 = vector.shape_cast %335 : vector<2x8x32xf32> to vector<16x32xf32>
    %337 = tpu.concatenate %267, %290, %313, %336 in 1 : vector<16x32xf32>, vector<16x32xf32>, vector<16x32xf32>, vector<16x32xf32> -> vector<16x128xf32>
    %338 = arith.truncf %337 : vector<16x128xf32> to vector<16x128xbf16>
    %c1_113 = arith.constant 1 : index
    %c0_114 = arith.constant 0 : index
    %c0_115 = arith.constant 0 : index
    %339 = vector.load %arg7[%c1_113, %c0_114, %c0_115] : memref<2x128x128xbf16, #tpu.memory_space<vmem>>, vector<1x128x128xbf16>
    %340 = vector.shape_cast %339 : vector<1x128x128xbf16> to vector<128x128xbf16>
    %cst_116 = arith.constant dense<0.000000e+00> : vector<16x128xf32>
    %341 = tpu.matmul %338, %340, %cst_116 {dimension_numbers = #tpu.dot_dimension_numbers<[1], [0], [0], [1], [0, 0, 1, 1], [], []>} : vector<16x128xbf16>, vector<128x128xbf16>, vector<16x128xf32> -> vector<16x128xf32>
    %c1_117 = arith.constant 1 : index
    %c0_118 = arith.constant 0 : index
    %c0_119 = arith.constant 0 : index
    %342 = vector.load %arg8[%c1_117, %c0_118, %c0_119] : memref<2x1x128xf32, #tpu.memory_space<vmem>>, vector<1x1x128xf32>
    %343 = vector.shape_cast %342 : vector<1x1x128xf32> to vector<1x128xf32>
    %344 = vector.broadcast %343 : vector<1x128xf32> to vector<16x128xf32>
    %345 = arith.addf %341, %344 : vector<16x128xf32>
    %346 = arith.addf %230, %345 : vector<16x128xf32>
    %c1_120 = arith.constant 1 : index
    %c0_121 = arith.constant 0 : index
    %c0_122 = arith.constant 0 : index
    %347 = vector.load %arg9[%c1_120, %c0_121, %c0_122] : memref<2x1x128xf32, #tpu.memory_space<vmem>>, vector<1x1x128xf32>
    %348 = vector.shape_cast %347 : vector<1x1x128xf32> to vector<1x128xf32>
    %c1_123 = arith.constant 1 : index
    %c0_124 = arith.constant 0 : index
    %c0_125 = arith.constant 0 : index
    %349 = vector.load %arg10[%c1_123, %c0_124, %c0_125] : memref<2x1x128xf32, #tpu.memory_space<vmem>>, vector<1x1x128xf32>
    %350 = vector.shape_cast %349 : vector<1x1x128xf32> to vector<1x128xf32>
    %cst_126 = arith.constant dense<0.000000e+00> : vector<16xf32>
    %351 = vector.multi_reduction <add>, %346, %cst_126 [1] : vector<16x128xf32> to vector<16xf32>
    %352 = vector.shape_cast %351 : vector<16xf32> to vector<16x1xf32>
    %cst_127 = arith.constant 1.280000e+02 : f32
    %353 = vector.broadcast %cst_127 : f32 to vector<16x1xf32>
    %354 = arith.divf %352, %353 : vector<16x1xf32>
    %355 = vector.broadcast %354 : vector<16x1xf32> to vector<16x128xf32>
    %356 = arith.subf %346, %355 : vector<16x128xf32>
    %357 = arith.mulf %356, %356 : vector<16x128xf32>
    %cst_128 = arith.constant dense<0.000000e+00> : vector<16xf32>
    %358 = vector.multi_reduction <add>, %357, %cst_128 [1] : vector<16x128xf32> to vector<16xf32>
    %359 = vector.shape_cast %358 : vector<16xf32> to vector<16x1xf32>
    %cst_129 = arith.constant 1.280000e+02 : f32
    %360 = vector.broadcast %cst_129 : f32 to vector<16x1xf32>
    %361 = arith.divf %359, %360 : vector<16x1xf32>
    %362 = vector.broadcast %354 : vector<16x1xf32> to vector<16x128xf32>
    %363 = arith.subf %346, %362 : vector<16x128xf32>
    %cst_130 = arith.constant 9.99999996E-13 : f32
    %364 = vector.broadcast %cst_130 : f32 to vector<16x1xf32>
    %365 = arith.addf %361, %364 : vector<16x1xf32>
    %366 = math.rsqrt %365 : vector<16x1xf32>
    %367 = vector.broadcast %366 : vector<16x1xf32> to vector<16x128xf32>
    %368 = arith.mulf %363, %367 : vector<16x128xf32>
    %369 = vector.broadcast %348 : vector<1x128xf32> to vector<16x128xf32>
    %370 = arith.mulf %368, %369 : vector<16x128xf32>
    %371 = vector.broadcast %350 : vector<1x128xf32> to vector<16x128xf32>
    %372 = arith.addf %370, %371 : vector<16x128xf32>
    %373 = arith.truncf %372 : vector<16x128xf32> to vector<16x128xbf16>
    %c1_131 = arith.constant 1 : index
    %c0_132 = arith.constant 0 : index
    %c0_133 = arith.constant 0 : index
    %374 = vector.load %arg11[%c1_131, %c0_132, %c0_133] : memref<2x128x256xbf16, #tpu.memory_space<vmem>>, vector<1x128x256xbf16>
    %375 = vector.shape_cast %374 : vector<1x128x256xbf16> to vector<128x256xbf16>
    %cst_134 = arith.constant dense<0.000000e+00> : vector<16x256xf32>
    %376 = tpu.matmul %373, %375, %cst_134 {dimension_numbers = #tpu.dot_dimension_numbers<[1], [0], [0], [1], [0, 0, 1, 1], [], []>} : vector<16x128xbf16>, vector<128x256xbf16>, vector<16x256xf32> -> vector<16x256xf32>
    %c1_135 = arith.constant 1 : index
    %c0_136 = arith.constant 0 : index
    %c0_137 = arith.constant 0 : index
    %377 = vector.load %arg12[%c1_135, %c0_136, %c0_137] : memref<2x1x256xf32, #tpu.memory_space<vmem>>, vector<1x1x256xf32>
    %378 = vector.shape_cast %377 : vector<1x1x256xf32> to vector<1x256xf32>
    %379 = vector.broadcast %378 : vector<1x256xf32> to vector<16x256xf32>
    %380 = arith.addf %376, %379 : vector<16x256xf32>
    %381 = arith.mulf %380, %380 : vector<16x256xf32>
    %382 = arith.mulf %380, %381 : vector<16x256xf32>
    %cst_138 = arith.constant 4.471500e-02 : f32
    %383 = vector.broadcast %cst_138 : f32 to vector<16x256xf32>
    %384 = arith.mulf %383, %382 : vector<16x256xf32>
    %385 = arith.addf %380, %384 : vector<16x256xf32>
    %cst_139 = arith.constant 0.797884583 : f32
    %386 = vector.broadcast %cst_139 : f32 to vector<16x256xf32>
    %387 = arith.mulf %386, %385 : vector<16x256xf32>
    %388 = math.tanh %387 : vector<16x256xf32>
    %cst_140 = arith.constant 1.000000e+00 : f32
    %389 = vector.broadcast %cst_140 : f32 to vector<16x256xf32>
    %390 = arith.addf %389, %388 : vector<16x256xf32>
    %cst_141 = arith.constant 5.000000e-01 : f32
    %391 = vector.broadcast %cst_141 : f32 to vector<16x256xf32>
    %392 = arith.mulf %391, %390 : vector<16x256xf32>
    %393 = arith.mulf %380, %392 : vector<16x256xf32>
    %394 = arith.truncf %393 : vector<16x256xf32> to vector<16x256xbf16>
    %c1_142 = arith.constant 1 : index
    %c0_143 = arith.constant 0 : index
    %c0_144 = arith.constant 0 : index
    %395 = vector.load %arg13[%c1_142, %c0_143, %c0_144] : memref<2x256x128xbf16, #tpu.memory_space<vmem>>, vector<1x256x128xbf16>
    %396 = vector.shape_cast %395 : vector<1x256x128xbf16> to vector<256x128xbf16>
    %cst_145 = arith.constant dense<0.000000e+00> : vector<16x128xf32>
    %397 = tpu.matmul %394, %396, %cst_145 {dimension_numbers = #tpu.dot_dimension_numbers<[1], [0], [0], [1], [0, 0, 1, 1], [], []>} : vector<16x256xbf16>, vector<256x128xbf16>, vector<16x128xf32> -> vector<16x128xf32>
    %c1_146 = arith.constant 1 : index
    %c0_147 = arith.constant 0 : index
    %c0_148 = arith.constant 0 : index
    %398 = vector.load %arg14[%c1_146, %c0_147, %c0_148] : memref<2x1x128xf32, #tpu.memory_space<vmem>>, vector<1x1x128xf32>
    %399 = vector.shape_cast %398 : vector<1x1x128xf32> to vector<1x128xf32>
    %400 = vector.broadcast %399 : vector<1x128xf32> to vector<16x128xf32>
    %401 = arith.addf %397, %400 : vector<16x128xf32>
    %402 = arith.addf %372, %401 : vector<16x128xf32>
    %c1_149 = arith.constant 1 : index
    %c0_150 = arith.constant 0 : index
    %c0_151 = arith.constant 0 : index
    %403 = vector.load %arg15[%c1_149, %c0_150, %c0_151] : memref<2x1x128xf32, #tpu.memory_space<vmem>>, vector<1x1x128xf32>
    %404 = vector.shape_cast %403 : vector<1x1x128xf32> to vector<1x128xf32>
    %c1_152 = arith.constant 1 : index
    %c0_153 = arith.constant 0 : index
    %c0_154 = arith.constant 0 : index
    %405 = vector.load %arg16[%c1_152, %c0_153, %c0_154] : memref<2x1x128xf32, #tpu.memory_space<vmem>>, vector<1x1x128xf32>
    %406 = vector.shape_cast %405 : vector<1x1x128xf32> to vector<1x128xf32>
    %cst_155 = arith.constant dense<0.000000e+00> : vector<16xf32>
    %407 = vector.multi_reduction <add>, %402, %cst_155 [1] : vector<16x128xf32> to vector<16xf32>
    %408 = vector.shape_cast %407 : vector<16xf32> to vector<16x1xf32>
    %cst_156 = arith.constant 1.280000e+02 : f32
    %409 = vector.broadcast %cst_156 : f32 to vector<16x1xf32>
    %410 = arith.divf %408, %409 : vector<16x1xf32>
    %411 = vector.broadcast %410 : vector<16x1xf32> to vector<16x128xf32>
    %412 = arith.subf %402, %411 : vector<16x128xf32>
    %413 = arith.mulf %412, %412 : vector<16x128xf32>
    %cst_157 = arith.constant dense<0.000000e+00> : vector<16xf32>
    %414 = vector.multi_reduction <add>, %413, %cst_157 [1] : vector<16x128xf32> to vector<16xf32>
    %415 = vector.shape_cast %414 : vector<16xf32> to vector<16x1xf32>
    %cst_158 = arith.constant 1.280000e+02 : f32
    %416 = vector.broadcast %cst_158 : f32 to vector<16x1xf32>
    %417 = arith.divf %415, %416 : vector<16x1xf32>
    %418 = vector.broadcast %410 : vector<16x1xf32> to vector<16x128xf32>
    %419 = arith.subf %402, %418 : vector<16x128xf32>
    %cst_159 = arith.constant 9.99999996E-13 : f32
    %420 = vector.broadcast %cst_159 : f32 to vector<16x1xf32>
    %421 = arith.addf %417, %420 : vector<16x1xf32>
    %422 = math.rsqrt %421 : vector<16x1xf32>
    %423 = vector.broadcast %422 : vector<16x1xf32> to vector<16x128xf32>
    %424 = arith.mulf %419, %423 : vector<16x128xf32>
    %425 = vector.broadcast %404 : vector<1x128xf32> to vector<16x128xf32>
    %426 = arith.mulf %424, %425 : vector<16x128xf32>
    %427 = vector.broadcast %406 : vector<1x128xf32> to vector<16x128xf32>
    %428 = arith.addf %426, %427 : vector<16x128xf32>
    %429 = arith.truncf %428 : vector<16x128xf32> to vector<16x128xbf16>
    %c0_160 = arith.constant 0 : index
    %c0_161 = arith.constant 0 : index
    %430 = vector.load %arg17[%c0_160, %c0_161] : memref<128x512xbf16, #tpu.memory_space<vmem>>, vector<128x512xbf16>
    %cst_162 = arith.constant dense<0.000000e+00> : vector<16x512xf32>
    %431 = tpu.matmul %429, %430, %cst_162 {dimension_numbers = #tpu.dot_dimension_numbers<[1], [0], [0], [1], [0, 0, 1, 1], [], []>} : vector<16x128xbf16>, vector<128x512xbf16>, vector<16x512xf32> -> vector<16x512xf32>
    %c0_163 = arith.constant 0 : index
    %c0_164 = arith.constant 0 : index
    %432 = vector.load %arg18[%c0_163, %c0_164] : memref<1x512xf32, #tpu.memory_space<vmem>>, vector<1x512xf32>
    %433 = vector.broadcast %432 : vector<1x512xf32> to vector<16x512xf32>
    %434 = arith.addf %431, %433 : vector<16x512xf32>
    %435 = vector.shape_cast %434 : vector<16x512xf32> to vector<2x8x512xf32>
    %cst_165 = arith.constant 0.000000e+00 : f32
    %436 = vector.broadcast %cst_165 : f32 to vector<2x128xf32>
    %cst_166 = arith.constant 0.000000e+00 : f32
    %437 = vector.broadcast %cst_166 : f32 to vector<2x128xf32>
    %438 = vector.extract_strided_slice %435 {offsets = [0, 0, 0], sizes = [2, 1, 512], strides = [1, 1, 1]} : vector<2x8x512xf32> to vector<2x1x512xf32>
    %439 = vector.shape_cast %438 : vector<2x1x512xf32> to vector<2x512xf32>
    %440 = arith.truncf %436 : vector<2x128xf32> to vector<2x128xbf16>
    %c0_167 = arith.constant 0 : index
    %c0_168 = arith.constant 0 : index
    %441 = vector.load %arg19[%c0_167, %c0_168] : memref<128x512xbf16, #tpu.memory_space<vmem>>, vector<128x512xbf16>
    %cst_169 = arith.constant dense<0.000000e+00> : vector<2x512xf32>
    %442 = tpu.matmul %440, %441, %cst_169 {dimension_numbers = #tpu.dot_dimension_numbers<[1], [0], [0], [1], [0, 0, 1, 1], [], []>} : vector<2x128xbf16>, vector<128x512xbf16>, vector<2x512xf32> -> vector<2x512xf32>
    %443 = arith.addf %439, %442 : vector<2x512xf32>
    %444 = vector.extract_strided_slice %443 {offsets = [0, 0], sizes = [2, 384], strides = [1, 1]} : vector<2x512xf32> to vector<2x384xf32>
    %445 = arith.negf %444 : vector<2x384xf32>
    %446 = math.exp %445 : vector<2x384xf32>
    %cst_170 = arith.constant 1.000000e+00 : f32
    %447 = vector.broadcast %cst_170 : f32 to vector<2x384xf32>
    %448 = arith.addf %447, %446 : vector<2x384xf32>
    %449 = arith.divf %447, %448 : vector<2x384xf32>
    %450 = vector.extract_strided_slice %449 {offsets = [0, 0], sizes = [2, 128], strides = [1, 1]} : vector<2x384xf32> to vector<2x128xf32>
    %451 = vector.extract_strided_slice %449 {offsets = [0, 128], sizes = [2, 128], strides = [1, 1]} : vector<2x384xf32> to vector<2x128xf32>
    %452 = vector.extract_strided_slice %449 {offsets = [0, 256], sizes = [2, 128], strides = [1, 1]} : vector<2x384xf32> to vector<2x128xf32>
    %453 = vector.extract_strided_slice %443 {offsets = [0, 384], sizes = [2, 128], strides = [1, 1]} : vector<2x512xf32> to vector<2x128xf32>
    %454 = math.tanh %453 : vector<2x128xf32>
    %455 = arith.mulf %451, %437 : vector<2x128xf32>
    %456 = arith.mulf %450, %454 : vector<2x128xf32>
    %457 = arith.addf %455, %456 : vector<2x128xf32>
    %458 = math.tanh %457 : vector<2x128xf32>
    %459 = arith.mulf %452, %458 : vector<2x128xf32>
    %460 = vector.extract_strided_slice %435 {offsets = [0, 1, 0], sizes = [2, 1, 512], strides = [1, 1, 1]} : vector<2x8x512xf32> to vector<2x1x512xf32>
    %461 = vector.shape_cast %460 : vector<2x1x512xf32> to vector<2x512xf32>
    %462 = arith.truncf %459 : vector<2x128xf32> to vector<2x128xbf16>
    %c0_171 = arith.constant 0 : index
    %c0_172 = arith.constant 0 : index
    %463 = vector.load %arg19[%c0_171, %c0_172] : memref<128x512xbf16, #tpu.memory_space<vmem>>, vector<128x512xbf16>
    %cst_173 = arith.constant dense<0.000000e+00> : vector<2x512xf32>
    %464 = tpu.matmul %462, %463, %cst_173 {dimension_numbers = #tpu.dot_dimension_numbers<[1], [0], [0], [1], [0, 0, 1, 1], [], []>} : vector<2x128xbf16>, vector<128x512xbf16>, vector<2x512xf32> -> vector<2x512xf32>
    %465 = arith.addf %461, %464 : vector<2x512xf32>
    %466 = vector.extract_strided_slice %465 {offsets = [0, 0], sizes = [2, 384], strides = [1, 1]} : vector<2x512xf32> to vector<2x384xf32>
    %467 = arith.negf %466 : vector<2x384xf32>
    %468 = math.exp %467 : vector<2x384xf32>
    %cst_174 = arith.constant 1.000000e+00 : f32
    %469 = vector.broadcast %cst_174 : f32 to vector<2x384xf32>
    %470 = arith.addf %469, %468 : vector<2x384xf32>
    %471 = arith.divf %469, %470 : vector<2x384xf32>
    %472 = vector.extract_strided_slice %471 {offsets = [0, 0], sizes = [2, 128], strides = [1, 1]} : vector<2x384xf32> to vector<2x128xf32>
    %473 = vector.extract_strided_slice %471 {offsets = [0, 128], sizes = [2, 128], strides = [1, 1]} : vector<2x384xf32> to vector<2x128xf32>
    %474 = vector.extract_strided_slice %471 {offsets = [0, 256], sizes = [2, 128], strides = [1, 1]} : vector<2x384xf32> to vector<2x128xf32>
    %475 = vector.extract_strided_slice %465 {offsets = [0, 384], sizes = [2, 128], strides = [1, 1]} : vector<2x512xf32> to vector<2x128xf32>
    %476 = math.tanh %475 : vector<2x128xf32>
    %477 = arith.mulf %473, %457 : vector<2x128xf32>
    %478 = arith.mulf %472, %476 : vector<2x128xf32>
    %479 = arith.addf %477, %478 : vector<2x128xf32>
    %480 = math.tanh %479 : vector<2x128xf32>
    %481 = arith.mulf %474, %480 : vector<2x128xf32>
    %482 = vector.extract_strided_slice %435 {offsets = [0, 2, 0], sizes = [2, 1, 512], strides = [1, 1, 1]} : vector<2x8x512xf32> to vector<2x1x512xf32>
    %483 = vector.shape_cast %482 : vector<2x1x512xf32> to vector<2x512xf32>
    %484 = arith.truncf %481 : vector<2x128xf32> to vector<2x128xbf16>
    %c0_175 = arith.constant 0 : index
    %c0_176 = arith.constant 0 : index
    %485 = vector.load %arg19[%c0_175, %c0_176] : memref<128x512xbf16, #tpu.memory_space<vmem>>, vector<128x512xbf16>
    %cst_177 = arith.constant dense<0.000000e+00> : vector<2x512xf32>
    %486 = tpu.matmul %484, %485, %cst_177 {dimension_numbers = #tpu.dot_dimension_numbers<[1], [0], [0], [1], [0, 0, 1, 1], [], []>} : vector<2x128xbf16>, vector<128x512xbf16>, vector<2x512xf32> -> vector<2x512xf32>
    %487 = arith.addf %483, %486 : vector<2x512xf32>
    %488 = vector.extract_strided_slice %487 {offsets = [0, 0], sizes = [2, 384], strides = [1, 1]} : vector<2x512xf32> to vector<2x384xf32>
    %489 = arith.negf %488 : vector<2x384xf32>
    %490 = math.exp %489 : vector<2x384xf32>
    %cst_178 = arith.constant 1.000000e+00 : f32
    %491 = vector.broadcast %cst_178 : f32 to vector<2x384xf32>
    %492 = arith.addf %491, %490 : vector<2x384xf32>
    %493 = arith.divf %491, %492 : vector<2x384xf32>
    %494 = vector.extract_strided_slice %493 {offsets = [0, 0], sizes = [2, 128], strides = [1, 1]} : vector<2x384xf32> to vector<2x128xf32>
    %495 = vector.extract_strided_slice %493 {offsets = [0, 128], sizes = [2, 128], strides = [1, 1]} : vector<2x384xf32> to vector<2x128xf32>
    %496 = vector.extract_strided_slice %493 {offsets = [0, 256], sizes = [2, 128], strides = [1, 1]} : vector<2x384xf32> to vector<2x128xf32>
    %497 = vector.extract_strided_slice %487 {offsets = [0, 384], sizes = [2, 128], strides = [1, 1]} : vector<2x512xf32> to vector<2x128xf32>
    %498 = math.tanh %497 : vector<2x128xf32>
    %499 = arith.mulf %495, %479 : vector<2x128xf32>
    %500 = arith.mulf %494, %498 : vector<2x128xf32>
    %501 = arith.addf %499, %500 : vector<2x128xf32>
    %502 = math.tanh %501 : vector<2x128xf32>
    %503 = arith.mulf %496, %502 : vector<2x128xf32>
    %504 = vector.extract_strided_slice %435 {offsets = [0, 3, 0], sizes = [2, 1, 512], strides = [1, 1, 1]} : vector<2x8x512xf32> to vector<2x1x512xf32>
    %505 = vector.shape_cast %504 : vector<2x1x512xf32> to vector<2x512xf32>
    %506 = arith.truncf %503 : vector<2x128xf32> to vector<2x128xbf16>
    %c0_179 = arith.constant 0 : index
    %c0_180 = arith.constant 0 : index
    %507 = vector.load %arg19[%c0_179, %c0_180] : memref<128x512xbf16, #tpu.memory_space<vmem>>, vector<128x512xbf16>
    %cst_181 = arith.constant dense<0.000000e+00> : vector<2x512xf32>
    %508 = tpu.matmul %506, %507, %cst_181 {dimension_numbers = #tpu.dot_dimension_numbers<[1], [0], [0], [1], [0, 0, 1, 1], [], []>} : vector<2x128xbf16>, vector<128x512xbf16>, vector<2x512xf32> -> vector<2x512xf32>
    %509 = arith.addf %505, %508 : vector<2x512xf32>
    %510 = vector.extract_strided_slice %509 {offsets = [0, 0], sizes = [2, 384], strides = [1, 1]} : vector<2x512xf32> to vector<2x384xf32>
    %511 = arith.negf %510 : vector<2x384xf32>
    %512 = math.exp %511 : vector<2x384xf32>
    %cst_182 = arith.constant 1.000000e+00 : f32
    %513 = vector.broadcast %cst_182 : f32 to vector<2x384xf32>
    %514 = arith.addf %513, %512 : vector<2x384xf32>
    %515 = arith.divf %513, %514 : vector<2x384xf32>
    %516 = vector.extract_strided_slice %515 {offsets = [0, 0], sizes = [2, 128], strides = [1, 1]} : vector<2x384xf32> to vector<2x128xf32>
    %517 = vector.extract_strided_slice %515 {offsets = [0, 128], sizes = [2, 128], strides = [1, 1]} : vector<2x384xf32> to vector<2x128xf32>
    %518 = vector.extract_strided_slice %515 {offsets = [0, 256], sizes = [2, 128], strides = [1, 1]} : vector<2x384xf32> to vector<2x128xf32>
    %519 = vector.extract_strided_slice %509 {offsets = [0, 384], sizes = [2, 128], strides = [1, 1]} : vector<2x512xf32> to vector<2x128xf32>
    %520 = math.tanh %519 : vector<2x128xf32>
    %521 = arith.mulf %517, %501 : vector<2x128xf32>
    %522 = arith.mulf %516, %520 : vector<2x128xf32>
    %523 = arith.addf %521, %522 : vector<2x128xf32>
    %524 = math.tanh %523 : vector<2x128xf32>
    %525 = arith.mulf %518, %524 : vector<2x128xf32>
    %526 = vector.extract_strided_slice %435 {offsets = [0, 4, 0], sizes = [2, 1, 512], strides = [1, 1, 1]} : vector<2x8x512xf32> to vector<2x1x512xf32>
    %527 = vector.shape_cast %526 : vector<2x1x512xf32> to vector<2x512xf32>
    %528 = arith.truncf %525 : vector<2x128xf32> to vector<2x128xbf16>
    %c0_183 = arith.constant 0 : index
    %c0_184 = arith.constant 0 : index
    %529 = vector.load %arg19[%c0_183, %c0_184] : memref<128x512xbf16, #tpu.memory_space<vmem>>, vector<128x512xbf16>
    %cst_185 = arith.constant dense<0.000000e+00> : vector<2x512xf32>
    %530 = tpu.matmul %528, %529, %cst_185 {dimension_numbers = #tpu.dot_dimension_numbers<[1], [0], [0], [1], [0, 0, 1, 1], [], []>} : vector<2x128xbf16>, vector<128x512xbf16>, vector<2x512xf32> -> vector<2x512xf32>
    %531 = arith.addf %527, %530 : vector<2x512xf32>
    %532 = vector.extract_strided_slice %531 {offsets = [0, 0], sizes = [2, 384], strides = [1, 1]} : vector<2x512xf32> to vector<2x384xf32>
    %533 = arith.negf %532 : vector<2x384xf32>
    %534 = math.exp %533 : vector<2x384xf32>
    %cst_186 = arith.constant 1.000000e+00 : f32
    %535 = vector.broadcast %cst_186 : f32 to vector<2x384xf32>
    %536 = arith.addf %535, %534 : vector<2x384xf32>
    %537 = arith.divf %535, %536 : vector<2x384xf32>
    %538 = vector.extract_strided_slice %537 {offsets = [0, 0], sizes = [2, 128], strides = [1, 1]} : vector<2x384xf32> to vector<2x128xf32>
    %539 = vector.extract_strided_slice %537 {offsets = [0, 128], sizes = [2, 128], strides = [1, 1]} : vector<2x384xf32> to vector<2x128xf32>
    %540 = vector.extract_strided_slice %537 {offsets = [0, 256], sizes = [2, 128], strides = [1, 1]} : vector<2x384xf32> to vector<2x128xf32>
    %541 = vector.extract_strided_slice %531 {offsets = [0, 384], sizes = [2, 128], strides = [1, 1]} : vector<2x512xf32> to vector<2x128xf32>
    %542 = math.tanh %541 : vector<2x128xf32>
    %543 = arith.mulf %539, %523 : vector<2x128xf32>
    %544 = arith.mulf %538, %542 : vector<2x128xf32>
    %545 = arith.addf %543, %544 : vector<2x128xf32>
    %546 = math.tanh %545 : vector<2x128xf32>
    %547 = arith.mulf %540, %546 : vector<2x128xf32>
    %548 = vector.extract_strided_slice %435 {offsets = [0, 5, 0], sizes = [2, 1, 512], strides = [1, 1, 1]} : vector<2x8x512xf32> to vector<2x1x512xf32>
    %549 = vector.shape_cast %548 : vector<2x1x512xf32> to vector<2x512xf32>
    %550 = arith.truncf %547 : vector<2x128xf32> to vector<2x128xbf16>
    %c0_187 = arith.constant 0 : index
    %c0_188 = arith.constant 0 : index
    %551 = vector.load %arg19[%c0_187, %c0_188] : memref<128x512xbf16, #tpu.memory_space<vmem>>, vector<128x512xbf16>
    %cst_189 = arith.constant dense<0.000000e+00> : vector<2x512xf32>
    %552 = tpu.matmul %550, %551, %cst_189 {dimension_numbers = #tpu.dot_dimension_numbers<[1], [0], [0], [1], [0, 0, 1, 1], [], []>} : vector<2x128xbf16>, vector<128x512xbf16>, vector<2x512xf32> -> vector<2x512xf32>
    %553 = arith.addf %549, %552 : vector<2x512xf32>
    %554 = vector.extract_strided_slice %553 {offsets = [0, 0], sizes = [2, 384], strides = [1, 1]} : vector<2x512xf32> to vector<2x384xf32>
    %555 = arith.negf %554 : vector<2x384xf32>
    %556 = math.exp %555 : vector<2x384xf32>
    %cst_190 = arith.constant 1.000000e+00 : f32
    %557 = vector.broadcast %cst_190 : f32 to vector<2x384xf32>
    %558 = arith.addf %557, %556 : vector<2x384xf32>
    %559 = arith.divf %557, %558 : vector<2x384xf32>
    %560 = vector.extract_strided_slice %559 {offsets = [0, 0], sizes = [2, 128], strides = [1, 1]} : vector<2x384xf32> to vector<2x128xf32>
    %561 = vector.extract_strided_slice %559 {offsets = [0, 128], sizes = [2, 128], strides = [1, 1]} : vector<2x384xf32> to vector<2x128xf32>
    %562 = vector.extract_strided_slice %559 {offsets = [0, 256], sizes = [2, 128], strides = [1, 1]} : vector<2x384xf32> to vector<2x128xf32>
    %563 = vector.extract_strided_slice %553 {offsets = [0, 384], sizes = [2, 128], strides = [1, 1]} : vector<2x512xf32> to vector<2x128xf32>
    %564 = math.tanh %563 : vector<2x128xf32>
    %565 = arith.mulf %561, %545 : vector<2x128xf32>
    %566 = arith.mulf %560, %564 : vector<2x128xf32>
    %567 = arith.addf %565, %566 : vector<2x128xf32>
    %568 = math.tanh %567 : vector<2x128xf32>
    %569 = arith.mulf %562, %568 : vector<2x128xf32>
    %570 = vector.extract_strided_slice %435 {offsets = [0, 6, 0], sizes = [2, 1, 512], strides = [1, 1, 1]} : vector<2x8x512xf32> to vector<2x1x512xf32>
    %571 = vector.shape_cast %570 : vector<2x1x512xf32> to vector<2x512xf32>
    %572 = arith.truncf %569 : vector<2x128xf32> to vector<2x128xbf16>
    %c0_191 = arith.constant 0 : index
    %c0_192 = arith.constant 0 : index
    %573 = vector.load %arg19[%c0_191, %c0_192] : memref<128x512xbf16, #tpu.memory_space<vmem>>, vector<128x512xbf16>
    %cst_193 = arith.constant dense<0.000000e+00> : vector<2x512xf32>
    %574 = tpu.matmul %572, %573, %cst_193 {dimension_numbers = #tpu.dot_dimension_numbers<[1], [0], [0], [1], [0, 0, 1, 1], [], []>} : vector<2x128xbf16>, vector<128x512xbf16>, vector<2x512xf32> -> vector<2x512xf32>
    %575 = arith.addf %571, %574 : vector<2x512xf32>
    %576 = vector.extract_strided_slice %575 {offsets = [0, 0], sizes = [2, 384], strides = [1, 1]} : vector<2x512xf32> to vector<2x384xf32>
    %577 = arith.negf %576 : vector<2x384xf32>
    %578 = math.exp %577 : vector<2x384xf32>
    %cst_194 = arith.constant 1.000000e+00 : f32
    %579 = vector.broadcast %cst_194 : f32 to vector<2x384xf32>
    %580 = arith.addf %579, %578 : vector<2x384xf32>
    %581 = arith.divf %579, %580 : vector<2x384xf32>
    %582 = vector.extract_strided_slice %581 {offsets = [0, 0], sizes = [2, 128], strides = [1, 1]} : vector<2x384xf32> to vector<2x128xf32>
    %583 = vector.extract_strided_slice %581 {offsets = [0, 128], sizes = [2, 128], strides = [1, 1]} : vector<2x384xf32> to vector<2x128xf32>
    %584 = vector.extract_strided_slice %581 {offsets = [0, 256], sizes = [2, 128], strides = [1, 1]} : vector<2x384xf32> to vector<2x128xf32>
    %585 = vector.extract_strided_slice %575 {offsets = [0, 384], sizes = [2, 128], strides = [1, 1]} : vector<2x512xf32> to vector<2x128xf32>
    %586 = math.tanh %585 : vector<2x128xf32>
    %587 = arith.mulf %583, %567 : vector<2x128xf32>
    %588 = arith.mulf %582, %586 : vector<2x128xf32>
    %589 = arith.addf %587, %588 : vector<2x128xf32>
    %590 = math.tanh %589 : vector<2x128xf32>
    %591 = arith.mulf %584, %590 : vector<2x128xf32>
    %592 = vector.extract_strided_slice %435 {offsets = [0, 7, 0], sizes = [2, 1, 512], strides = [1, 1, 1]} : vector<2x8x512xf32> to vector<2x1x512xf32>
    %593 = vector.shape_cast %592 : vector<2x1x512xf32> to vector<2x512xf32>
    %594 = arith.truncf %591 : vector<2x128xf32> to vector<2x128xbf16>
    %c0_195 = arith.constant 0 : index
    %c0_196 = arith.constant 0 : index
    %595 = vector.load %arg19[%c0_195, %c0_196] : memref<128x512xbf16, #tpu.memory_space<vmem>>, vector<128x512xbf16>
    %cst_197 = arith.constant dense<0.000000e+00> : vector<2x512xf32>
    %596 = tpu.matmul %594, %595, %cst_197 {dimension_numbers = #tpu.dot_dimension_numbers<[1], [0], [0], [1], [0, 0, 1, 1], [], []>} : vector<2x128xbf16>, vector<128x512xbf16>, vector<2x512xf32> -> vector<2x512xf32>
    %597 = arith.addf %593, %596 : vector<2x512xf32>
    %598 = vector.extract_strided_slice %597 {offsets = [0, 0], sizes = [2, 384], strides = [1, 1]} : vector<2x512xf32> to vector<2x384xf32>
    %599 = arith.negf %598 : vector<2x384xf32>
    %600 = math.exp %599 : vector<2x384xf32>
    %cst_198 = arith.constant 1.000000e+00 : f32
    %601 = vector.broadcast %cst_198 : f32 to vector<2x384xf32>
    %602 = arith.addf %601, %600 : vector<2x384xf32>
    %603 = arith.divf %601, %602 : vector<2x384xf32>
    %604 = vector.extract_strided_slice %603 {offsets = [0, 0], sizes = [2, 128], strides = [1, 1]} : vector<2x384xf32> to vector<2x128xf32>
    %605 = vector.extract_strided_slice %603 {offsets = [0, 128], sizes = [2, 128], strides = [1, 1]} : vector<2x384xf32> to vector<2x128xf32>
    %606 = vector.extract_strided_slice %603 {offsets = [0, 256], sizes = [2, 128], strides = [1, 1]} : vector<2x384xf32> to vector<2x128xf32>
    %607 = vector.extract_strided_slice %597 {offsets = [0, 384], sizes = [2, 128], strides = [1, 1]} : vector<2x512xf32> to vector<2x128xf32>
    %608 = math.tanh %607 : vector<2x128xf32>
    %609 = arith.mulf %605, %589 : vector<2x128xf32>
    %610 = arith.mulf %604, %608 : vector<2x128xf32>
    %611 = arith.addf %609, %610 : vector<2x128xf32>
    %612 = math.tanh %611 : vector<2x128xf32>
    %613 = arith.mulf %606, %612 : vector<2x128xf32>
    %614 = arith.truncf %613 : vector<2x128xf32> to vector<2x128xbf16>
    %c0_199 = arith.constant 0 : index
    %c0_200 = arith.constant 0 : index
    %615 = vector.load %arg20[%c0_199, %c0_200] : memref<128x128xbf16, #tpu.memory_space<vmem>>, vector<128x128xbf16>
    %cst_201 = arith.constant dense<0.000000e+00> : vector<2x128xf32>
    %616 = tpu.matmul %614, %615, %cst_201 {dimension_numbers = #tpu.dot_dimension_numbers<[1], [0], [0], [1], [0, 0, 1, 1], [], []>} : vector<2x128xbf16>, vector<128x128xbf16>, vector<2x128xf32> -> vector<2x128xf32>
    %c0_202 = arith.constant 0 : index
    %c0_203 = arith.constant 0 : index
    %617 = vector.load %arg21[%c0_202, %c0_203] : memref<1x128xf32, #tpu.memory_space<vmem>>, vector<1x128xf32>
    %618 = vector.broadcast %617 : vector<1x128xf32> to vector<2x128xf32>
    %619 = arith.addf %616, %618 : vector<2x128xf32>
    %c0_204 = arith.constant 0 : index
    %c0_205 = arith.constant 0 : index
    %620 = vector.load %arg22[%c0_204, %c0_205] : memref<2x128xf32, #tpu.memory_space<vmem>>, vector<2x128xf32>
    tpu.vector_store %arg22[%c0_204, %c0_205], %619 {strides = array<i32>} : memref<2x128xf32, #tpu.memory_space<vmem>>, vector<2x128xf32>,
    return
  }
  func.func @transform_0(%arg0: i32) -> (i32, i32) {
    %c0_i32 = arith.constant 0 : i32
    %c0_i32_0 = arith.constant 0 : i32
    %c0_i32_1 = arith.constant 0 : i32
    return %c0_i32, %c0_i32_0 : i32, i32
  }
  func.func @transform_1(%arg0: i32) -> (i32, i32) {
    %c0_i32 = arith.constant 0 : i32
    %c0_i32_0 = arith.constant 0 : i32
    %c0_i32_1 = arith.constant 0 : i32
    return %c0_i32, %c0_i32_0 : i32, i32
  }
  func.func @transform_2(%arg0: i32) -> (i32, i32) {
    %c0_i32 = arith.constant 0 : i32
    %c0_i32_0 = arith.constant 0 : i32
    %c0_i32_1 = arith.constant 0 : i32
    return %c0_i32, %c0_i32_0 : i32, i32
  }
  func.func @transform_3(%arg0: i32) -> (i32, i32) {
    %c0_i32 = arith.constant 0 : i32
    %c0_i32_0 = arith.constant 0 : i32
    %c0_i32_1 = arith.constant 0 : i32
    return %c0_i32, %c0_i32_0 : i32, i32
  }
  func.func @transform_4(%arg0: i32) -> (i32, i32, i32) {
    %c0_i32 = arith.constant 0 : i32
    %c0_i32_0 = arith.constant 0 : i32
    %c0_i32_1 = arith.constant 0 : i32
    %c0_i32_2 = arith.constant 0 : i32
    return %c0_i32, %c0_i32_0, %c0_i32_1 : i32, i32, i32
  }
  func.func @transform_5(%arg0: i32) -> (i32, i32, i32) {
    %c0_i32 = arith.constant 0 : i32
    %c0_i32_0 = arith.constant 0 : i32
    %c0_i32_1 = arith.constant 0 : i32
    %c0_i32_2 = arith.constant 0 : i32
    return %c0_i32, %c0_i32_0, %c0_i32_1 : i32, i32, i32
  }
  func.func @transform_6(%arg0: i32) -> (i32, i32, i32) {
    %c0_i32 = arith.constant 0 : i32
    %c0_i32_0 = arith.constant 0 : i32
    %c0_i32_1 = arith.constant 0 : i32
    %c0_i32_2 = arith.constant 0 : i32
    return %c0_i32, %c0_i32_0, %c0_i32_1 : i32, i32, i32
  }
  func.func @transform_7(%arg0: i32) -> (i32, i32, i32) {
    %c0_i32 = arith.constant 0 : i32
    %c0_i32_0 = arith.constant 0 : i32
    %c0_i32_1 = arith.constant 0 : i32
    %c0_i32_2 = arith.constant 0 : i32
    return %c0_i32, %c0_i32_0, %c0_i32_1 : i32, i32, i32
  }
  func.func @transform_8(%arg0: i32) -> (i32, i32, i32) {
    %c0_i32 = arith.constant 0 : i32
    %c0_i32_0 = arith.constant 0 : i32
    %c0_i32_1 = arith.constant 0 : i32
    %c0_i32_2 = arith.constant 0 : i32
    return %c0_i32, %c0_i32_0, %c0_i32_1 : i32, i32, i32
  }
  func.func @transform_9(%arg0: i32) -> (i32, i32, i32) {
    %c0_i32 = arith.constant 0 : i32
    %c0_i32_0 = arith.constant 0 : i32
    %c0_i32_1 = arith.constant 0 : i32
    %c0_i32_2 = arith.constant 0 : i32
    return %c0_i32, %c0_i32_0, %c0_i32_1 : i32, i32, i32
  }
  func.func @transform_10(%arg0: i32) -> (i32, i32, i32) {
    %c0_i32 = arith.constant 0 : i32
    %c0_i32_0 = arith.constant 0 : i32
    %c0_i32_1 = arith.constant 0 : i32
    %c0_i32_2 = arith.constant 0 : i32
    return %c0_i32, %c0_i32_0, %c0_i32_1 : i32, i32, i32
  }
  func.func @transform_11(%arg0: i32) -> (i32, i32, i32) {
    %c0_i32 = arith.constant 0 : i32
    %c0_i32_0 = arith.constant 0 : i32
    %c0_i32_1 = arith.constant 0 : i32
    %c0_i32_2 = arith.constant 0 : i32
    return %c0_i32, %c0_i32_0, %c0_i32_1 : i32, i32, i32
  }
  func.func @transform_12(%arg0: i32) -> (i32, i32, i32) {
    %c0_i32 = arith.constant 0 : i32
    %c0_i32_0 = arith.constant 0 : i32
    %c0_i32_1 = arith.constant 0 : i32
    %c0_i32_2 = arith.constant 0 : i32
    return %c0_i32, %c0_i32_0, %c0_i32_1 : i32, i32, i32
  }
  func.func @transform_13(%arg0: i32) -> (i32, i32, i32) {
    %c0_i32 = arith.constant 0 : i32
    %c0_i32_0 = arith.constant 0 : i32
    %c0_i32_1 = arith.constant 0 : i32
    %c0_i32_2 = arith.constant 0 : i32
    return %c0_i32, %c0_i32_0, %c0_i32_1 : i32, i32, i32
  }
  func.func @transform_14(%arg0: i32) -> (i32, i32, i32) {
    %c0_i32 = arith.constant 0 : i32
    %c0_i32_0 = arith.constant 0 : i32
    %c0_i32_1 = arith.constant 0 : i32
    %c0_i32_2 = arith.constant 0 : i32
    return %c0_i32, %c0_i32_0, %c0_i32_1 : i32, i32, i32
  }
  func.func @transform_15(%arg0: i32) -> (i32, i32, i32) {
    %c0_i32 = arith.constant 0 : i32
    %c0_i32_0 = arith.constant 0 : i32
    %c0_i32_1 = arith.constant 0 : i32
    %c0_i32_2 = arith.constant 0 : i32
    return %c0_i32, %c0_i32_0, %c0_i32_1 : i32, i32, i32
  }
  func.func @transform_16(%arg0: i32) -> (i32, i32) {
    %c0_i32 = arith.constant 0 : i32
    %c0_i32_0 = arith.constant 0 : i32
    %c0_i32_1 = arith.constant 0 : i32
    return %c0_i32, %c0_i32_0 : i32, i32
  }
  func.func @transform_17(%arg0: i32) -> (i32, i32) {
    %c0_i32 = arith.constant 0 : i32
    %c0_i32_0 = arith.constant 0 : i32
    %c0_i32_1 = arith.constant 0 : i32
    return %c0_i32, %c0_i32_0 : i32, i32
  }
  func.func @transform_18(%arg0: i32) -> (i32, i32) {
    %c0_i32 = arith.constant 0 : i32
    %c0_i32_0 = arith.constant 0 : i32
    %c0_i32_1 = arith.constant 0 : i32
    return %c0_i32, %c0_i32_0 : i32, i32
  }
  func.func @transform_19(%arg0: i32) -> (i32, i32) {
    %c0_i32 = arith.constant 0 : i32
    %c0_i32_0 = arith.constant 0 : i32
    %c0_i32_1 = arith.constant 0 : i32
    return %c0_i32, %c0_i32_0 : i32, i32
  }
  func.func @transform_20(%arg0: i32) -> (i32, i32) {
    %c0_i32 = arith.constant 0 : i32
    %c0_i32_0 = arith.constant 0 : i32
    %c0_i32_1 = arith.constant 0 : i32
    return %c0_i32, %c0_i32_0 : i32, i32
  }
  func.func @transform_21(%arg0: i32) -> (i32, i32) {
    %c0_i32 = arith.constant 0 : i32
    %c0_i32_0 = arith.constant 0 : i32
    %c0_i32_1 = arith.constant 0 : i32
    return %c0_i32, %c0_i32_0 : i32, i32
  }
}

</mosaic_0001>

<bundles_post_ra>
// kernel: bert_lstm_classifier.1
= control target key start
LH: loop header
LB: loop body
LE: loop exit
PB: predicated region body
PF: predicated region fallthrough
CT: control target
= control target key end

     0   :  { %s8734_s0 = inlined_call_operand.vmem [shape: f32[16,128], index: 0, kind: input, shape index: {}]   ;;  %s8735_s1 = inlined_call_operand.vmem [shape: f32[2,8], index: 1, kind: input, shape index: {}]   ;;  %s8736_s2 = inlined_call_operand.vmem [shape: f32[1,128], index: 2, kind: input, shape index: {}]   ;;  %s8737_s3 = inlined_call_operand.vmem [shape: f32[1,128], index: 3, kind: input, shape index: {}]   ;;  %s8738_s4 = inlined_call_operand.hbm [shape: bf16[2,128,384], index: 4, kind: input, shape index: {}]   ;;  %s8739_s5 = inlined_call_operand.vmem [shape: f32[2,1,384], index: 5, kind: input, shape index: {}]   ;;  %s8740_s6 = inlined_call_operand.vmem [shape: bf16[2,128,128], index: 6, kind: input, shape index: {}]   ;;  %s8741_s7 = inlined_call_operand.vmem [shape: f32[2,1,128], index: 7, kind: input, shape index: {}]   ;;  %s8742_s8 = inlined_call_operand.vmem [shape: f32[2,1,128], index: 8, kind: input, shape index: {}]   ;;  %s8743_s9 = inlined_call_operand.vmem [shape: f32[2,1,128], index: 9, kind: input, shape index: {}]   ;;  %s8744_s10 = inlined_call_operand.hbm [shape: bf16[2,128,256], index: 10, kind: input, shape index: {}]   ;;  %s8745_s11 = inlined_call_operand.vmem [shape: f32[2,1,256], index: 11, kind: input, shape index: {}]   ;;  %s8746_s12 = inlined_call_operand.hbm [shape: bf16[2,256,128], index: 12, kind: input, shape index: {}]   ;;  %s8747_s13 = inlined_call_operand.vmem [shape: f32[2,1,128], index: 13, kind: input, shape index: {}]   ;;  %s8748_s14 = inlined_call_operand.vmem [shape: f32[2,1,128], index: 14, kind: input, shape index: {}]   ;;  %s8749_s15 = inlined_call_operand.vmem [shape: f32[2,1,128], index: 15, kind: input, shape index: {}]   ;;  %s8750_s16 = inlined_call_operand.hbm [shape: bf16[128,512], index: 16, kind: input, shape index: {}]   ;;  %s8751_s17 = inlined_call_operand.vmem [shape: f32[1,512], index: 17, kind: input, shape index: {}]   ;;  %s8752_s18 = inlined_call_operand.hbm [shape: bf16[128,512], index: 18, kind: input, shape index: {}]   ;;  %s8753_s19 = inlined_call_operand.vmem [shape: bf16[128,128], index: 19, kind: input, shape index: {}]   ;;  %s8754_s20 = inlined_call_operand.vmem [shape: f32[1,128], index: 20, kind: input, shape index: {}]   ;;  %s8755_s21 = inlined_call_operand.hbm [shape: f32[2,128], index: 21, kind: output, shape index: {}]  }
   0x1   :  { %8760 = sst [smem:[#allocation16_spill]] %s8734_s0 }
   0x2   :  { %8761 = sst [smem:[#allocation17_spill]] %s8735_s1 }
   0x3   :  { %8762 = sst [smem:[#allocation18_spill]] %s8736_s2 }
   0x4   :  { %8763 = sst [smem:[#allocation19_spill]] %s8737_s3 }
   0x5   :  { %8764 = sst [smem:[#allocation20_spill]] %s8738_s4 }
   0x6   :  { %8765 = sst [smem:[#allocation21_spill]] %s8739_s5 }
   0x7   :  { %26 = vsyncpa [#allocation3], 0 }
   0x8   :  { %27 = vsyncpa [#allocation6], 0 }
   0x9   :  { %28 = vsyncpa [#allocation9], 0 }
   0xa   :  { %29 = vsyncpa [#allocation4], 0  ;;  %s7373_s2 = smov [#allocation5]  }
   0xb   :  { %s65_s25 = sshll.u32 %s7373_s2, 4  ;;  %s66_s25 = int_to_ptr.vmem [resolvable:$true] %s65_s25 }
   0xc   :  { %s7253_s26 = scalar_lea.vmem %s66_s25, 4096  ;;  %p7258_p1 = scmp.lt.s32.totalorder %s66_s25, %s66_s25 }
   0xd   :  { %p7254_p0 = scmp.ne.s32.totalorder %s66_s25, %s7253_s26  ;;  %p7259_p2 = scmp.lt.s32.totalorder %s7253_s26, %s7253_s26 }
   0xf   :  { %p7260_p3 = por %p7259_p2, %p7258_p1 }
  0x11   :  { %p7261_p4 = pnand %p7260_p3, %p7254_p0 }
  0x13   :  { %7264 = shalt.err (!%p7261_p4)
}
  0x14   :  { %s7374_s27 = smov 128   ;;  %s7375_s3 = smov 8  }
  0x15   :  { %71 = dma.hbm_to_vmem [thread:$0]  %s8744_s10, 4096, %s66_s25, [#allocation6], %s7374_s27, %s7374_s27, %s7375_s3  }
  0x16   :  { %s7376_s0 = smov [#allocation8]  }
  0x17   :  { %s97_s4 = sshll.u32 %s7376_s0, 4  ;;  %s98_s4 = int_to_ptr.vmem [resolvable:$true] %s97_s4 }
  0x18   :  { %s7273_s30 = scalar_lea.vmem %s98_s4, 4096  ;;  %p7278_p6 = scmp.lt.s32.totalorder %s98_s4, %s98_s4 }
  0x19   :  { %p7274_p5 = scmp.ne.s32.totalorder %s98_s4, %s7273_s30  ;;  %p7279_p7 = scmp.lt.s32.totalorder %s7273_s30, %s7273_s30 }
  0x1b   :  { %p7280_p8 = por %p7279_p7, %p7278_p6 }
  0x1d   :  { %p7281_p9 = pnand %p7280_p8, %p7274_p5 }
  0x1f   :  { %7284 = shalt.err (!%p7281_p9)
}
  0x20   :  { %s7377_s5 = smov 256   ;;  %s7378_s22 = smov 16  }
  0x21   :  { %103 = dma.hbm_to_vmem [thread:$0]  %s8750_s16, 4096, %s98_s4, [#allocation9], %s7377_s5, %s7377_s5, %s7378_s22  }
  0x22   :  { %s7379_s10 = smov [#allocation2]  }
  0x23   :  { %s43_s24 = sshll.u32 %s7379_s10, 4  ;;  %s44_s24 = int_to_ptr.vmem [resolvable:$true] %s43_s24 }
  0x24   :  { %s7293_s2 = scalar_lea.vmem %s44_s24, 6144  ;;  %p7298_p11 = scmp.lt.s32.totalorder %s44_s24, %s44_s24 }
  0x25   :  { %p7294_p10 = scmp.ne.s32.totalorder %s44_s24, %s7293_s2  ;;  %p7299_p12 = scmp.lt.s32.totalorder %s7293_s2, %s7293_s2 }
  0x27   :  { %p7300_p13 = por %p7299_p12, %p7298_p11 }
  0x29   :  { %p7301_p0 = pnand %p7300_p13, %p7294_p10 }
  0x2b   :  { %7304 = shalt.err (!%p7301_p0)
}
  0x2c   :  { %s7380_s25 = smov 192   ;;  %s7381_s26 = smov 12  }
  0x2d   :  { %s8766_s28 = sld [smem:[#allocation20_spill]]  ;;  %s7382_s29 = smov [#allocation7]  }
  0x2e   :  { %s79_s0 = sshll.u32 %s7382_s29, 4  ;;  %s80_s0 = int_to_ptr.vmem [resolvable:$true] %s79_s0 }
  0x2f   :  { %s7313_s16 = scalar_lea.vmem %s80_s0, 4096  ;;  %p7318_p2 = scmp.lt.s32.totalorder %s80_s0, %s80_s0 }
  0x30   :  { %p7314_p1 = scmp.ne.s32.totalorder %s80_s0, %s7313_s16  ;;  %p7319_p3 = scmp.lt.s32.totalorder %s7313_s16, %s7313_s16 }
  0x32   :  { %p7320_p4 = por %p7319_p3, %p7318_p2 }
  0x33   :  { %49 = dma.hbm_to_vmem [thread:$0]  %s8766_s28, 6144, %s44_s24, [#allocation3], %s7380_s25, %s7380_s25, %s7381_s26  }
  0x34   :  { %p7321_p5 = pnand %p7320_p4, %p7314_p1 }
  0x36   :  { %7324 = shalt.err (!%p7321_p5)
}
  0x37   :  { %s7383_s4 = smov 64   ;;  %s7384_s30 = smov 4  }
  0x38   :  { %85 = dma.hbm_to_vmem [thread:$0]  %s8746_s12, 4096, %s80_s0, [#allocation6], %s7383_s4, %s7383_s4, %s7384_s30  }
  0x39   :  { %s7385_s10 = smov [#allocation10]  }
  0x3a   :  { %s111_s24 = sshll.u32 %s7385_s10, 4  ;;  %s112_s24 = int_to_ptr.vmem [resolvable:$true] %s111_s24 }
  0x3b   :  { %s7333_s2 = scalar_lea.vmem %s112_s24, 4096  ;;  %p7338_p7 = scmp.lt.s32.totalorder %s112_s24, %s112_s24 }
  0x3c   :  { %p7334_p6 = scmp.ne.s32.totalorder %s112_s24, %s7333_s2  ;;  %p7339_p8 = scmp.lt.s32.totalorder %s7333_s2, %s7333_s2 }
  0x3e   :  { %p7340_p9 = por %p7339_p8, %p7338_p7 }
  0x40   :  { %p7341_p10 = pnand %p7340_p9, %p7334_p6 }
  0x42   :  { %7344 = shalt.err (!%p7341_p10)
}
  0x43   :  { %117 = dma.hbm_to_vmem [thread:$0]  %s8752_s18, 4096, %s112_s24, [#allocation9], %s7377_s5, %s7377_s5, %s7378_s22  }
  0x44   :  { %7365 = dma.done.wait [#allocation3], 6144  }
  0x45   :  { %7366 = vsyncadd [#allocation3], 4294961152 }
  0x46   :  { %7367 = dma.done.wait [#allocation6], 8192  }
  0x47   :  { %7368 = vsyncadd [#allocation6], 4294959104 }
  0x48   :  { %7369 = dma.done.wait [#allocation9], 8192  }
  0x49   :  { %7370 = vsyncadd [#allocation9], 4294959104  ;;  %s8767_s3 = sld [smem:[#allocation16_spill]]  ;;  %v6593_v2 = vld [vmem:[#allocation2 + $0xac] ss:$12 sps:$4 sm:$0xff]   ;;  %v8758_v4 = vmov 0.0   ;;  %v145_v53 = vlaneseq }
  0x4a   :  { %v6595_v3 = vld [vmem:[#allocation2 + $0xa8] ss:$12 sps:$4 sm:$0xff]   ;;  %6251 = vmatprep.subr.bf16.mxu1 %v8758_v4  ;;  %v6596_v5 = vld [vmem:[#allocation2 + $0xb0] ss:$12 sps:$4 sm:$0xff]   ;;  %395 = vmatprep.subr.bf16.mxu0 %v6593_v2  ;;  %v6600_v16 = vld [vmem:[#allocation2 + $0x98] ss:$12 sps:$4 sm:$0xff]  }
  0x4b   :  { %396 = vmatpush1.bf16.msra.mxu0 %v6595_v3  ;;  %6252 = vmatpush3.bf16.msra.mxu1 %v6596_v5  ;;  %v6597_v14 = vld [vmem:[#allocation2 + $0x94] ss:$12 sps:$4 sm:$0xff]   ;;  %v6599_v15 = vld [vmem:[#allocation2 + $0x90] ss:$12 sps:$4 sm:$0xff]   ;;  %v6603_v18 = vld [vmem:[#allocation2 + $0x78] ss:$12 sps:$4 sm:$0xff]  }
  0x4c   :  { %6253 = vmatprep.subr.bf16.mxu1 %v8758_v4  ;;  %397 = vmatprep.subr.bf16.mxu0 %v6597_v14  ;;  %v6601_v17 = vld [vmem:[#allocation2 + $0x7c] ss:$12 sps:$4 sm:$0xff]   ;;  %v6604_v19 = vld [vmem:[#allocation2 + $0x80] ss:$12 sps:$4 sm:$0xff]   ;;  %v6605_v20 = vld [vmem:[#allocation2 + $0x64] ss:$12 sps:$4 sm:$0xff]  }
  0x4d   :  { %v6607_v21 = vld [vmem:[#allocation2 + $0x60] ss:$12 sps:$4 sm:$0xff]   ;;  %v6608_v22 = vld [vmem:[#allocation2 + $0x68] ss:$12 sps:$4 sm:$0xff]   ;;  %v6612_v25 = vld [vmem:[#allocation2 + $0x50] ss:$12 sps:$4 sm:$0xff]  }
  0x4e   :  { %v6609_v23 = vld [vmem:[#allocation2 + $0x4c] ss:$12 sps:$4 sm:$0xff]   ;;  %v6611_v24 = vld [vmem:[#allocation2 + $0x48] ss:$12 sps:$4 sm:$0xff]   ;;  %v7387_v27 = vmov 0   ;;  %vm7388_vm0 = vmmov 0  }
  0x4f   :  { %v174_v0 = vld [vmem:[%s8767_s3] sm:$0xff]  ;;  %v175_v1 = vld [vmem:[%s8767_s3 + $0x8] sm:$0xff]  ;;  %398 = vmatpush1.bf16.msra.mxu0 %v6599_v15  ;;  %6254 = vmatpush3.bf16.msra.mxu1 %v6600_v16  ;;  %v6615_v28 = vld [vmem:[#allocation2 + $0x30] ss:$12 sps:$4 sm:$0xff]   ;;  %s8768_s22 = sld [smem:[#allocation18_spill]]  ;;  %v7571_v54 = vshrl.u32 %v145_v53, 7 }
  0x50   :  { %178 = vadd.xlane.f32.xlu0 %v174_v0  ;;  %6255 = vmatprep.subr.bf16.mxu1 %v8758_v4  ;;  %v6613_v26 = vld [vmem:[#allocation2 + $0x34] ss:$12 sps:$4 sm:$0xff]   ;;  %v6616_v29 = vld [vmem:[#allocation2 + $0x38] ss:$12 sps:$4 sm:$0xff]   ;;  %v6617_v30 = vld [vmem:[#allocation2 + $0x1c] ss:$12 sps:$4 sm:$0xff]  }
  0x51   :  { %399 = vmatprep.subr.bf16.mxu0 %v6601_v17  ;;  %427 = vmatprep.mubr.bf16.mxu0 %v7387_v27  ;;  %v6619_v31 = vld [vmem:[#allocation2 + $0x18] ss:$12 sps:$4 sm:$0xff]   ;;  %v6620_v32 = vld [vmem:[#allocation2 + $0x20] ss:$12 sps:$4 sm:$0xff]   ;;  %v6624_v35 = vld [vmem:[#allocation2 + $0x8] ss:$12 sps:$4 sm:$0xff]  }
  0x52   :  { %6267 = vmatprep.mubr.msk.bf16.mxu1 %vm7388_vm0, %v8758_v4  ;;  %v6621_v33 = vld [vmem:[#allocation2 + $0x4] ss:$12 sps:$4 sm:$0xff]   ;;  %v6623_v34 = vld [vmem:[#allocation2] ss:$12 sps:$4 sm:$0xff]   ;;  %s8769_s30 = sld [smem:[#allocation19_spill]]  ;;  %v7574_v55 = vsub.s32 1, %v7571_v54 }
  0x53   :  { %400 = vmatpush1.bf16.msra.mxu0 %v6603_v18  ;;  %6256 = vmatpush3.bf16.msra.mxu1 %v6604_v19  ;;  %s8770_s10 = sld [smem:[#allocation21_spill]]  ;;  %v7580_v57 = vsub.s32 2, %v7571_v54  ;;  %v7584_v61 = vsub.s32 0, %v7571_v54  ;;  %vm497_vm1 = vcmask 261120   ;;  %vm622_vm2 = vcmask 1043456   ;;  %s7390_s26 = smov 96  }
  0x54   :  { %180 = vadd.xlane.f32.xlu0 %v175_v1  ;;  %6257 = vmatprep.subr.bf16.mxu1 %v8758_v4  ;;  %s8771_s25 = sld [smem:[#allocation17_spill]]  ;;  %vm594_vm3 = vcmask 64512   ;;  %s7391_s12 = smov 32   ;;  %vm1410_vm4 = vcmask 523264   ;;  %vm1413_vm5 = vcmask 785408   ;;  %vm4402_vm6 = vcmask 1041409  }
  0x55   :  { %401 = vmatprep.subr.bf16.mxu0 %v6605_v20  ;;  %v5755_v44 = vld [vmem:[%s8768_s22] ss:$0 sm:$0xff] }
  0x57   :  { %402 = vmatpush1.bf16.msra.mxu0 %v6607_v21  ;;  %6258 = vmatpush3.bf16.msra.mxu1 %v6608_v22 }
  0x58   :  { %403 = vmatprep.subr.bf16.mxu0 %v6609_v23  ;;  %6259 = vmatprep.subr.bf16.mxu1 %v8758_v4  ;;  %v5756_v48 = vld [vmem:[%s8769_s30] ss:$0 sm:$0xff]  ;;  %v7389_v23 = vmov 1966171168  }
  0x59   :  { %v250_v56 = vld [vmem:[%s8770_s10] sm:$0x7] }
  0x5a   :  { %v259_v58 = vrot.slane %v250_v56, %v7574_v55  ;;  %v255_v5 = vrot.slane %v250_v56, %v7584_v61 }
  0x5b   :  { %404 = vmatpush1.bf16.msra.mxu0 %v6611_v24  ;;  %6260 = vmatpush3.bf16.msra.mxu1 %v6612_v25  ;;  %v143_v24 = vunpack.c.l.s4 %v7389_v23  ;;  %v138_v25 = vld [vmem:[%s8771_s25] sm:$0x3] }
  0x5c   :  { %405 = vmatprep.subr.bf16.mxu0 %v6613_v26  ;;  %6261 = vmatprep.subr.bf16.mxu1 %v8758_v4  ;;  %v139_v26 = vsub.f32 1.0, %v138_v25 }
  0x5f   :  { %406 = vmatpush1.bf16.msra.mxu0 %v6615_v28  ;;  %6262 = vmatpush3.bf16.msra.mxu1 %v6616_v29  ;;  %v144_v28 = vunpack.c.0.s8 %v143_v24  ;;  %v140_v29 = vmul.f32 -1e+09, %v139_v26 }
  0x60   :  { %407 = vmatprep.subr.bf16.mxu0 %v6617_v30  ;;  %6263 = vmatprep.subr.bf16.mxu1 %v8758_v4 }
  0x61   :  { %v147_v30 = vsub.s32 %v144_v28, %v7571_v54 }
  0x63   :  { %408 = vmatpush1.bf16.msra.mxu0 %v6619_v31  ;;  %6264 = vmatpush3.bf16.msra.mxu1 %v6620_v32  ;;  %v148_v31 = vrot.slane %v140_v29, %v147_v30 }
  0x64   :  { %409 = vmatprep.subr.bf16.mxu0 %v6621_v33  ;;  %6265 = vmatprep.subr.bf16.mxu1 %v8758_v4 }
  0x65   :  { %v156_v32 = vrot.slane %v148_v31, %v147_v30  ;;  %v149_v33 = vcombine.high %v148_v31, %v148_v31 }
  0x67   :  { %410 = vmatpush1.bf16.msra.mxu0 %v6623_v34  ;;  %6266 = vmatpush3.bf16.msra.mxu1 %v6624_v35  ;;  %v7625_v34 = vrot.slane %v156_v32, %v7584_v61  ;;  %v163_v35 = vrot.slane %v149_v33, %v147_v30 }
  0x68   :  { %6271 = vmatprep.subr.bf16.mxu0 %v8758_v4  ;;  %6277 = vmatprep.subr.bf16.mxu1 %v8758_v4 }
  0xd9   :  { %v179_v6 = vpop.xlane.xlu0 %178 }
  0xda   :  { %v183_v7 = vmul.f32 0.0078125, %v179_v6 }
  0xdc   :  { %v7534_v8 = vsub.f32 %v174_v0, %v183_v7  ;;  %v263_v0 = vrot.slane %v250_v56, %v7580_v57 }
  0xdd   :  { %v181_v9 = vpop.xlane.xlu0 %180 }
  0xde   :  { %v184_v10 = vmul.f32 0.0078125, %v181_v9  ;;  %v187_v11 = vmul.f32 %v7534_v8, %v7534_v8 }
  0xe0   :  { %v7538_v12 = vsub.f32 %v175_v1, %v184_v10  ;;  %189 = vadd.xlane.f32.xlu1 %v187_v11 }
  0xe2   :  { %v188_v13 = vmul.f32 %v7538_v12, %v7538_v12 }
  0xe4   :  { %191 = vadd.xlane.f32.xlu1 %v188_v13 }
 0x169   :  { %v190_v36 = vpop.xlane.xlu1 %189 }
 0x16a   :  { %v193_v37 = vmul.f32 0.0078125, %v190_v36 }
 0x16c   :  { %v195_v38 = vadd.f32 1e-12, %v193_v37 }
 0x16d   :  { %v192_v39 = vpop.xlane.xlu1 %191 }
 0x16e   :  { %6857 = vrsqrt.f32 %v195_v38  ;;  %v194_v40 = vmul.f32 0.0078125, %v192_v39 }
 0x170   :  { %v196_v41 = vadd.f32 1e-12, %v194_v40  ;;  %v7629_v40 = vrot.slane %v163_v35, %v7584_v61 }
 0x172   :  { %6859 = vrsqrt.f32 %v196_v41 }
 0x17b   :  { %v6858_v42 = vpop.eup %6857 }
 0x17c   :  { %v199_v43 = vmul.f32 %v6858_v42, %v7534_v8 }
 0x17e   :  { %v207_v47 = vmul.f32 %v5755_v44, %v199_v43 }
 0x17f   :  { %v6860_v45 = vpop.eup %6859 }
 0x180   :  { %v200_v46 = vmul.f32 %v6860_v45, %v7538_v12  ;;  %v7561_v50 = vadd.f32 %v5756_v48, %v207_v47 }
 0x182   :  { %v208_v49 = vmul.f32 %v5755_v44, %v200_v46 }
 0x184   :  { %v7563_v51 = vadd.f32 %v5756_v48, %v208_v49 }
 0x186   :  { %v217_v52 = vpack.c.bf16 %v7563_v51, %v7561_v50 }
 0x188   :  { %428 = vmatmul.mubr.bf16.vlgmr.msra.gmra.mxu0 %v217_v52  ;;  %6268 = vmatmul.mubr.bf16.vlgmr.msra.gmra.mxu1 %v217_v52 }
 0x189   :  { %6273 = vmatprep.mubr.msk.bf16.mxu0 %vm7388_vm0, %v8758_v4  ;;  %6279 = vmatprep.mubr.msk.bf16.mxu1 %vm7388_vm0, %v8758_v4 }
 0x248   :  { %v429_v59 = vpop.f32.mrf.mxu0  ;;  %v472_v60 = vpop.f32.mrf.mxu1 }
 0x249   :  { %v473_v9 = vadd.f32 %v472_v60, %v263_v0  ;;  %v430_v12 = vadd.f32 %v429_v59, %v255_v5 }
 0x24a   :  { %v431_v62 = vpop.f32.mrf.mxu0  ;;  %v6269_v63 = vpop.f32.mrf.mxu1 }
 0x24b   :  { %v432_v1 = vadd.f32 %v431_v62, %v259_v58  ;;  %v7595_v14 = vpack.c.bf16 %v473_v9, %v473_v9  ;;  %v7599_v17 = vpack.c.bf16 %v430_v12, %v430_v12 }
 0x24c   :  { %v433_v2 = vpop.f32.mrf.mxu0  ;;  %v475_v3 = vpop.f32.mrf.mxu1 }
 0x24d   :  { %v7588_v6 = vpack.c.bf16 %v432_v1, %v432_v1  ;;  %v476_v15 = vadd.f32 %v475_v3, %v263_v0  ;;  %v434_v18 = vadd.f32 %v433_v2, %v255_v5  ;;  %v624_v20 = vsel %vm622_vm2, %v7595_v14, 0 }
 0x24e   :  { %v435_v7 = vpop.f32.mrf.mxu0  ;;  %v6270_v8 = vpop.f32.mrf.mxu1 }
 0x24f   :  { %v436_v10 = vadd.f32 %v435_v7, %v259_v58  ;;  %v502_v11 = vsel %vm497_vm1, %v7588_v6, 0  ;;  %v7602_v19 = vpack.c.bf16 %v476_v15, %v476_v15  ;;  %v7610_v21 = vpack.c.bf16 %v434_v18, %v434_v18 }
 0x250   :  { %6272 = vmatpush3.bf16.xpose.msra.mxu0 %v502_v11 }
 0x251   :  { %v7592_v13 = vpack.c.bf16 %v436_v10, %v436_v10  ;;  %6283 = vmatprep.subr.bf16.mxu0 %v8758_v4  ;;  %v670_v22 = vsel %vm622_vm2, %v7602_v19, 0 }
 0x253   :  { %v548_v16 = vsel %vm497_vm1, %v7592_v13, 0 }
 0x254   :  { %6278 = vmatpush3.bf16.xpose.msra.mxu1 %v548_v16 }
 0x255   :  { %6289 = vmatprep.subr.bf16.mxu1 %v8758_v4 }
 0x257   :  { %6274 = vmatmul.mubr.msk.bf16.vlgmr.msra.gmra.mxu0 %vm497_vm1, %v7599_v17 }
 0x258   :  { %6284 = vmatpush3.bf16.msra.mxu0 %v624_v20  ;;  %6285 = vmatprep.mubr.msk.bf16.mxu0 %vm7388_vm0, %v8758_v4 }
 0x259   :  { %6295 = vmatprep.subr.bf16.mxu0 %v8758_v4 }
 0x25b   :  { %6280 = vmatmul.mubr.msk.bf16.vlgmr.msra.gmra.mxu1 %vm497_vm1, %v7610_v21 }
 0x25c   :  { %6290 = vmatpush3.bf16.msra.mxu1 %v670_v22  ;;  %6291 = vmatprep.mubr.msk.bf16.mxu1 %vm7388_vm0, %v8758_v4 }
 0x25d   :  { %6301 = vmatprep.subr.bf16.mxu1 %v8758_v4 }
 0x317   :  { %v538_v36 = vpop.f32.mrf.mxu0 }
 0x318   :  { %v590_v37 = vmul.f32 0.17677669, %v538_v36 }
 0x319   :  { %v6275_v38 = vpop.f32.mrf.mxu0 }
 0x31a   :  { %v592_v39 = vadd.f32 %v590_v37, %v7625_v34 }
 0x31b   :  { %v541_v41 = vpop.f32.mrf.mxu0  ;;  %v584_v42 = vpop.f32.mrf.mxu1 }
 0x31c   :  { %v591_v43 = vmul.f32 0.17677669, %v584_v42  ;;  %v595_v44 = vsel %vm594_vm3, %v592_v39, -inf }
 0x31d   :  { %v6276_v45 = vpop.f32.mrf.mxu0  ;;  %v6281_v46 = vpop.f32.mrf.mxu1  ;;  %596 = vmax.xlane.f32.xlu0 %v595_v44 }
 0x31e   :  { %v593_v47 = vadd.f32 %v591_v43, %v7629_v40 }
 0x31f   :  { %v587_v48 = vpop.f32.mrf.mxu1 }
 0x320   :  { %v598_v49 = vsel %vm594_vm3, %v593_v47, -inf }
 0x321   :  { %v6282_v52 = vpop.f32.mrf.mxu1  ;;  %599 = vmax.xlane.f32.xlu1 %v598_v49 }
 0x332   :  { %764 = vrot.lane.b32.xlu1 %v7592_v13, %s7390_s26 }
 0x3a6   :  { %v597_v53 = vpop.xlane.xlu0 %596 }
 0x3a7   :  { %v601_v56 = vsub.f32 %v592_v39, %v597_v53 }
 0x3a9   :  { %v603_v58 = vmul.f32 1.442695, %v601_v56 }
 0x3aa   :  { %v600_v59 = vpop.xlane.xlu1 %599 }
 0x3ab   :  { %6861 = vpow2.f32 %v603_v58  ;;  %v602_v60 = vsub.f32 %v593_v47, %v600_v59 }
 0x3ad   :  { %v605_v62 = vmul.f32 1.442695, %v602_v60 }
 0x3ae   :  { %v765_v3 = vpop.permute.xlu1 %764 }
 0x3af   :  { %6863 = vpow2.f32 %v605_v62  ;;  %v770_v20 = vsel %vm497_vm1, %v765_v3, 0 }
 0x3b8   :  { %v6862_v63 = vpop.eup %6861 }
 0x3b9   :  { %v607_v0 = vsel %vm594_vm3, %v6862_v63, 0.0 }
 0x3ba   :  { %608 = vadd.xlane.f32.xlu0 %v607_v0 }
 0x3bc   :  { %v6864_v1 = vpop.eup %6863 }
 0x3bd   :  { %v610_v2 = vsel %vm594_vm3, %v6864_v1, 0.0 }
 0x3be   :  { %611 = vadd.xlane.f32.xlu1 %v610_v2 }
 0x3cf   :  { %712 = vrot.lane.b32.xlu1 %v7599_v17, %s7390_s26 }
 0x3d0   :  { %714 = vrot.lane.b32.xlu0 %v7588_v6, %s7390_s26 }
 0x3d3   :  { %762 = vrot.lane.b32.xlu1 %v7610_v21, %s7390_s26 }
 0x443   :  { %v609_v5 = vpop.xlane.xlu0 %608 }
 0x444   :  { %6865 = vrcp.f32 %v609_v5 }
 0x447   :  { %v612_v7 = vpop.xlane.xlu1 %611  ;;  %v715_v10 = vpop.permute.xlu0 %714 }
 0x448   :  { %6867 = vrcp.f32 %v612_v7  ;;  %v720_v15 = vsel %vm497_vm1, %v715_v10, 0 }
 0x44b   :  { %v713_v22 = vpop.permute.xlu1 %712 }
 0x44f   :  { %v763_v23 = vpop.permute.xlu1 %762 }
 0x451   :  { %v6866_v8 = vpop.eup %6865 }
 0x452   :  { %v615_v9 = vmul.f32 %v6866_v8, %v6862_v63 }
 0x454   :  { %v617_v11 = vpack.c.bf16 %v615_v9, %v615_v9 }
 0x455   :  { %v6868_v12 = vpop.eup %6867 }
 0x456   :  { %6286 = vmatmul.mubr.msk.bf16.vlgmr.msra.gmra.mxu0 %vm594_vm3, %v617_v11  ;;  %v616_v16 = vmul.f32 %v6868_v12, %v6864_v1 }
 0x457   :  { %6296 = vmatpush3.bf16.xpose.msra.mxu0 %v720_v15  ;;  %6297 = vmatprep.mubr.msk.bf16.mxu0 %vm7388_vm0, %v8758_v4 }
 0x458   :  { %v618_v18 = vpack.c.bf16 %v616_v16, %v616_v16  ;;  %6307 = vmatprep.subr.bf16.mxu0 %v8758_v4 }
 0x45a   :  { %6292 = vmatmul.mubr.msk.bf16.vlgmr.msra.gmra.mxu1 %vm594_vm3, %v618_v18 }
 0x45b   :  { %6302 = vmatpush3.bf16.xpose.msra.mxu1 %v770_v20  ;;  %6303 = vmatprep.mubr.msk.bf16.mxu1 %vm7388_vm0, %v8758_v4 }
 0x45c   :  { %6313 = vmatprep.subr.bf16.mxu1 %v8758_v4 }
 0x45e   :  { %6298 = vmatmul.mubr.msk.bf16.vlgmr.msra.gmra.mxu0 %vm497_vm1, %v713_v22 }
 0x45f   :  { %6309 = vmatprep.mubr.msk.bf16.mxu0 %vm7388_vm0, %v8758_v4 }
 0x462   :  { %6304 = vmatmul.mubr.msk.bf16.vlgmr.msra.gmra.mxu1 %vm497_vm1, %v763_v23 }
 0x463   :  { %6315 = vmatprep.mubr.msk.bf16.mxu1 %vm7388_vm0, %v8758_v4 }
 0x516   :  { %v7660_v24 = vpop.f32.mrf.mxu0 }
 0x518   :  { %v6287_v25 = vpop.f32.mrf.mxu0 }
 0x51a   :  { %v663_v26 = vpop.f32.mrf.mxu0  ;;  %v7662_v28 = vpop.f32.mrf.mxu1 }
 0x51c   :  { %v6288_v29 = vpop.f32.mrf.mxu0  ;;  %v6293_v30 = vpop.f32.mrf.mxu1 }
 0x51e   :  { %v709_v31 = vpop.f32.mrf.mxu1  ;;  %v756_v32 = vpop.f32.mrf.mxu0 }
 0x51f   :  { %v812_v33 = vmul.f32 0.17677669, %v756_v32 }
 0x520   :  { %v6294_v35 = vpop.f32.mrf.mxu1  ;;  %v6299_v36 = vpop.f32.mrf.mxu0 }
 0x521   :  { %v814_v37 = vadd.f32 %v812_v33, %v7625_v34 }
 0x522   :  { %v759_v38 = vpop.f32.mrf.mxu0  ;;  %v806_v39 = vpop.f32.mrf.mxu1 }
 0x523   :  { %v813_v41 = vmul.f32 0.17677669, %v806_v39  ;;  %v816_v42 = vsel %vm594_vm3, %v814_v37, -inf }
 0x524   :  { %817 = vmax.xlane.f32.xlu0 %v816_v42  ;;  %v6300_v43 = vpop.f32.mrf.mxu0  ;;  %v6305_v44 = vpop.f32.mrf.mxu1 }
 0x525   :  { %v815_v45 = vadd.f32 %v813_v41, %v7629_v40 }
 0x526   :  { %v809_v46 = vpop.f32.mrf.mxu1 }
 0x527   :  { %v819_v47 = vsel %vm594_vm3, %v815_v45, -inf }
 0x528   :  { %820 = vmax.xlane.f32.xlu1 %v819_v47  ;;  %v6306_v48 = vpop.f32.mrf.mxu1 }
 0x539   :  { %888 = vrot.lane.b32.xlu1 %v7602_v19, %s7390_s26 }
 0x53d   :  { %938 = vrot.lane.b32.xlu1 %v7588_v6, %s7383_s4 }
 0x541   :  { %988 = vrot.lane.b32.xlu1 %v7592_v13, %s7383_s4 }
 0x545   :  { %986 = vrot.lane.b32.xlu1 %v7610_v21, %s7383_s4 }
 0x5ad   :  { %v818_v49 = vpop.xlane.xlu0 %817 }
 0x5ae   :  { %v822_v52 = vsub.f32 %v814_v37, %v818_v49 }
 0x5b0   :  { %v824_v53 = vmul.f32 1.442695, %v822_v52 }
 0x5b1   :  { %v821_v56 = vpop.xlane.xlu1 %820 }
 0x5b2   :  { %6869 = vpow2.f32 %v824_v53  ;;  %v823_v58 = vsub.f32 %v815_v45, %v821_v56 }
 0x5b4   :  { %v826_v59 = vmul.f32 1.442695, %v823_v58 }
 0x5b5   :  { %v889_v60 = vpop.permute.xlu1 %888 }
 0x5b6   :  { %6871 = vpow2.f32 %v826_v59  ;;  %v894_v62 = vsel %vm622_vm2, %v889_v60, 0 }
 0x5b7   :  { %6314 = vmatpush3.bf16.msra.mxu1 %v894_v62 }
 0x5b8   :  { %6325 = vmatprep.subr.bf16.mxu1 %v8758_v4 }
 0x5b9   :  { %v939_v10 = vpop.permute.xlu1 %938 }
 0x5ba   :  { %v944_v16 = vsel %vm497_vm1, %v939_v10, 0 }
 0x5bd   :  { %v989_v20 = vpop.permute.xlu1 %988 }
 0x5be   :  { %v994_v23 = vsel %vm497_vm1, %v989_v20, 0 }
 0x5bf   :  { %v6870_v63 = vpop.eup %6869 }
 0x5c0   :  { %v828_v0 = vsel %vm594_vm3, %v6870_v63, 0.0 }
 0x5c1   :  { %829 = vadd.xlane.f32.xlu0 %v828_v0  ;;  %v987_v26 = vpop.permute.xlu1 %986 }
 0x5c3   :  { %v6872_v1 = vpop.eup %6871 }
 0x5c4   :  { %v831_v2 = vsel %vm594_vm3, %v6872_v1, 0.0 }
 0x5c5   :  { %832 = vadd.xlane.f32.xlu0 %v831_v2 }
 0x5db   :  { %840 = vrot.lane.b32.xlu0 %v7595_v14, %s7390_s26 }
 0x5df   :  { %936 = vrot.lane.b32.xlu0 %v7599_v17, %s7383_s4 }
 0x64a   :  { %v830_v3 = vpop.xlane.xlu0 %829 }
 0x64b   :  { %6873 = vrcp.f32 %v830_v3 }
 0x64e   :  { %v833_v5 = vpop.xlane.xlu0 %832 }
 0x64f   :  { %6875 = vrcp.f32 %v833_v5 }
 0x652   :  { %v841_v7 = vpop.permute.xlu0 %840 }
 0x653   :  { %v846_v8 = vsel %vm622_vm2, %v841_v7, 0 }
 0x654   :  { %6308 = vmatpush3.bf16.msra.mxu0 %v846_v8 }
 0x655   :  { %6319 = vmatprep.subr.bf16.mxu0 %v8758_v4 }
 0x656   :  { %v937_v25 = vpop.permute.xlu0 %936 }
 0x658   :  { %v6874_v9 = vpop.eup %6873 }
 0x659   :  { %v836_v11 = vmul.f32 %v6874_v9, %v6870_v63 }
 0x65b   :  { %v838_v12 = vpack.c.bf16 %v836_v11, %v836_v11 }
 0x65c   :  { %v6876_v15 = vpop.eup %6875 }
 0x65d   :  { %6310 = vmatmul.mubr.msk.bf16.vlgmr.msra.gmra.mxu0 %vm594_vm3, %v838_v12  ;;  %v837_v18 = vmul.f32 %v6876_v15, %v6872_v1 }
 0x65e   :  { %6320 = vmatpush3.bf16.xpose.msra.mxu0 %v944_v16  ;;  %6321 = vmatprep.mubr.msk.bf16.mxu0 %vm7388_vm0, %v8758_v4 }
 0x65f   :  { %v839_v22 = vpack.c.bf16 %v837_v18, %v837_v18  ;;  %6331 = vmatprep.subr.bf16.mxu0 %v8758_v4 }
 0x661   :  { %6316 = vmatmul.mubr.msk.bf16.vlgmr.msra.gmra.mxu1 %vm594_vm3, %v839_v22 }
 0x662   :  { %6326 = vmatpush3.bf16.xpose.msra.mxu1 %v994_v23  ;;  %6327 = vmatprep.mubr.msk.bf16.mxu1 %vm7388_vm0, %v8758_v4 }
 0x663   :  { %6337 = vmatprep.subr.bf16.mxu1 %v8758_v4 }
 0x665   :  { %6322 = vmatmul.mubr.msk.bf16.vlgmr.msra.gmra.mxu0 %vm497_vm1, %v937_v25 }
 0x666   :  { %6333 = vmatprep.mubr.msk.bf16.mxu0 %vm7388_vm0, %v8758_v4 }
 0x669   :  { %6328 = vmatmul.mubr.msk.bf16.vlgmr.msra.gmra.mxu1 %vm497_vm1, %v987_v26 }
 0x66a   :  { %6339 = vmatprep.mubr.msk.bf16.mxu1 %vm7388_vm0, %v8758_v4 }
 0x71d   :  { %v7702_v29 = vpop.f32.mrf.mxu0 }
 0x71f   :  { %v6311_v30 = vpop.f32.mrf.mxu0 }
 0x721   :  { %v885_v31 = vpop.f32.mrf.mxu0  ;;  %v7704_v32 = vpop.f32.mrf.mxu1 }
 0x722   :  { %v6563_v33 = vpack.i.bf16 %v7704_v32, %v7702_v29 }
 0x723   :  { %v6312_v35 = vpop.f32.mrf.mxu0  ;;  %v6317_v36 = vpop.f32.mrf.mxu1 }
 0x725   :  { %v933_v37 = vpop.f32.mrf.mxu1  ;;  %v980_v38 = vpop.f32.mrf.mxu0 }
 0x726   :  { %v1036_v39 = vmul.f32 0.17677669, %v980_v38 }
 0x727   :  { %v6318_v41 = vpop.f32.mrf.mxu1  ;;  %v6323_v42 = vpop.f32.mrf.mxu0 }
 0x728   :  { %v1038_v43 = vadd.f32 %v1036_v39, %v7625_v34 }
 0x729   :  { %v983_v44 = vpop.f32.mrf.mxu0  ;;  %v1030_v45 = vpop.f32.mrf.mxu1 }
 0x72a   :  { %v1037_v46 = vmul.f32 0.17677669, %v1030_v45  ;;  %v1040_v47 = vsel %vm594_vm3, %v1038_v43, -inf }
 0x72b   :  { %1041 = vmax.xlane.f32.xlu0 %v1040_v47  ;;  %v6324_v48 = vpop.f32.mrf.mxu0  ;;  %v6329_v49 = vpop.f32.mrf.mxu1 }
 0x72c   :  { %v1039_v52 = vadd.f32 %v1037_v46, %v7629_v40 }
 0x72d   :  { %v1033_v53 = vpop.f32.mrf.mxu1 }
 0x72e   :  { %v1043_v56 = vsel %vm594_vm3, %v1039_v52, -inf }
 0x72f   :  { %1044 = vmax.xlane.f32.xlu1 %v1043_v56  ;;  %v6330_v58 = vpop.f32.mrf.mxu1 }
 0x740   :  { %1112 = vrot.lane.b32.xlu1 %v7602_v19, %s7383_s4 }
 0x744   :  { %1162 = vrot.lane.b32.xlu1 %v7588_v6, %s7391_s12 }
 0x748   :  { %1212 = vrot.lane.b32.xlu1 %v7592_v13, %s7391_s12 }
 0x74c   :  { %1210 = vrot.lane.b32.xlu1 %v7610_v21, %s7391_s12 }
 0x7b4   :  { %v1042_v59 = vpop.xlane.xlu0 %1041 }
 0x7b5   :  { %v1046_v60 = vsub.f32 %v1038_v43, %v1042_v59 }
 0x7b7   :  { %v1048_v62 = vmul.f32 1.442695, %v1046_v60 }
 0x7b8   :  { %v1045_v63 = vpop.xlane.xlu1 %1044 }
 0x7b9   :  { %6877 = vpow2.f32 %v1048_v62  ;;  %v1047_v0 = vsub.f32 %v1039_v52, %v1045_v63 }
 0x7bb   :  { %v1050_v1 = vmul.f32 1.442695, %v1047_v0 }
 0x7bc   :  { %v1113_v2 = vpop.permute.xlu1 %1112 }
 0x7bd   :  { %6879 = vpow2.f32 %v1050_v1  ;;  %v1118_v3 = vsel %vm622_vm2, %v1113_v2, 0 }
 0x7be   :  { %6338 = vmatpush3.bf16.msra.mxu1 %v1118_v3 }
 0x7bf   :  { %6349 = vmatprep.subr.bf16.mxu1 %v8758_v4 }
 0x7c0   :  { %v1163_v12 = vpop.permute.xlu1 %1162 }
 0x7c1   :  { %v1168_v20 = vsel %vm497_vm1, %v1163_v12, 0 }
 0x7c4   :  { %v1213_v22 = vpop.permute.xlu1 %1212 }
 0x7c5   :  { %v1218_v25 = vsel %vm497_vm1, %v1213_v22, 0  ;;  %v6627_v22 = vld [vmem:[%s8740_s6 + $0x28] sm:$0xff]  }
 0x7c6   :  { %v6878_v6 = vpop.eup %6877 }
 0x7c7   :  { %v1052_v13 = vsel %vm594_vm3, %v6878_v6, 0.0 }
 0x7c8   :  { %1053 = vadd.xlane.f32.xlu0 %v1052_v13  ;;  %v1211_v30 = vpop.permute.xlu1 %1210 }
 0x7ca   :  { %v6880_v5 = vpop.eup %6879 }
 0x7cb   :  { %v1055_v21 = vsel %vm594_vm3, %v6880_v5, 0.0 }
 0x7cc   :  { %1056 = vadd.xlane.f32.xlu0 %v1055_v21 }
 0x7e2   :  { %1064 = vrot.lane.b32.xlu0 %v7595_v14, %s7383_s4 }
 0x7e6   :  { %1160 = vrot.lane.b32.xlu0 %v7599_v17, %s7391_s12 }
 0x851   :  { %v1054_v7 = vpop.xlane.xlu0 %1053 }
 0x852   :  { %6881 = vrcp.f32 %v1054_v7 }
 0x855   :  { %v1057_v8 = vpop.xlane.xlu0 %1056 }
 0x856   :  { %6883 = vrcp.f32 %v1057_v8 }
 0x859   :  { %v1065_v9 = vpop.permute.xlu0 %1064 }
 0x85a   :  { %v1070_v10 = vsel %vm622_vm2, %v1065_v9, 0 }
 0x85b   :  { %6332 = vmatpush3.bf16.msra.mxu0 %v1070_v10 }
 0x85c   :  { %6343 = vmatprep.subr.bf16.mxu0 %v8758_v4 }
 0x85d   :  { %v1161_v26 = vpop.permute.xlu0 %1160 }
 0x85f   :  { %v6882_v11 = vpop.eup %6881 }
 0x860   :  { %v1060_v15 = vmul.f32 %v6882_v11, %v6878_v6 }
 0x862   :  { %v1062_v16 = vpack.c.bf16 %v1060_v15, %v1060_v15 }
 0x863   :  { %v6884_v18 = vpop.eup %6883 }
 0x864   :  { %6334 = vmatmul.mubr.msk.bf16.vlgmr.msra.gmra.mxu0 %vm594_vm3, %v1062_v16  ;;  %v1061_v17 = vmul.f32 %v6884_v18, %v6880_v5 }
 0x865   :  { %6344 = vmatpush3.bf16.xpose.msra.mxu0 %v1168_v20  ;;  %6345 = vmatprep.mubr.msk.bf16.mxu0 %vm7388_vm0, %v8758_v4  ;;  %v6625_v20 = vld [vmem:[%s8740_s6 + $0x38] sm:$0xff]  }
 0x866   :  { %v1063_v23 = vpack.c.bf16 %v1061_v17, %v1061_v17  ;;  %6355 = vmatprep.subr.bf16.mxu0 %v8758_v4  ;;  %v6626_v17 = vld [vmem:[%s8740_s6 + $0x30] sm:$0xff]  }
 0x868   :  { %6340 = vmatmul.mubr.msk.bf16.vlgmr.msra.gmra.mxu1 %vm594_vm3, %v1063_v23  ;;  %v6628_v23 = vld [vmem:[%s8740_s6 + $0x20] sm:$0xff]  }
 0x869   :  { %6350 = vmatpush3.bf16.xpose.msra.mxu1 %v1218_v25  ;;  %6351 = vmatprep.mubr.msk.bf16.mxu1 %vm7388_vm0, %v8758_v4  ;;  %v6629_v25 = vld [vmem:[%s8740_s6 + $0x18] sm:$0xff]  }
 0x86a   :  { %6361 = vmatprep.subr.bf16.mxu1 %v8758_v4 }
 0x86c   :  { %6346 = vmatmul.mubr.msk.bf16.vlgmr.msra.gmra.mxu0 %vm497_vm1, %v1161_v26  ;;  %v6630_v26 = vld [vmem:[%s8740_s6 + $0x10] sm:$0xff]  }
 0x86d   :  { %6357 = vmatprep.mubr.msk.bf16.mxu0 %vm7388_vm0, %v8758_v4 }
 0x870   :  { %6352 = vmatmul.mubr.msk.bf16.vlgmr.msra.gmra.mxu1 %vm497_vm1, %v1211_v30  ;;  %v6631_v30 = vld [vmem:[%s8740_s6 + $0x8] sm:$0xff]  }
 0x871   :  { %6363 = vmatprep.mubr.msk.bf16.mxu1 %vm7388_vm0, %v8758_v4 }
 0x924   :  { %v1106_v31 = vpop.f32.mrf.mxu0 }
 0x926   :  { %v6335_v35 = vpop.f32.mrf.mxu0 }
 0x928   :  { %v1109_v36 = vpop.f32.mrf.mxu0  ;;  %v1154_v37 = vpop.f32.mrf.mxu1 }
 0x929   :  { %v6568_v63 = vpack.i.bf16 %v1154_v37, %v1106_v31  ;;  %v6632_v31 = vld [vmem:[%s8740_s6] sm:$0xff]  }
 0x92a   :  { %v6336_v38 = vpop.f32.mrf.mxu0  ;;  %v6341_v39 = vpop.f32.mrf.mxu1 }
 0x92c   :  { %v1157_v41 = vpop.f32.mrf.mxu1  ;;  %v1204_v42 = vpop.f32.mrf.mxu0 }
 0x92d   :  { %v1260_v43 = vmul.f32 0.17677669, %v1204_v42 }
 0x92e   :  { %v6342_v44 = vpop.f32.mrf.mxu1  ;;  %v6347_v45 = vpop.f32.mrf.mxu0 }
 0x92f   :  { %v1262_v46 = vadd.f32 %v1260_v43, %v7625_v34 }
 0x930   :  { %v1207_v47 = vpop.f32.mrf.mxu0  ;;  %v1254_v48 = vpop.f32.mrf.mxu1 }
 0x931   :  { %v1261_v49 = vmul.f32 0.17677669, %v1254_v48  ;;  %v1264_v52 = vsel %vm594_vm3, %v1262_v46, -inf }
 0x932   :  { %1265 = vmax.xlane.f32.xlu0 %v1264_v52  ;;  %v6348_v53 = vpop.f32.mrf.mxu0  ;;  %v6353_v56 = vpop.f32.mrf.mxu1 }
 0x933   :  { %v1263_v58 = vadd.f32 %v1261_v49, %v7629_v40 }
 0x934   :  { %v1257_v59 = vpop.f32.mrf.mxu1 }
 0x935   :  { %v1267_v60 = vsel %vm594_vm3, %v1263_v58, -inf }
 0x936   :  { %1268 = vmax.xlane.f32.xlu1 %v1267_v60  ;;  %v6354_v62 = vpop.f32.mrf.mxu1 }
 0x947   :  { %1336 = vrot.lane.b32.xlu1 %v7602_v19, %s7391_s12 }
 0x94b   :  { %6564 = vrot.lane.b32.xlu1 %v6563_v33, %s7391_s12 }
 0x94f   :  { %6569 = vrot.lane.b32.xlu1 %v6568_v63, %s7383_s4 }
 0x9bb   :  { %v1266_v0 = vpop.xlane.xlu0 %1265 }
 0x9bc   :  { %v1270_v1 = vsub.f32 %v1262_v46, %v1266_v0 }
 0x9be   :  { %v1272_v2 = vmul.f32 1.442695, %v1270_v1 }
 0x9bf   :  { %v1269_v3 = vpop.xlane.xlu1 %1268 }
 0x9c0   :  { %6885 = vpow2.f32 %v1272_v2  ;;  %v1271_v6 = vsub.f32 %v1263_v58, %v1269_v3  ;;  %v5803_v3 = vld [vmem:[%s8741_s7] ss:$0 sm:$0xff] }
 0x9c2   :  { %v1274_v13 = vmul.f32 1.442695, %v1271_v6 }
 0x9c3   :  { %v1337_v5 = vpop.permute.xlu1 %1336 }
 0x9c4   :  { %6887 = vpow2.f32 %v1274_v13  ;;  %v1342_v21 = vsel %vm622_vm2, %v1337_v5, 0 }
 0x9c5   :  { %6362 = vmatpush3.bf16.msra.mxu1 %v1342_v21 }
 0x9c7   :  { %v6565_v45 = vpop.permute.xlu1 %6564 }
 0x9c8   :  { %v6567_v47 = vunpack.i.h.bf16 %v6565_v45  ;;  %v6566_v48 = vunpack.i.l.bf16 %v6565_v45 }
 0x9ca   :  { %v1409_v56 = vsel %vm497_vm1, %v7662_v28, %v6567_v47  ;;  %v1408_v58 = vsel %vm497_vm1, %v7660_v24, %v6566_v48 }
 0x9cb   :  { %v6570_v46 = vpop.permute.xlu1 %6569 }
 0x9cc   :  { %v6572_v49 = vunpack.i.h.bf16 %v6570_v46  ;;  %v6571_v52 = vunpack.i.l.bf16 %v6570_v46  ;;  %v5812_v46 = vld [vmem:[%s8742_s8] ss:$0 sm:$0xff] }
 0x9cd   :  { %v6886_v19 = vpop.eup %6885 }
 0x9ce   :  { %v1276_v7 = vsel %vm594_vm3, %v6886_v19, 0.0  ;;  %v1411_v62 = vsel %vm1410_vm4, %v1408_v58, %v6571_v52  ;;  %v1412_v63 = vsel %vm1410_vm4, %v1409_v56, %v6572_v49  ;;  %v5813_v52 = vld [vmem:[%s8743_s9] ss:$0 sm:$0xff] }
 0x9cf   :  { %1277 = vadd.xlane.f32.xlu0 %v1276_v7 }
 0x9d1   :  { %v6888_v29 = vpop.eup %6887 }
 0x9d2   :  { %v1279_v32 = vsel %vm594_vm3, %v6888_v29, 0.0 }
 0x9d3   :  { %1280 = vadd.xlane.f32.xlu0 %v1279_v32  ;;  %v6635_v32 = vld [vmem:[#allocation5 + $0x74] ss:$8 sps:$4 sm:$0xff]  }
 0x9d4   :  { %1680 = vmatprep.subr.bf16.mxu1 %v6635_v32  ;;  %v1588_v32 = vld [vmem:[%s8745_s11] sm:$0x3] }
 0x9e9   :  { %1288 = vrot.lane.b32.xlu0 %v7595_v14, %s7391_s12 }
 0xa58   :  { %v1278_v33 = vpop.xlane.xlu0 %1277 }
 0xa59   :  { %6889 = vrcp.f32 %v1278_v33 }
 0xa5c   :  { %v1281_v8 = vpop.xlane.xlu0 %1280 }
 0xa5d   :  { %6891 = vrcp.f32 %v1281_v8 }
 0xa60   :  { %v1289_v9 = vpop.permute.xlu0 %1288 }
 0xa61   :  { %v1294_v10 = vsel %vm622_vm2, %v1289_v9, 0 }
 0xa62   :  { %6356 = vmatpush3.bf16.msra.mxu0 %v1294_v10 }
 0xa63   :  { %6367 = vmatprep.subr.bf16.mxu0 %v8758_v4 }
 0xa66   :  { %v6890_v11 = vpop.eup %6889 }
 0xa67   :  { %v1284_v12 = vmul.f32 %v6890_v11, %v6886_v19 }
 0xa69   :  { %v1286_v15 = vpack.c.bf16 %v1284_v12, %v1284_v12 }
 0xa6a   :  { %v6892_v16 = vpop.eup %6891 }
 0xa6b   :  { %6358 = vmatmul.mubr.msk.bf16.vlgmr.msra.gmra.mxu0 %vm594_vm3, %v1286_v15  ;;  %v1285_v18 = vmul.f32 %v6892_v16, %v6888_v29  ;;  %v6633_v29 = vld [vmem:[#allocation5 + $0x70] ss:$8 sps:$4 sm:$0xff]   ;;  %v6638_v16 = vld [vmem:[#allocation5 + $0x64] ss:$8 sps:$4 sm:$0xff]  }
 0xa6c   :  { %6383 = vmatprep.mubr.msk.bf16.mxu0 %vm7388_vm0, %v8758_v4  ;;  %6368 = vmatpush3.bf16.msra.mxu0 %v6625_v20  ;;  %v6642_v20 = vld [vmem:[#allocation5 + $0x40] ss:$8 sps:$4 sm:$0xff]  }
 0xa6d   :  { %v1287_v14 = vpack.c.bf16 %v1285_v18, %v1285_v18  ;;  %6369 = vmatprep.subr.bf16.mxu0 %v8758_v4  ;;  %v6636_v18 = vld [vmem:[#allocation5 + $0x60] ss:$8 sps:$4 sm:$0xff]  }
 0xa6f   :  { %6364 = vmatmul.mubr.msk.bf16.vlgmr.msra.gmra.mxu1 %vm594_vm3, %v1287_v14  ;;  %v6639_v14 = vld [vmem:[#allocation5 + $0x50] ss:$8 sps:$4 sm:$0xff]  }
 0xa70   :  { %1712 = vmatprep.mubr.bf16.mxu1 %v7387_v27  ;;  %6370 = vmatpush3.bf16.msra.mxu0 %v6626_v17  ;;  %v6644_v17 = vld [vmem:[#allocation5 + $0x44] ss:$8 sps:$4 sm:$0xff]  }
 0xa71   :  { %6371 = vmatprep.subr.bf16.mxu0 %v8758_v4  ;;  %1681 = vmatpush1.bf16.msra.mxu1 %v6633_v29  ;;  %v6672_v29 = vld [vmem:[#allocation7] sm:$0xff]  }
 0xa72   :  { %1682 = vmatprep.subr.bf16.mxu1 %v6638_v16 }
 0xa74   :  { %6372 = vmatpush3.bf16.msra.mxu0 %v6627_v22  ;;  %v6647_v22 = vld [vmem:[#allocation5 + $0x34] ss:$8 sps:$4 sm:$0xff]  }
 0xa75   :  { %6373 = vmatprep.subr.bf16.mxu0 %v8758_v4  ;;  %1683 = vmatpush1.bf16.msra.mxu1 %v6636_v18 }
 0xa78   :  { %6374 = vmatpush3.bf16.msra.mxu0 %v6628_v23  ;;  %v6645_v23 = vld [vmem:[#allocation5 + $0x30] ss:$8 sps:$4 sm:$0xff]  }
 0xa79   :  { %6375 = vmatprep.subr.bf16.mxu0 %v8758_v4 }
 0xa7c   :  { %6376 = vmatpush3.bf16.msra.mxu0 %v6629_v25  ;;  %v6650_v25 = vld [vmem:[#allocation5 + $0x24] ss:$8 sps:$4 sm:$0xff]  }
 0xa7d   :  { %6377 = vmatprep.subr.bf16.mxu0 %v8758_v4 }
 0xa80   :  { %6378 = vmatpush3.bf16.msra.mxu0 %v6630_v26  ;;  %v6648_v26 = vld [vmem:[#allocation5 + $0x20] ss:$8 sps:$4 sm:$0xff]  }
 0xa81   :  { %6379 = vmatprep.subr.bf16.mxu0 %v8758_v4 }
 0xa84   :  { %6380 = vmatpush3.bf16.msra.mxu0 %v6631_v30  ;;  %v6653_v30 = vld [vmem:[#allocation5 + $0x14] ss:$8 sps:$4 sm:$0xff]  }
 0xa85   :  { %6381 = vmatprep.subr.bf16.mxu0 %v8758_v4 }
 0xa88   :  { %6382 = vmatpush3.bf16.msra.mxu0 %v6632_v31  ;;  %v6651_v31 = vld [vmem:[#allocation5 + $0x10] ss:$8 sps:$4 sm:$0xff]  }
 0xb2b   :  { %v1330_v35 = vpop.f32.mrf.mxu0 }
 0xb2d   :  { %v6359_v36 = vpop.f32.mrf.mxu0 }
 0xb2e   :  { %v6654_v36 = vld [vmem:[#allocation5] ss:$8 sps:$4 sm:$0xff]  }
 0xb2f   :  { %v1333_v37 = vpop.f32.mrf.mxu0  ;;  %v1378_v38 = vpop.f32.mrf.mxu1 }
 0xb30   :  { %v6573_v39 = vpack.i.bf16 %v1378_v38, %v1330_v35  ;;  %v6656_v35 = vld [vmem:[#allocation5 + $0x4] ss:$8 sps:$4 sm:$0xff]  }
 0xb31   :  { %v6360_v41 = vpop.f32.mrf.mxu0  ;;  %v6365_v42 = vpop.f32.mrf.mxu1 }
 0xb32   :  { %6574 = vrot.lane.b32.xlu0 %v6573_v39, %s7390_s26 }
 0xb33   :  { %v1381_v43 = vpop.f32.mrf.mxu1 }
 0xb35   :  { %v6366_v44 = vpop.f32.mrf.mxu1 }
 0xba4   :  { %v6575_v53 = vpop.permute.xlu0 %6574 }
 0xba5   :  { %v6577_v59 = vunpack.i.h.bf16 %v6575_v53  ;;  %v6576_v60 = vunpack.i.l.bf16 %v6575_v53 }
 0xba7   :  { %v1415_v0 = vsel %vm1413_vm5, %v1412_v63, %v6577_v59  ;;  %v1414_v1 = vsel %vm1413_vm5, %v1411_v62, %v6576_v60  ;;  %v6657_v60 = vld [vmem:[#allocation7 + $0x78] sm:$0xff]   ;;  %v6659_v63 = vld [vmem:[#allocation7 + $0x70] sm:$0xff]  }
 0xba8   :  { %v1416_v2 = vpack.c.bf16 %v1415_v0, %v1414_v1  ;;  %v6658_v62 = vld [vmem:[#allocation7 + $0x38] sm:$0xff]   ;;  %6148 = vmatprep.subr.bf16.mxu0 %v6657_v60  ;;  %v6660_v0 = vld [vmem:[#allocation7 + $0x30] sm:$0xff]   ;;  %v6661_v1 = vld [vmem:[#allocation7 + $0x68] sm:$0xff]  }
 0xbaa   :  { %6384 = vmatmul.mubr.bf16.vlgmr.msra.gmra.mxu0 %v1416_v2  ;;  %v6662_v2 = vld [vmem:[#allocation7 + $0x28] sm:$0xff]  }
 0xbab   :  { %6149 = vmatpush3.bf16.msra.mxu0 %v6658_v62 }
 0xbac   :  { %6150 = vmatprep.subr.bf16.mxu0 %v6659_v63 }
 0xbaf   :  { %6151 = vmatpush3.bf16.msra.mxu0 %v6660_v0 }
 0xbb0   :  { %6152 = vmatprep.subr.bf16.mxu0 %v6661_v1 }
 0xbb3   :  { %6153 = vmatpush3.bf16.msra.mxu0 %v6662_v2 }
 0xc6a   :  { %v1522_v28 = vpop.f32.mrf.mxu0 }
 0xc6b   :  { %v1523_v6 = vadd.f32 %v5803_v3, %v1522_v28  ;;  %v6664_v28 = vld [vmem:[#allocation7 + $0x20] sm:$0xff]  }
 0xc6c   :  { %v6385_v13 = vpop.f32.mrf.mxu0 }
 0xc6d   :  { %v1529_v24 = vadd.f32 %v1523_v6, %v7561_v50  ;;  %v6665_v6 = vld [vmem:[#allocation7 + $0x58] sm:$0xff]  }
 0xc6e   :  { %v1525_v5 = vpop.f32.mrf.mxu0  ;;  %v6666_v13 = vld [vmem:[#allocation7 + $0x18] sm:$0xff]  }
 0xc6f   :  { %v1526_v21 = vadd.f32 %v5803_v3, %v1525_v5  ;;  %1533 = vadd.xlane.f32.xlu1 %v1529_v24  ;;  %v6663_v3 = vld [vmem:[#allocation7 + $0x60] sm:$0xff]   ;;  %v6668_v5 = vld [vmem:[#allocation7 + $0x10] sm:$0xff]  }
 0xc70   :  { %v6386_v19 = vpop.f32.mrf.mxu0  ;;  %6154 = vmatprep.subr.bf16.mxu0 %v6663_v3 }
 0xc71   :  { %v1530_v7 = vadd.f32 %v1526_v21, %v7563_v51  ;;  %v6641_v51 = vld [vmem:[#allocation5 + $0x54] ss:$8 sps:$4 sm:$0xff]   ;;  %6155 = vmatpush3.bf16.msra.mxu0 %v6664_v28  ;;  %v6669_v21 = vld [vmem:[#allocation7 + $0x48] sm:$0xff]  }
 0xc72   :  { %1684 = vmatprep.subr.bf16.mxu1 %v6641_v51  ;;  %6156 = vmatprep.subr.bf16.mxu0 %v6665_v6  ;;  %v6670_v19 = vld [vmem:[#allocation7 + $0x8] sm:$0xff]  }
 0xc73   :  { %1535 = vadd.xlane.f32.xlu0 %v1530_v7  ;;  %1685 = vmatpush1.bf16.msra.mxu1 %v6639_v14 }
 0xc74   :  { %1686 = vmatprep.subr.bf16.mxu1 %v6644_v17 }
 0xc75   :  { %6157 = vmatpush3.bf16.msra.mxu0 %v6666_v13 }
 0xc77   :  { %1687 = vmatpush1.bf16.msra.mxu1 %v6642_v20 }
 0xc78   :  { %1688 = vmatprep.subr.bf16.mxu1 %v6647_v22 }
 0xc7b   :  { %1689 = vmatpush1.bf16.msra.mxu1 %v6645_v23 }
 0xc7c   :  { %1690 = vmatprep.subr.bf16.mxu1 %v6650_v25 }
 0xc7f   :  { %1691 = vmatpush1.bf16.msra.mxu1 %v6648_v26 }
 0xc80   :  { %1692 = vmatprep.subr.bf16.mxu1 %v6653_v30 }
 0xc83   :  { %1693 = vmatpush1.bf16.msra.mxu1 %v6651_v31 }
 0xc84   :  { %1694 = vmatprep.subr.bf16.mxu1 %v6656_v35 }
 0xc87   :  { %1695 = vmatpush1.bf16.msra.mxu1 %v6654_v36 }
 0xcf8   :  { %v1534_v33 = vpop.xlane.xlu1 %1533 }
 0xcf9   :  { %v1537_v8 = vmul.f32 0.0078125, %v1534_v33  ;;  %v1593_v33 = vrot.slane %v1588_v32, %v7584_v61 }
 0xcfb   :  { %v1539_v9 = vsub.f32 %v1529_v24, %v1537_v8  ;;  %v6667_v24 = vld [vmem:[#allocation7 + $0x50] sm:$0xff]   ;;  %v1597_v8 = vrot.slane %v1588_v32, %v7574_v55 }
 0xcfc   :  { %v1536_v10 = vpop.xlane.xlu0 %1535  ;;  %6158 = vmatprep.subr.bf16.mxu0 %v6667_v24 }
 0xcfd   :  { %v1538_v11 = vmul.f32 0.0078125, %v1536_v10  ;;  %v1541_v12 = vmul.f32 %v1539_v9, %v1539_v9  ;;  %6159 = vmatpush3.bf16.msra.mxu0 %v6668_v5 }
 0xcfe   :  { %6160 = vmatprep.subr.bf16.mxu0 %v6669_v21  ;;  %v5830_v21 = vld [vmem:[%s8747_s13] ss:$0 sm:$0xff] }
 0xcff   :  { %v1540_v15 = vsub.f32 %v1530_v7, %v1538_v11  ;;  %1543 = vadd.xlane.f32.xlu0 %v1541_v12  ;;  %v6671_v7 = vld [vmem:[#allocation7 + $0x40] sm:$0xff]  }
 0xd01   :  { %v1542_v50 = vmul.f32 %v1540_v15, %v1540_v15  ;;  %6161 = vmatpush3.bf16.msra.mxu0 %v6670_v19 }
 0xd02   :  { %6162 = vmatprep.subr.bf16.mxu0 %v6671_v7 }
 0xd03   :  { %1545 = vadd.xlane.f32.xlu0 %v1542_v50 }
 0xd05   :  { %6163 = vmatpush3.bf16.msra.mxu0 %v6672_v29 }
 0xd06   :  { %6387 = vmatprep.subr.bf16.mxu0 %v8758_v4 }
 0xd88   :  { %v1544_v37 = vpop.xlane.xlu0 %1543 }
 0xd89   :  { %v1547_v38 = vmul.f32 0.0078125, %v1544_v37 }
 0xd8b   :  { %v1549_v39 = vadd.f32 1e-12, %v1547_v38 }
 0xd8c   :  { %v1546_v41 = vpop.xlane.xlu0 %1545 }
 0xd8d   :  { %6893 = vrsqrt.f32 %v1549_v39  ;;  %v1548_v42 = vmul.f32 0.0078125, %v1546_v41 }
 0xd8f   :  { %v1550_v43 = vadd.f32 1e-12, %v1548_v42 }
 0xd91   :  { %6895 = vrsqrt.f32 %v1550_v43 }
 0xd9a   :  { %v6894_v44 = vpop.eup %6893 }
 0xd9b   :  { %v1553_v45 = vmul.f32 %v6894_v44, %v1539_v9 }
 0xd9d   :  { %v1561_v49 = vmul.f32 %v5812_v46, %v1553_v45 }
 0xd9e   :  { %v6896_v47 = vpop.eup %6895 }
 0xd9f   :  { %v1554_v48 = vmul.f32 %v6896_v47, %v1540_v15  ;;  %v7820_v56 = vadd.f32 %v5813_v52, %v1561_v49 }
 0xda1   :  { %v1562_v53 = vmul.f32 %v5812_v46, %v1554_v48 }
 0xda3   :  { %v7822_v58 = vadd.f32 %v5813_v52, %v1562_v53 }
 0xda5   :  { %v1571_v59 = vpack.c.bf16 %v7822_v58, %v7820_v56 }
 0xda7   :  { %1713 = vmatmul.mubr.bf16.vlgmr.msra.gmra.mxu1 %v1571_v59 }
 0xda8   :  { %2191 = vmatprep.mubr.bf16.mxu1 %v7387_v27 }
 0xe67   :  { %v1714_v9 = vpop.f32.mrf.mxu1 }
 0xe68   :  { %v1715_v10 = vadd.f32 %v1714_v9, %v1593_v33 }
 0xe69   :  { %v1716_v11 = vpop.f32.mrf.mxu1 }
 0xe6a   :  { %v1723_v12 = vmul.f32 %v1715_v10, %v1715_v10  ;;  %v1717_v15 = vadd.f32 %v1716_v11, %v1597_v8 }
 0xe6b   :  { %v1718_v50 = vpop.f32.mrf.mxu1 }
 0xe6c   :  { %v1727_v16 = vmul.f32 %v1723_v12, %v1715_v10  ;;  %v1724_v18 = vmul.f32 %v1717_v15, %v1717_v15  ;;  %v1719_v51 = vadd.f32 %v1718_v50, %v1593_v33  ;;  %v6673_v12 = vld [vmem:[#allocation2 + $0x168] ss:$12 sps:$4 sm:$0xff]   ;;  %v6676_v50 = vld [vmem:[#allocation2 + $0x170] ss:$12 sps:$4 sm:$0xff]  }
 0xe6d   :  { %v1720_v14 = vpop.f32.mrf.mxu1 }
 0xe6e   :  { %v1731_v20 = vmul.f32 0.044715, %v1727_v16  ;;  %v1728_v17 = vmul.f32 %v1724_v18, %v1717_v15  ;;  %v1725_v22 = vmul.f32 %v1719_v51, %v1719_v51  ;;  %v1721_v23 = vadd.f32 %v1720_v14, %v1597_v8 }
 0xe70   :  { %v1735_v25 = vadd.f32 %v1731_v20, %v1715_v10  ;;  %v1732_v26 = vmul.f32 0.044715, %v1728_v17  ;;  %v1729_v30 = vmul.f32 %v1725_v22, %v1719_v51  ;;  %v1726_v31 = vmul.f32 %v1721_v23, %v1721_v23  ;;  %v6679_v22 = vld [vmem:[#allocation2 + $0x154] ss:$12 sps:$4 sm:$0xff]  }
 0xe72   :  { %v1739_v35 = vmul.f32 0.7978846, %v1735_v25  ;;  %v1736_v36 = vadd.f32 %v1732_v26, %v1717_v15  ;;  %v1733_v37 = vmul.f32 0.044715, %v1729_v30  ;;  %v1730_v38 = vmul.f32 %v1726_v31, %v1721_v23  ;;  %v6680_v25 = vld [vmem:[#allocation2 + $0x158] ss:$12 sps:$4 sm:$0xff]  }
 0xe73   :  { %v6683_v26 = vld [vmem:[#allocation2 + $0x13c] ss:$12 sps:$4 sm:$0xff]   ;;  %v6681_v30 = vld [vmem:[#allocation2 + $0x138] ss:$12 sps:$4 sm:$0xff]   ;;  %v6684_v31 = vld [vmem:[#allocation2 + $0x140] ss:$12 sps:$4 sm:$0xff]  }
 0xe74   :  { %v1740_v39 = vmul.f32 0.7978846, %v1736_v36  ;;  %v1737_v41 = vadd.f32 %v1733_v37, %v1719_v51  ;;  %v1734_v42 = vmul.f32 0.044715, %v1730_v38  ;;  %6897 = vtanh.f32 %v1739_v35  ;;  %v6685_v35 = vld [vmem:[#allocation2 + $0x120] ss:$12 sps:$4 sm:$0xff]  }
 0xe75   :  { %v6687_v36 = vld [vmem:[#allocation2 + $0x124] ss:$12 sps:$4 sm:$0xff]   ;;  %v6688_v37 = vld [vmem:[#allocation2 + $0x128] ss:$12 sps:$4 sm:$0xff]   ;;  %v6691_v38 = vld [vmem:[#allocation2 + $0x10c] ss:$12 sps:$4 sm:$0xff]  }
 0xe76   :  { %6899 = vtanh.f32 %v1740_v39  ;;  %v1741_v43 = vmul.f32 0.7978846, %v1737_v41  ;;  %v1738_v44 = vadd.f32 %v1734_v42, %v1721_v23  ;;  %v6689_v39 = vld [vmem:[#allocation2 + $0x108] ss:$12 sps:$4 sm:$0xff]   ;;  %v6692_v41 = vld [vmem:[#allocation2 + $0x110] ss:$12 sps:$4 sm:$0xff]  }
 0xe77   :  { %v6695_v42 = vld [vmem:[#allocation2 + $0xf4] ss:$12 sps:$4 sm:$0xff]  }
 0xe78   :  { %6901 = vtanh.f32 %v1741_v43  ;;  %v1742_v45 = vmul.f32 0.7978846, %v1738_v44  ;;  %v6693_v43 = vld [vmem:[#allocation2 + $0xf0] ss:$12 sps:$4 sm:$0xff]   ;;  %v6696_v44 = vld [vmem:[#allocation2 + $0xf8] ss:$12 sps:$4 sm:$0xff]  }
 0xe7a   :  { %6903 = vtanh.f32 %v1742_v45  ;;  %v6699_v45 = vld [vmem:[#allocation2 + $0xdc] ss:$12 sps:$4 sm:$0xff]  }
 0xe81   :  { %v6898_v46 = vpop.eup %6897 }
 0xe82   :  { %v1747_v52 = vadd.f32 1.0, %v6898_v46  ;;  %v6697_v46 = vld [vmem:[#allocation2 + $0xd8] ss:$12 sps:$4 sm:$0xff]  }
 0xe83   :  { %v6900_v47 = vpop.eup %6899 }
 0xe84   :  { %v1748_v48 = vadd.f32 1.0, %v6900_v47  ;;  %v1751_v0 = vmul.f32 0.5, %v1747_v52  ;;  %v6700_v47 = vld [vmem:[#allocation2 + $0xe0] ss:$12 sps:$4 sm:$0xff]   ;;  %v6704_v52 = vld [vmem:[#allocation2 + $0xc8] ss:$12 sps:$4 sm:$0xff]  }
 0xe85   :  { %v6902_v49 = vpop.eup %6901 }
 0xe86   :  { %v1749_v53 = vadd.f32 1.0, %v6902_v49  ;;  %v1752_v63 = vmul.f32 0.5, %v1748_v48  ;;  %v1755_v6 = vmul.f32 %v1751_v0, %v1715_v10  ;;  %v6703_v48 = vld [vmem:[#allocation2 + $0xc4] ss:$12 sps:$4 sm:$0xff]   ;;  %v6701_v49 = vld [vmem:[#allocation2 + $0xc0] ss:$12 sps:$4 sm:$0xff]  }
 0xe87   :  { %v6904_v59 = vpop.eup %6903 }
 0xe88   :  { %v1753_v60 = vmul.f32 0.5, %v1749_v53  ;;  %v1750_v62 = vadd.f32 1.0, %v6904_v59  ;;  %v1756_v3 = vmul.f32 %v1752_v63, %v1717_v15  ;;  %v6675_v15 = vld [vmem:[#allocation2 + $0x16c] ss:$12 sps:$4 sm:$0xff]  }
 0xe89   :  { %2159 = vmatprep.subr.bf16.mxu1 %v6675_v15 }
 0xe8a   :  { %v1754_v1 = vmul.f32 0.5, %v1750_v62  ;;  %v1757_v2 = vmul.f32 %v1753_v60, %v1719_v51  ;;  %2160 = vmatpush1.bf16.msra.mxu1 %v6673_v12 }
 0xe8b   :  { %2161 = vmatprep.subr.bf16.mxu1 %v6679_v22 }
 0xe8c   :  { %v1758_v28 = vmul.f32 %v1754_v1, %v1721_v23  ;;  %v1759_v24 = vpack.c.bf16 %v1757_v2, %v1755_v6  ;;  %v6677_v23 = vld [vmem:[#allocation2 + $0x150] ss:$12 sps:$4 sm:$0xff]  }
 0xe8e   :  { %v1760_v13 = vpack.c.bf16 %v1758_v28, %v1756_v3  ;;  %2162 = vmatpush1.bf16.msra.mxu1 %v6677_v23  ;;  %v5847_v3 = vld [vmem:[%s8748_s14] ss:$0 sm:$0xff] }
 0xe8f   :  { %2163 = vmatprep.subr.bf16.mxu1 %v6683_v26 }
 0xe90   :  { %1928 = vmatprep.mubr.bf16.mxu0 %v1760_v13 }
 0xe91   :  { %1929 = vmatmul.mubr.bf16.vlgmr.msra.gmra.mxu0 %v1759_v24  ;;  %v5848_v24 = vld [vmem:[%s8749_s15] ss:$0 sm:$0xff] }
 0xe92   :  { %6403 = vmatprep.mubr.msk.bf16.mxu0 %vm7388_vm0, %v8758_v4  ;;  %6388 = vmatpush3.bf16.msra.mxu0 %v6676_v50 }
 0xe93   :  { %6389 = vmatprep.subr.bf16.mxu0 %v8758_v4  ;;  %2164 = vmatpush1.bf16.msra.mxu1 %v6681_v30 }
 0xe94   :  { %2165 = vmatprep.subr.bf16.mxu1 %v6687_v36 }
 0xe96   :  { %6390 = vmatpush3.bf16.msra.mxu0 %v6680_v25 }
 0xe97   :  { %6391 = vmatprep.subr.bf16.mxu0 %v8758_v4  ;;  %2166 = vmatpush1.bf16.msra.mxu1 %v6685_v35 }
 0xe98   :  { %2167 = vmatprep.subr.bf16.mxu1 %v6691_v38 }
 0xe9a   :  { %6392 = vmatpush3.bf16.msra.mxu0 %v6684_v31 }
 0xe9b   :  { %6393 = vmatprep.subr.bf16.mxu0 %v8758_v4  ;;  %2168 = vmatpush1.bf16.msra.mxu1 %v6689_v39 }
 0xe9c   :  { %2169 = vmatprep.subr.bf16.mxu1 %v6695_v42 }
 0xe9e   :  { %6394 = vmatpush3.bf16.msra.mxu0 %v6688_v37 }
 0xe9f   :  { %6395 = vmatprep.subr.bf16.mxu0 %v8758_v4  ;;  %2170 = vmatpush1.bf16.msra.mxu1 %v6693_v43 }
 0xea0   :  { %2171 = vmatprep.subr.bf16.mxu1 %v6699_v45 }
 0xea2   :  { %6396 = vmatpush3.bf16.msra.mxu0 %v6692_v41 }
 0xea3   :  { %6397 = vmatprep.subr.bf16.mxu0 %v8758_v4  ;;  %2172 = vmatpush1.bf16.msra.mxu1 %v6697_v46 }
 0xea4   :  { %2173 = vmatprep.subr.bf16.mxu1 %v6703_v48 }
 0xea6   :  { %6398 = vmatpush3.bf16.msra.mxu0 %v6696_v44 }
 0xea7   :  { %6399 = vmatprep.subr.bf16.mxu0 %v8758_v4  ;;  %2174 = vmatpush1.bf16.msra.mxu1 %v6701_v49 }
 0xea8   :  { %6407 = vmatprep.subr.bf16.mxu1 %v8758_v4 }
 0xeaa   :  { %6400 = vmatpush3.bf16.msra.mxu0 %v6700_v47 }
 0xeab   :  { %6401 = vmatprep.subr.bf16.mxu0 %v8758_v4 }
 0xeae   :  { %6402 = vmatpush3.bf16.msra.mxu0 %v6704_v52 }
 0xeaf   :  { %6431 = vmatprep.subr.bf16.mxu0 %v8758_v4 }
 0xf51   :  { %v6164_v5 = vpop.f32.mrf.mxu0 }
 0xf53   :  { %v6165_v19 = vpop.f32.mrf.mxu0 }
 0xf54   :  { %v6166_v7 = vadd.f32 %v6165_v19, %v6164_v5 }
 0xf55   :  { %v6167_v29 = vpop.f32.mrf.mxu0 }
 0xf56   :  { %v1931_v32 = vadd.f32 %v6166_v7, %v5830_v21 }
 0xf57   :  { %v6168_v33 = vpop.f32.mrf.mxu0 }
 0xf58   :  { %v6169_v8 = vadd.f32 %v6168_v33, %v6167_v29  ;;  %v1937_v9 = vadd.f32 %v1931_v32, %v7820_v56  ;;  %v5849_v29 = vld [vmem:[%s8770_s10 + $0x3] sm:$0x7] }
 0xf59   :  { %v2023_v32 = vrot.slane %v5849_v29, %v7574_v55 }
 0xf5a   :  { %v1934_v10 = vadd.f32 %v6169_v8, %v5830_v21  ;;  %1941 = vadd.xlane.f32.xlu1 %v1937_v9 }
 0xf5c   :  { %v1938_v11 = vadd.f32 %v1934_v10, %v7822_v58 }
 0xf5e   :  { %1943 = vadd.xlane.f32.xlu0 %v1938_v11 }
 0xfe3   :  { %v1942_v16 = vpop.xlane.xlu1 %1941 }
 0xfe4   :  { %v1945_v18 = vmul.f32 0.0078125, %v1942_v16  ;;  %v2019_v16 = vrot.slane %v5849_v29, %v7584_v61 }
 0xfe6   :  { %v7841_v51 = vsub.f32 %v1937_v9, %v1945_v18 }
 0xfe7   :  { %v1944_v14 = vpop.xlane.xlu0 %1943 }
 0xfe8   :  { %v1946_v20 = vmul.f32 0.0078125, %v1944_v14  ;;  %v1949_v56 = vmul.f32 %v7841_v51, %v7841_v51 }
 0xfea   :  { %v7845_v17 = vsub.f32 %v1938_v11, %v1946_v20  ;;  %1951 = vadd.xlane.f32.xlu1 %v1949_v56  ;;  %v2027_v11 = vrot.slane %v5849_v29, %v7580_v57 }
 0xfec   :  { %v1950_v58 = vmul.f32 %v7845_v17, %v7845_v17 }
 0xfee   :  { %1953 = vadd.xlane.f32.xlu0 %v1950_v58 }
0x1073   :  { %v1952_v53 = vpop.xlane.xlu1 %1951 }
0x1074   :  { %v1955_v59 = vmul.f32 0.0078125, %v1952_v53 }
0x1076   :  { %v1957_v60 = vadd.f32 1e-12, %v1955_v59 }
0x1077   :  { %v1954_v62 = vpop.xlane.xlu0 %1953 }
0x1078   :  { %6905 = vrsqrt.f32 %v1957_v60  ;;  %v1956_v63 = vmul.f32 0.0078125, %v1954_v62 }
0x107a   :  { %v1958_v0 = vadd.f32 1e-12, %v1956_v63 }
0x107c   :  { %6907 = vrsqrt.f32 %v1958_v0 }
0x1085   :  { %v6906_v1 = vpop.eup %6905 }
0x1086   :  { %v1961_v2 = vmul.f32 %v6906_v1, %v7841_v51 }
0x1088   :  { %v1969_v13 = vmul.f32 %v5847_v3, %v1961_v2 }
0x1089   :  { %v6908_v28 = vpop.eup %6907 }
0x108a   :  { %v1962_v6 = vmul.f32 %v6908_v28, %v7845_v17  ;;  %v7865_v21 = vadd.f32 %v5848_v24, %v1969_v13 }
0x108c   :  { %v1970_v5 = vmul.f32 %v5847_v3, %v1962_v6 }
0x108e   :  { %v7867_v19 = vadd.f32 %v5848_v24, %v1970_v5 }
0x1090   :  { %v1979_v7 = vpack.c.bf16 %v7867_v19, %v7865_v21 }
0x1092   :  { %2192 = vmatmul.mubr.bf16.vlgmr.msra.gmra.mxu1 %v1979_v7  ;;  %6404 = vmatmul.mubr.bf16.vlgmr.msra.gmra.mxu0 %v1979_v7 }
0x1093   :  { %6409 = vmatprep.mubr.msk.bf16.mxu1 %vm7388_vm0, %v8758_v4  ;;  %6433 = vmatprep.mubr.msk.bf16.mxu0 %vm7388_vm0, %v8758_v4 }
0x1152   :  { %v2193_v33 = vpop.f32.mrf.mxu1  ;;  %v2236_v8 = vpop.f32.mrf.mxu0 }
0x1153   :  { %v2194_v58 = vadd.f32 %v2193_v33, %v2019_v16  ;;  %v2237_v25 = vadd.f32 %v2236_v8, %v2027_v11 }
0x1154   :  { %v2195_v9 = vpop.f32.mrf.mxu1  ;;  %v6405_v10 = vpop.f32.mrf.mxu0 }
0x1155   :  { %v2196_v12 = vadd.f32 %v2195_v9, %v2023_v32  ;;  %v7890_v23 = vpack.c.bf16 %v2194_v58, %v2194_v58  ;;  %v7899_v31 = vpack.c.bf16 %v2237_v25, %v2237_v25 }
0x1156   :  { %v2197_v15 = vpop.f32.mrf.mxu1  ;;  %v2239_v50 = vpop.f32.mrf.mxu0 }
0x1157   :  { %v7881_v18 = vpack.c.bf16 %v2196_v12, %v2196_v12  ;;  %v7883_v51 = vadd.f32 %v2239_v50, %v2027_v11  ;;  %v2198_v30 = vadd.f32 %v2197_v15, %v2019_v16  ;;  %v2385_v36 = vsel %vm622_vm2, %v7899_v31, 0 }
0x1158   :  { %v2199_v14 = vpop.f32.mrf.mxu1  ;;  %v6406_v20 = vpop.f32.mrf.mxu0 }
0x1159   :  { %v2200_v56 = vadd.f32 %v2199_v14, %v2023_v32  ;;  %v2265_v17 = vsel %vm497_vm1, %v7881_v18, 0  ;;  %v7901_v35 = vpack.c.bf16 %v2198_v30, %v2198_v30  ;;  %v7931_v33 = vpack.c.bf16 %v7883_v51, %v7883_v51 }
0x115a   :  { %6408 = vmatpush3.bf16.xpose.msra.mxu1 %v2265_v17 }
0x115b   :  { %6413 = vmatprep.subr.bf16.mxu1 %v8758_v4  ;;  %v7888_v22 = vpack.c.bf16 %v2200_v56, %v2200_v56  ;;  %v2431_v10 = vsel %vm622_vm2, %v7931_v33, 0 }
0x115d   :  { %v2311_v26 = vsel %vm497_vm1, %v7888_v22, 0 }
0x1161   :  { %6410 = vmatmul.mubr.msk.bf16.vlgmr.msra.gmra.mxu1 %vm497_vm1, %v7890_v23 }
0x1162   :  { %6414 = vmatpush3.bf16.xpose.msra.mxu1 %v2311_v26  ;;  %6415 = vmatprep.mubr.msk.bf16.mxu1 %vm7388_vm0, %v8758_v4 }
0x1163   :  { %6419 = vmatprep.subr.bf16.mxu1 %v8758_v4 }
0x1169   :  { %6416 = vmatmul.mubr.msk.bf16.vlgmr.msra.gmra.mxu1 %vm497_vm1, %v7901_v35 }
0x116a   :  { %6420 = vmatpush3.bf16.msra.mxu1 %v2385_v36  ;;  %6421 = vmatprep.mubr.msk.bf16.mxu1 %vm7388_vm0, %v8758_v4 }
0x116b   :  { %6425 = vmatprep.subr.bf16.mxu1 %v8758_v4 }
0x1221   :  { %v2301_v37 = vpop.f32.mrf.mxu1 }
0x1222   :  { %v2353_v38 = vmul.f32 0.17677669, %v2301_v37 }
0x1223   :  { %v6411_v39 = vpop.f32.mrf.mxu1 }
0x1224   :  { %v2355_v41 = vadd.f32 %v2353_v38, %v7625_v34 }
0x1225   :  { %v2304_v42 = vpop.f32.mrf.mxu1 }
0x1226   :  { %v2357_v43 = vsel %vm594_vm3, %v2355_v41, -inf }
0x1227   :  { %2358 = vmax.xlane.f32.xlu1 %v2357_v43  ;;  %v6412_v44 = vpop.f32.mrf.mxu1 }
0x1229   :  { %v2347_v45 = vpop.f32.mrf.mxu1 }
0x122a   :  { %v2354_v46 = vmul.f32 0.17677669, %v2347_v45 }
0x122b   :  { %v6417_v47 = vpop.f32.mrf.mxu1 }
0x122c   :  { %v2356_v48 = vadd.f32 %v2354_v46, %v7629_v40 }
0x122d   :  { %v2350_v49 = vpop.f32.mrf.mxu1 }
0x122e   :  { %v2360_v52 = vsel %vm594_vm3, %v2356_v48, -inf }
0x122f   :  { %2361 = vmax.xlane.f32.xlu0 %v2360_v52  ;;  %v6418_v53 = vpop.f32.mrf.mxu1 }
0x12b0   :  { %v2359_v59 = vpop.xlane.xlu1 %2358 }
0x12b1   :  { %v2363_v60 = vsub.f32 %v2355_v41, %v2359_v59 }
0x12b3   :  { %v2365_v62 = vmul.f32 1.442695, %v2363_v60 }
0x12b5   :  { %6909 = vpow2.f32 %v2365_v62 }
0x12b8   :  { %v2362_v63 = vpop.xlane.xlu0 %2361 }
0x12b9   :  { %v2364_v0 = vsub.f32 %v2356_v48, %v2362_v63 }
0x12bb   :  { %v2367_v1 = vmul.f32 1.442695, %v2364_v0 }
0x12bd   :  { %6911 = vpow2.f32 %v2367_v1 }
0x12c2   :  { %v6910_v2 = vpop.eup %6909 }
0x12c3   :  { %v2369_v3 = vsel %vm594_vm3, %v6910_v2, 0.0 }
0x12c4   :  { %2370 = vadd.xlane.f32.xlu1 %v2369_v3 }
0x12ca   :  { %v6912_v28 = vpop.eup %6911 }
0x12cb   :  { %v2372_v6 = vsel %vm594_vm3, %v6912_v28, 0.0 }
0x12cc   :  { %2373 = vadd.xlane.f32.xlu0 %v2372_v6 }
0x12d5   :  { %2475 = vrot.lane.b32.xlu1 %v7881_v18, %s7390_s26 }
0x12d9   :  { %2473 = vrot.lane.b32.xlu1 %v7890_v23, %s7390_s26 }
0x12dd   :  { %2523 = vrot.lane.b32.xlu1 %v7901_v35, %s7390_s26 }
0x12e2   :  { %2525 = vrot.lane.b32.xlu0 %v7888_v22, %s7390_s26 }
0x134d   :  { %v2371_v13 = vpop.xlane.xlu1 %2370 }
0x134e   :  { %6913 = vrcp.f32 %v2371_v13 }
0x1351   :  { %v2476_v24 = vpop.permute.xlu1 %2475 }
0x1352   :  { %v2481_v5 = vsel %vm497_vm1, %v2476_v24, 0 }
0x1353   :  { %6432 = vmatpush3.bf16.xpose.msra.mxu0 %v2481_v5 }
0x1354   :  { %6443 = vmatprep.subr.bf16.mxu0 %v8758_v4 }
0x1355   :  { %v2374_v7 = vpop.xlane.xlu0 %2373  ;;  %v2474_v29 = vpop.permute.xlu1 %2473 }
0x1356   :  { %6915 = vrcp.f32 %v2374_v7 }
0x1359   :  { %v2526_v15 = vpop.permute.xlu0 %2525  ;;  %v2524_v51 = vpop.permute.xlu1 %2523 }
0x135a   :  { %6434 = vmatmul.mubr.msk.bf16.vlgmr.msra.gmra.mxu0 %vm497_vm1, %v2474_v29  ;;  %v2531_v16 = vsel %vm497_vm1, %v2526_v15, 0 }
0x135b   :  { %v6914_v32 = vpop.eup %6913  ;;  %6445 = vmatprep.mubr.msk.bf16.mxu0 %vm7388_vm0, %v8758_v4 }
0x135c   :  { %v2377_v8 = vmul.f32 %v6914_v32, %v6910_v2 }
0x135e   :  { %v2379_v9 = vpack.c.bf16 %v2377_v8, %v2377_v8 }
0x1360   :  { %6422 = vmatmul.mubr.msk.bf16.vlgmr.msra.gmra.mxu1 %vm594_vm3, %v2379_v9 }
0x1361   :  { %6426 = vmatpush3.bf16.msra.mxu1 %v2431_v10  ;;  %6427 = vmatprep.mubr.msk.bf16.mxu1 %vm7388_vm0, %v8758_v4 }
0x1362   :  { %6437 = vmatprep.subr.bf16.mxu1 %v8758_v4 }
0x1363   :  { %v6916_v11 = vpop.eup %6915 }
0x1364   :  { %v2378_v12 = vmul.f32 %v6916_v11, %v6912_v28 }
0x1366   :  { %v2380_v50 = vpack.c.bf16 %v2378_v12, %v2378_v12 }
0x1368   :  { %6428 = vmatmul.mubr.msk.bf16.vlgmr.msra.gmra.mxu1 %vm594_vm3, %v2380_v50 }
0x1369   :  { %6438 = vmatpush3.bf16.xpose.msra.mxu1 %v2531_v16  ;;  %6439 = vmatprep.mubr.msk.bf16.mxu1 %vm7388_vm0, %v8758_v4 }
0x136a   :  { %6449 = vmatprep.subr.bf16.mxu1 %v8758_v4 }
0x1370   :  { %6440 = vmatmul.mubr.msk.bf16.vlgmr.msra.gmra.mxu1 %vm497_vm1, %v2524_v51 }
0x1371   :  { %6451 = vmatprep.mubr.msk.bf16.mxu1 %vm7388_vm0, %v8758_v4 }
0x141a   :  { %v2517_v14 = vpop.f32.mrf.mxu0 }
0x141b   :  { %v2573_v20 = vmul.f32 0.17677669, %v2517_v14 }
0x141c   :  { %v6435_v56 = vpop.f32.mrf.mxu0 }
0x141d   :  { %v2575_v17 = vadd.f32 %v2573_v20, %v7625_v34 }
0x141e   :  { %v2520_v58 = vpop.f32.mrf.mxu0 }
0x141f   :  { %v2577_v25 = vsel %vm594_vm3, %v2575_v17, -inf }
0x1420   :  { %2578 = vmax.xlane.f32.xlu1 %v2577_v25  ;;  %v7949_v26 = vpop.f32.mrf.mxu1  ;;  %v6436_v30 = vpop.f32.mrf.mxu0 }
0x1422   :  { %v6423_v36 = vpop.f32.mrf.mxu1 }
0x1424   :  { %v2424_v37 = vpop.f32.mrf.mxu1 }
0x1426   :  { %v6424_v38 = vpop.f32.mrf.mxu1 }
0x1428   :  { %v7951_v39 = vpop.f32.mrf.mxu1 }
0x142a   :  { %v6429_v41 = vpop.f32.mrf.mxu1 }
0x142c   :  { %v2470_v42 = vpop.f32.mrf.mxu1 }
0x142e   :  { %v6430_v43 = vpop.f32.mrf.mxu1 }
0x1430   :  { %v2567_v44 = vpop.f32.mrf.mxu1 }
0x1431   :  { %v2574_v45 = vmul.f32 0.17677669, %v2567_v44  ;;  %2601 = vrot.lane.b32.xlu1 %v7899_v31, %s7390_s26 }
0x1432   :  { %v6441_v46 = vpop.f32.mrf.mxu1 }
0x1433   :  { %v2576_v47 = vadd.f32 %v2574_v45, %v7629_v40 }
0x1434   :  { %v2570_v48 = vpop.f32.mrf.mxu1 }
0x1435   :  { %2699 = vrot.lane.b32.xlu1 %v7881_v18, %s7383_s4  ;;  %v2580_v49 = vsel %vm594_vm3, %v2576_v47, -inf }
0x1436   :  { %2581 = vmax.xlane.f32.xlu0 %v2580_v49  ;;  %v6442_v52 = vpop.f32.mrf.mxu1 }
0x1439   :  { %2749 = vrot.lane.b32.xlu1 %v7888_v22, %s7383_s4 }
0x143d   :  { %2697 = vrot.lane.b32.xlu1 %v7890_v23, %s7383_s4 }
0x14a9   :  { %v2579_v53 = vpop.xlane.xlu1 %2578 }
0x14aa   :  { %v2583_v59 = vsub.f32 %v2575_v17, %v2579_v53 }
0x14ac   :  { %v2585_v60 = vmul.f32 1.442695, %v2583_v59 }
0x14ad   :  { %v2602_v62 = vpop.permute.xlu1 %2601 }
0x14ae   :  { %6917 = vpow2.f32 %v2585_v60  ;;  %v2607_v63 = vsel %vm622_vm2, %v2602_v62, 0 }
0x14af   :  { %6444 = vmatpush3.bf16.msra.mxu0 %v2607_v63 }
0x14b0   :  { %6455 = vmatprep.subr.bf16.mxu0 %v8758_v4 }
0x14b1   :  { %v2700_v7 = vpop.permute.xlu1 %2699 }
0x14b2   :  { %v2705_v8 = vsel %vm497_vm1, %v2700_v7, 0 }
0x14b5   :  { %v2750_v9 = vpop.permute.xlu1 %2749 }
0x14b6   :  { %v2755_v14 = vsel %vm497_vm1, %v2750_v9, 0 }
0x14b9   :  { %v2698_v11 = vpop.permute.xlu1 %2697 }
0x14bb   :  { %v6918_v0 = vpop.eup %6917 }
0x14bc   :  { %v2589_v1 = vsel %vm594_vm3, %v6918_v0, 0.0 }
0x14bd   :  { %2590 = vadd.xlane.f32.xlu0 %v2589_v1 }
0x14bf   :  { %v2582_v2 = vpop.xlane.xlu0 %2581 }
0x14c0   :  { %v2584_v3 = vsub.f32 %v2576_v47, %v2582_v2 }
0x14c2   :  { %v2587_v28 = vmul.f32 1.442695, %v2584_v3 }
0x14c4   :  { %6919 = vpow2.f32 %v2587_v28 }
0x14d1   :  { %v6920_v6 = vpop.eup %6919 }
0x14d2   :  { %v2592_v13 = vsel %vm594_vm3, %v6920_v6, 0.0 }
0x14d3   :  { %2593 = vadd.xlane.f32.xlu0 %v2592_v13 }
0x14e9   :  { %2649 = vrot.lane.b32.xlu0 %v7931_v33, %s7390_s26 }
0x14ed   :  { %2747 = vrot.lane.b32.xlu0 %v7901_v35, %s7383_s4 }
0x1546   :  { %v2591_v24 = vpop.xlane.xlu0 %2590 }
0x1547   :  { %6921 = vrcp.f32 %v2591_v24 }
0x1554   :  { %v6922_v5 = vpop.eup %6921 }
0x1555   :  { %v2597_v29 = vmul.f32 %v6922_v5, %v6918_v0 }
0x1557   :  { %v2599_v32 = vpack.c.bf16 %v2597_v29, %v2597_v29 }
0x1559   :  { %6446 = vmatmul.mubr.msk.bf16.vlgmr.msra.gmra.mxu0 %vm594_vm3, %v2599_v32 }
0x155a   :  { %6456 = vmatpush3.bf16.xpose.msra.mxu0 %v2705_v8  ;;  %6457 = vmatprep.mubr.msk.bf16.mxu0 %vm7388_vm0, %v8758_v4 }
0x155b   :  { %6467 = vmatprep.subr.bf16.mxu0 %v8758_v4 }
0x155c   :  { %v2594_v10 = vpop.xlane.xlu0 %2593 }
0x155d   :  { %6923 = vrcp.f32 %v2594_v10 }
0x1560   :  { %v2650_v12 = vpop.permute.xlu0 %2649 }
0x1561   :  { %v2655_v15 = vsel %vm622_vm2, %v2650_v12, 0  ;;  %6458 = vmatmul.mubr.msk.bf16.vlgmr.msra.gmra.mxu0 %vm497_vm1, %v2698_v11 }
0x1562   :  { %6450 = vmatpush3.bf16.msra.mxu1 %v2655_v15  ;;  %6469 = vmatprep.mubr.msk.bf16.mxu0 %vm7388_vm0, %v8758_v4 }
0x1563   :  { %6461 = vmatprep.subr.bf16.mxu1 %v8758_v4 }
0x1564   :  { %v2748_v20 = vpop.permute.xlu0 %2747 }
0x156a   :  { %v6924_v50 = vpop.eup %6923 }
0x156b   :  { %v2598_v16 = vmul.f32 %v6924_v50, %v6920_v6 }
0x156d   :  { %v2600_v51 = vpack.c.bf16 %v2598_v16, %v2598_v16 }
0x156f   :  { %6452 = vmatmul.mubr.msk.bf16.vlgmr.msra.gmra.mxu1 %vm594_vm3, %v2600_v51 }
0x1570   :  { %6462 = vmatpush3.bf16.xpose.msra.mxu1 %v2755_v14  ;;  %6463 = vmatprep.mubr.msk.bf16.mxu1 %vm7388_vm0, %v8758_v4 }
0x1571   :  { %6473 = vmatprep.subr.bf16.mxu1 %v8758_v4 }
0x1577   :  { %6464 = vmatmul.mubr.msk.bf16.vlgmr.msra.gmra.mxu1 %vm497_vm1, %v2748_v20 }
0x1578   :  { %6475 = vmatprep.mubr.msk.bf16.mxu1 %vm7388_vm0, %v8758_v4 }
0x1619   :  { %v7989_v56 = vpop.f32.mrf.mxu0 }
0x161b   :  { %v6447_v17 = vpop.f32.mrf.mxu0 }
0x161d   :  { %v2646_v58 = vpop.f32.mrf.mxu0 }
0x161f   :  { %v6448_v25 = vpop.f32.mrf.mxu0 }
0x1621   :  { %v2741_v30 = vpop.f32.mrf.mxu0 }
0x1622   :  { %v2797_v36 = vmul.f32 0.17677669, %v2741_v30 }
0x1623   :  { %v6459_v37 = vpop.f32.mrf.mxu0 }
0x1624   :  { %v2799_v38 = vadd.f32 %v2797_v36, %v7625_v34 }
0x1625   :  { %v2744_v41 = vpop.f32.mrf.mxu0 }
0x1626   :  { %v2801_v42 = vsel %vm594_vm3, %v2799_v38, -inf }
0x1627   :  { %2802 = vmax.xlane.f32.xlu1 %v2801_v42  ;;  %v6460_v43 = vpop.f32.mrf.mxu0 }
0x162f   :  { %v7993_v44 = vpop.f32.mrf.mxu1 }
0x1630   :  { %v6578_v45 = vpack.i.bf16 %v7993_v44, %v7989_v56 }
0x1631   :  { %v6453_v46 = vpop.f32.mrf.mxu1 }
0x1633   :  { %v2694_v47 = vpop.f32.mrf.mxu1 }
0x1635   :  { %v6454_v48 = vpop.f32.mrf.mxu1 }
0x1637   :  { %v2791_v49 = vpop.f32.mrf.mxu1 }
0x1638   :  { %v2798_v52 = vmul.f32 0.17677669, %v2791_v49  ;;  %2825 = vrot.lane.b32.xlu1 %v7899_v31, %s7383_s4 }
0x1639   :  { %v6465_v53 = vpop.f32.mrf.mxu1 }
0x163a   :  { %v2800_v59 = vadd.f32 %v2798_v52, %v7629_v40 }
0x163b   :  { %v2794_v60 = vpop.f32.mrf.mxu1 }
0x163c   :  { %2923 = vrot.lane.b32.xlu1 %v7881_v18, %s7391_s12  ;;  %v2804_v62 = vsel %vm594_vm3, %v2800_v59, -inf }
0x163d   :  { %2805 = vmax.xlane.f32.xlu0 %v2804_v62  ;;  %v6466_v63 = vpop.f32.mrf.mxu1 }
0x1640   :  { %2973 = vrot.lane.b32.xlu1 %v7888_v22, %s7391_s12 }
0x1644   :  { %2921 = vrot.lane.b32.xlu1 %v7890_v23, %s7391_s12 }
0x16b0   :  { %v2803_v0 = vpop.xlane.xlu1 %2802 }
0x16b1   :  { %v2807_v1 = vsub.f32 %v2799_v38, %v2803_v0 }
0x16b3   :  { %v2809_v2 = vmul.f32 1.442695, %v2807_v1 }
0x16b4   :  { %v2826_v3 = vpop.permute.xlu1 %2825 }
0x16b5   :  { %6925 = vpow2.f32 %v2809_v2  ;;  %v2831_v28 = vsel %vm622_vm2, %v2826_v3, 0 }
0x16b6   :  { %6468 = vmatpush3.bf16.msra.mxu0 %v2831_v28 }
0x16b7   :  { %6479 = vmatprep.subr.bf16.mxu0 %v8758_v4 }
0x16b8   :  { %v2924_v32 = vpop.permute.xlu1 %2923 }
0x16b9   :  { %v2929_v10 = vsel %vm497_vm1, %v2924_v32, 0 }
0x16bc   :  { %v2974_v11 = vpop.permute.xlu1 %2973 }
0x16bd   :  { %v2979_v20 = vsel %vm497_vm1, %v2974_v11, 0 }
0x16c2   :  { %v6926_v18 = vpop.eup %6925 }
0x16c3   :  { %v2813_v6 = vsel %vm594_vm3, %v6926_v18, 0.0 }
0x16c4   :  { %2814 = vadd.xlane.f32.xlu0 %v2813_v6 }
0x16c6   :  { %v2806_v13 = vpop.xlane.xlu0 %2805 }
0x16c7   :  { %v2808_v24 = vsub.f32 %v2800_v59, %v2806_v13 }
0x16c9   :  { %v2811_v22 = vmul.f32 1.442695, %v2808_v24 }
0x16cb   :  { %6927 = vpow2.f32 %v2811_v22 }
0x16d8   :  { %v6928_v5 = vpop.eup %6927 }
0x16d9   :  { %v2816_v23 = vsel %vm594_vm3, %v6928_v5, 0.0 }
0x16da   :  { %2817 = vadd.xlane.f32.xlu0 %v2816_v23 }
0x16f0   :  { %2873 = vrot.lane.b32.xlu0 %v7931_v33, %s7383_s4 }
0x16f4   :  { %2971 = vrot.lane.b32.xlu0 %v7901_v35, %s7391_s12  ;;  %v2922_v35 = vpop.permute.xlu1 %2921 }
0x174d   :  { %v2815_v7 = vpop.xlane.xlu0 %2814 }
0x174e   :  { %6929 = vrcp.f32 %v2815_v7 }
0x175b   :  { %v6930_v29 = vpop.eup %6929 }
0x175c   :  { %v2821_v8 = vmul.f32 %v6930_v29, %v6926_v18 }
0x175e   :  { %v2823_v9 = vpack.c.bf16 %v2821_v8, %v2821_v8 }
0x1760   :  { %6470 = vmatmul.mubr.msk.bf16.vlgmr.msra.gmra.mxu0 %vm594_vm3, %v2823_v9 }
0x1761   :  { %6480 = vmatpush3.bf16.xpose.msra.mxu0 %v2929_v10  ;;  %6481 = vmatprep.mubr.msk.bf16.mxu0 %vm7388_vm0, %v8758_v4 }
0x1762   :  { %6491 = vmatprep.subr.bf16.mxu0 %v8758_v4 }
0x1763   :  { %v2818_v12 = vpop.xlane.xlu0 %2817 }
0x1764   :  { %6931 = vrcp.f32 %v2818_v12 }
0x1767   :  { %v2874_v15 = vpop.permute.xlu0 %2873 }
0x1768   :  { %v2879_v50 = vsel %vm622_vm2, %v2874_v15, 0  ;;  %6482 = vmatmul.mubr.msk.bf16.vlgmr.msra.gmra.mxu0 %vm497_vm1, %v2922_v35  ;;  %v6706_v35 = vld [vmem:[%s8740_s6 + $0x70] sm:$0xff]   ;;  %v6707_v15 = vld [vmem:[%s8740_s6 + $0x68] sm:$0xff]  }
0x1769   :  { %6474 = vmatpush3.bf16.msra.mxu1 %v2879_v50  ;;  %6493 = vmatprep.mubr.msk.bf16.mxu0 %vm7388_vm0, %v8758_v4  ;;  %v6708_v50 = vld [vmem:[%s8740_s6 + $0x60] sm:$0xff]  }
0x176a   :  { %6485 = vmatprep.subr.bf16.mxu1 %v8758_v4 }
0x176b   :  { %v2972_v17 = vpop.permute.xlu0 %2971 }
0x1771   :  { %v6932_v16 = vpop.eup %6931 }
0x1772   :  { %v2822_v51 = vmul.f32 %v6932_v16, %v6928_v5  ;;  %v6709_v16 = vld [vmem:[%s8740_s6 + $0x58] sm:$0xff]  }
0x1774   :  { %v2824_v14 = vpack.c.bf16 %v2822_v51, %v2822_v51  ;;  %v6710_v51 = vld [vmem:[%s8740_s6 + $0x50] sm:$0xff]  }
0x1776   :  { %6476 = vmatmul.mubr.msk.bf16.vlgmr.msra.gmra.mxu1 %vm594_vm3, %v2824_v14  ;;  %v6711_v14 = vld [vmem:[%s8740_s6 + $0x48] sm:$0xff]  }
0x1777   :  { %6486 = vmatpush3.bf16.xpose.msra.mxu1 %v2979_v20  ;;  %6487 = vmatprep.mubr.msk.bf16.mxu1 %vm7388_vm0, %v8758_v4 }
0x1778   :  { %6497 = vmatprep.subr.bf16.mxu1 %v8758_v4 }
0x177e   :  { %6488 = vmatmul.mubr.msk.bf16.vlgmr.msra.gmra.mxu1 %vm497_vm1, %v2972_v17 }
0x177f   :  { %6499 = vmatprep.mubr.msk.bf16.mxu1 %vm7388_vm0, %v8758_v4 }
0x1820   :  { %v2867_v58 = vpop.f32.mrf.mxu0 }
0x1822   :  { %v6471_v25 = vpop.f32.mrf.mxu0 }
0x1824   :  { %v2870_v30 = vpop.f32.mrf.mxu0 }
0x1825   :  { %v6712_v30 = vld [vmem:[%s8740_s6 + $0x40] sm:$0xff]  }
0x1826   :  { %v6472_v36 = vpop.f32.mrf.mxu0 }
0x1828   :  { %v2965_v37 = vpop.f32.mrf.mxu0 }
0x1829   :  { %v3021_v38 = vmul.f32 0.17677669, %v2965_v37 }
0x182a   :  { %v6483_v41 = vpop.f32.mrf.mxu0 }
0x182b   :  { %v3023_v42 = vadd.f32 %v3021_v38, %v7625_v34 }
0x182c   :  { %v2968_v43 = vpop.f32.mrf.mxu0 }
0x182d   :  { %v3025_v46 = vsel %vm594_vm3, %v3023_v42, -inf }
0x182e   :  { %3026 = vmax.xlane.f32.xlu1 %v3025_v46  ;;  %v6484_v47 = vpop.f32.mrf.mxu0 }
0x1836   :  { %v2915_v48 = vpop.f32.mrf.mxu1 }
0x1837   :  { %v6583_v2 = vpack.i.bf16 %v2915_v48, %v2867_v58 }
0x1838   :  { %v6477_v49 = vpop.f32.mrf.mxu1 }
0x183a   :  { %v2918_v52 = vpop.f32.mrf.mxu1 }
0x183c   :  { %v6478_v53 = vpop.f32.mrf.mxu1 }
0x183e   :  { %v3015_v59 = vpop.f32.mrf.mxu1 }
0x183f   :  { %v3022_v60 = vmul.f32 0.17677669, %v3015_v59  ;;  %3049 = vrot.lane.b32.xlu1 %v7899_v31, %s7391_s12 }
0x1840   :  { %v6489_v62 = vpop.f32.mrf.mxu1 }
0x1841   :  { %v3024_v63 = vadd.f32 %v3022_v60, %v7629_v40 }
0x1842   :  { %v3018_v0 = vpop.f32.mrf.mxu1 }
0x1843   :  { %6579 = vrot.lane.b32.xlu1 %v6578_v45, %s7391_s12  ;;  %v3028_v34 = vsel %vm594_vm3, %v3024_v63, -inf }
0x1844   :  { %3029 = vmax.xlane.f32.xlu0 %v3028_v34  ;;  %v6490_v1 = vpop.f32.mrf.mxu1 }
0x1847   :  { %6584 = vrot.lane.b32.xlu1 %v6583_v2, %s7383_s4  ;;  %s7392_s4 = smov [#allocation11]  }
0x18b7   :  { %v3027_v3 = vpop.xlane.xlu1 %3026 }
0x18b8   :  { %v3031_v28 = vsub.f32 %v3023_v42, %v3027_v3 }
0x18ba   :  { %v3033_v18 = vmul.f32 1.442695, %v3031_v28  ;;  %v5913_v28 = vld [vmem:[%s8741_s7 + $0x1] ss:$0 sm:$0xff] }
0x18bb   :  { %v3050_v31 = vpop.permute.xlu1 %3049 }
0x18bc   :  { %6933 = vpow2.f32 %v3033_v18  ;;  %v3055_v40 = vsel %vm622_vm2, %v3050_v31, 0 }
0x18bd   :  { %6492 = vmatpush3.bf16.msra.mxu0 %v3055_v40 }
0x18be   :  { %6503 = vmatprep.subr.bf16.mxu0 %v8758_v4 }
0x18bf   :  { %v6580_v43 = vpop.permute.xlu1 %6579 }
0x18c0   :  { %v6582_v47 = vunpack.i.h.bf16 %v6580_v43  ;;  %v6581_v48 = vunpack.i.l.bf16 %v6580_v43 }
0x18c2   :  { %v3170_v59 = vsel %vm497_vm1, %v7951_v39, %v6582_v47  ;;  %v3169_v60 = vsel %vm497_vm1, %v7949_v26, %v6581_v48  ;;  %v5925_v48 = vld [vmem:[%s8743_s9 + $0x1] ss:$0 sm:$0xff] }
0x18c3   :  { %v6585_v46 = vpop.permute.xlu1 %6584 }
0x18c4   :  { %v6587_v49 = vunpack.i.h.bf16 %v6585_v46  ;;  %v6586_v52 = vunpack.i.l.bf16 %v6585_v46 }
0x18c6   :  { %v3172_v0 = vsel %vm1410_vm4, %v3170_v59, %v6587_v49  ;;  %v3171_v34 = vsel %vm1410_vm4, %v3169_v60, %v6586_v52  ;;  %v6737_v60 = vld [vmem:[#allocation7 + $0xf8] sm:$0xff]  }
0x18c9   :  { %v6934_v6 = vpop.eup %6933 }
0x18ca   :  { %v3037_v56 = vsel %vm594_vm3, %v6934_v6, 0.0 }
0x18cb   :  { %3038 = vadd.xlane.f32.xlu0 %v3037_v56 }
0x18cd   :  { %v3030_v44 = vpop.xlane.xlu0 %3029 }
0x18ce   :  { %v3032_v45 = vsub.f32 %v3024_v63, %v3030_v44 }
0x18d0   :  { %v3035_v13 = vmul.f32 1.442695, %v3032_v45  ;;  %v6713_v45 = vld [vmem:[#allocation5 + $0xf0] ss:$8 sps:$4 sm:$0xff]  }
0x18d2   :  { %6935 = vpow2.f32 %v3035_v13  ;;  %v6715_v13 = vld [vmem:[#allocation5 + $0xf4] ss:$8 sps:$4 sm:$0xff]  }
0x18df   :  { %v6936_v24 = vpop.eup %6935 }
0x18e0   :  { %v3040_v22 = vsel %vm594_vm3, %v6936_v24, 0.0 }
0x18e1   :  { %3041 = vadd.xlane.f32.xlu0 %v3040_v22 }
0x18f7   :  { %3097 = vrot.lane.b32.xlu0 %v7931_v33, %s7391_s12  ;;  %v6705_v33 = vld [vmem:[%s8740_s6 + $0x78] sm:$0xff]  }
0x1954   :  { %v3039_v5 = vpop.xlane.xlu0 %3038 }
0x1955   :  { %6937 = vrcp.f32 %v3039_v5 }
0x1962   :  { %v6938_v23 = vpop.eup %6937 }
0x1963   :  { %v3045_v7 = vmul.f32 %v6938_v23, %v6934_v6 }
0x1965   :  { %v3047_v29 = vpack.c.bf16 %v3045_v7, %v3045_v7 }
0x1967   :  { %6494 = vmatmul.mubr.msk.bf16.vlgmr.msra.gmra.mxu0 %vm594_vm3, %v3047_v29 }
0x1968   :  { %6519 = vmatprep.mubr.msk.bf16.mxu0 %vm7388_vm0, %v8758_v4  ;;  %6504 = vmatpush3.bf16.msra.mxu0 %v6705_v33  ;;  %v6727_v33 = vld [vmem:[#allocation5 + $0xb4] ss:$8 sps:$4 sm:$0xff]  }
0x1969   :  { %6505 = vmatprep.subr.bf16.mxu0 %v8758_v4 }
0x196a   :  { %v3042_v32 = vpop.xlane.xlu0 %3041 }
0x196b   :  { %6939 = vrcp.f32 %v3042_v32 }
0x196c   :  { %6506 = vmatpush3.bf16.msra.mxu0 %v6706_v35  ;;  %v6725_v35 = vld [vmem:[#allocation5 + $0xb0] ss:$8 sps:$4 sm:$0xff]  }
0x196d   :  { %6507 = vmatprep.subr.bf16.mxu0 %v8758_v4 }
0x196e   :  { %v3098_v8 = vpop.permute.xlu0 %3097 }
0x196f   :  { %v3103_v9 = vsel %vm622_vm2, %v3098_v8, 0  ;;  %v6718_v8 = vld [vmem:[#allocation5 + $0xe4] ss:$8 sps:$4 sm:$0xff]  }
0x1970   :  { %6498 = vmatpush3.bf16.msra.mxu1 %v3103_v9  ;;  %6508 = vmatpush3.bf16.msra.mxu0 %v6707_v15  ;;  %v6716_v9 = vld [vmem:[#allocation5 + $0xe0] ss:$8 sps:$4 sm:$0xff]   ;;  %v6730_v15 = vld [vmem:[#allocation5 + $0xa4] ss:$8 sps:$4 sm:$0xff]  }
0x1971   :  { %6509 = vmatprep.subr.bf16.mxu0 %v8758_v4  ;;  %3445 = vmatprep.subr.bf16.mxu1 %v6715_v13 }
0x1974   :  { %6510 = vmatpush3.bf16.msra.mxu0 %v6708_v50  ;;  %v6728_v50 = vld [vmem:[#allocation5 + $0xa0] ss:$8 sps:$4 sm:$0xff]  }
0x1975   :  { %6511 = vmatprep.subr.bf16.mxu0 %v8758_v4 }
0x1978   :  { %v6940_v10 = vpop.eup %6939  ;;  %6512 = vmatpush3.bf16.msra.mxu0 %v6709_v16  ;;  %v6733_v16 = vld [vmem:[#allocation5 + $0x94] ss:$8 sps:$4 sm:$0xff]  }
0x1979   :  { %v3046_v11 = vmul.f32 %v6940_v10, %v6936_v24  ;;  %6513 = vmatprep.subr.bf16.mxu0 %v8758_v4  ;;  %v6719_v10 = vld [vmem:[#allocation5 + $0xd0] ss:$8 sps:$4 sm:$0xff]  }
0x197b   :  { %v3048_v12 = vpack.c.bf16 %v3046_v11, %v3046_v11  ;;  %v6722_v11 = vld [vmem:[#allocation5 + $0xc0] ss:$8 sps:$4 sm:$0xff]  }
0x197c   :  { %6514 = vmatpush3.bf16.msra.mxu0 %v6710_v51  ;;  %v6731_v51 = vld [vmem:[#allocation5 + $0x90] ss:$8 sps:$4 sm:$0xff]  }
0x197d   :  { %6500 = vmatmul.mubr.msk.bf16.vlgmr.msra.gmra.mxu1 %vm594_vm3, %v3048_v12  ;;  %6515 = vmatprep.subr.bf16.mxu0 %v8758_v4  ;;  %v6724_v12 = vld [vmem:[#allocation5 + $0xc4] ss:$8 sps:$4 sm:$0xff]  }
0x197e   :  { %3477 = vmatprep.mubr.bf16.mxu1 %v7387_v27  ;;  %3446 = vmatpush1.bf16.msra.mxu1 %v6713_v45 }
0x197f   :  { %3447 = vmatprep.subr.bf16.mxu1 %v6718_v8 }
0x1980   :  { %6516 = vmatpush3.bf16.msra.mxu0 %v6711_v14  ;;  %v6736_v14 = vld [vmem:[#allocation5 + $0x84] ss:$8 sps:$4 sm:$0xff]  }
0x1981   :  { %6517 = vmatprep.subr.bf16.mxu0 %v8758_v4  ;;  %v3797_v4 = vsub.s32 3, %v7571_v54 }
0x1982   :  { %3448 = vmatpush1.bf16.msra.mxu1 %v6716_v9 }
0x1984   :  { %6518 = vmatpush3.bf16.msra.mxu0 %v6712_v30 }
0x1985   :  { %6220 = vmatprep.subr.bf16.mxu0 %v6737_v60 }
0x1a27   :  { %v3091_v20 = vpop.f32.mrf.mxu0 }
0x1a29   :  { %v6495_v17 = vpop.f32.mrf.mxu0 }
0x1a2b   :  { %v3094_v58 = vpop.f32.mrf.mxu0 }
0x1a2d   :  { %v6496_v25 = vpop.f32.mrf.mxu0 }
0x1a3d   :  { %v3139_v36 = vpop.f32.mrf.mxu1 }
0x1a3e   :  { %v6588_v37 = vpack.i.bf16 %v3139_v36, %v3091_v20  ;;  %v6734_v20 = vld [vmem:[#allocation5 + $0x80] ss:$8 sps:$4 sm:$0xff]  }
0x1a3f   :  { %v6501_v38 = vpop.f32.mrf.mxu1 }
0x1a40   :  { %6589 = vrot.lane.b32.xlu1 %v6588_v37, %s7390_s26 }
0x1a41   :  { %v3142_v41 = vpop.f32.mrf.mxu1 }
0x1a43   :  { %v6502_v42 = vpop.f32.mrf.mxu1 }
0x1a44   :  { %v5924_v42 = vld [vmem:[%s8742_s8 + $0x1] ss:$0 sm:$0xff]  ;;  %s5744_s8 = sshll.u32 %s7392_s4, 4  ;;  %s5745_s8 = int_to_ptr.vmem [resolvable:$true] %s5744_s8 }
0x1a45   :  { %s7345_s9 = scalar_lea.vmem %s5745_s8, 32  ;;  %p7350_p12 = scmp.lt.s32.totalorder %s5745_s8, %s5745_s8 }
0x1a46   :  { %p7346_p11 = scmp.ne.s32.totalorder %s5745_s8, %s7345_s9  ;;  %p7351_p13 = scmp.lt.s32.totalorder %s7345_s9, %s7345_s9 }
0x1a48   :  { %p7352_p0 = por %p7351_p13, %p7350_p12 }
0x1a4a   :  { %p7353_p1 = pnand %p7352_p0, %p7346_p11 }
0x1ab2   :  { %v6590_v53 = vpop.permute.xlu1 %6589 }
0x1ab3   :  { %v6592_v62 = vunpack.i.h.bf16 %v6590_v53  ;;  %v6591_v63 = vunpack.i.l.bf16 %v6590_v53 }
0x1ab5   :  { %v3174_v1 = vsel %vm1413_vm5, %v3172_v0, %v6592_v62  ;;  %v3173_v2 = vsel %vm1413_vm5, %v3171_v34, %v6591_v63  ;;  %v6738_v62 = vld [vmem:[#allocation7 + $0xb8] sm:$0xff]   ;;  %v6739_v63 = vld [vmem:[#allocation7 + $0xf0] sm:$0xff]   ;;  %v6741_v34 = vld [vmem:[#allocation7 + $0xe8] sm:$0xff]  }
0x1ab6   :  { %v3175_v3 = vpack.c.bf16 %v3174_v1, %v3173_v2  ;;  %v6740_v0 = vld [vmem:[#allocation7 + $0xb0] sm:$0xff]   ;;  %v6742_v1 = vld [vmem:[#allocation7 + $0xa8] sm:$0xff]   ;;  %v6743_v2 = vld [vmem:[#allocation7 + $0xe0] sm:$0xff]  }
0x1ab8   :  { %6520 = vmatmul.mubr.bf16.vlgmr.msra.gmra.mxu0 %v3175_v3  ;;  %v6744_v3 = vld [vmem:[#allocation7 + $0xa0] sm:$0xff]  }
0x1ab9   :  { %6221 = vmatpush3.bf16.msra.mxu0 %v6738_v62 }
0x1aba   :  { %6222 = vmatprep.subr.bf16.mxu0 %v6739_v63 }
0x1abd   :  { %6223 = vmatpush3.bf16.msra.mxu0 %v6740_v0 }
0x1abe   :  { %6224 = vmatprep.subr.bf16.mxu0 %v6741_v34 }
0x1ac1   :  { %6225 = vmatpush3.bf16.msra.mxu0 %v6742_v1 }
0x1ac2   :  { %6226 = vmatprep.subr.bf16.mxu0 %v6743_v2 }
0x1ac5   :  { %6227 = vmatpush3.bf16.msra.mxu0 %v6744_v3 }
0x1b78   :  { %v3283_v39 = vpop.f32.mrf.mxu0 }
0x1b79   :  { %v3284_v18 = vadd.f32 %v5913_v28, %v3283_v39  ;;  %v6746_v39 = vld [vmem:[#allocation7 + $0x98] sm:$0xff]  }
0x1b7a   :  { %v6521_v31 = vpop.f32.mrf.mxu0 }
0x1b7b   :  { %v3290_v26 = vadd.f32 %v3284_v18, %v7865_v21  ;;  %v6747_v18 = vld [vmem:[#allocation7 + $0xd0] sm:$0xff]  }
0x1b7c   :  { %v3286_v40 = vpop.f32.mrf.mxu0  ;;  %v6748_v31 = vld [vmem:[#allocation7 + $0x90] sm:$0xff]  }
0x1b7d   :  { %v3287_v6 = vadd.f32 %v5913_v28, %v3286_v40  ;;  %3296 = vadd.xlane.f32.xlu0 %v3290_v26  ;;  %v6745_v28 = vld [vmem:[#allocation7 + $0xd8] sm:$0xff]   ;;  %v6750_v40 = vld [vmem:[#allocation7 + $0x88] sm:$0xff]  }
0x1b7e   :  { %v6522_v56 = vpop.f32.mrf.mxu0  ;;  %6228 = vmatprep.subr.bf16.mxu0 %v6745_v28 }
0x1b7f   :  { %v3291_v44 = vadd.f32 %v3287_v6, %v7867_v19  ;;  %v6721_v19 = vld [vmem:[#allocation5 + $0xd4] ss:$8 sps:$4 sm:$0xff]   ;;  %6229 = vmatpush3.bf16.msra.mxu0 %v6746_v39  ;;  %v6751_v6 = vld [vmem:[#allocation7 + $0xc0] sm:$0xff]  }
0x1b80   :  { %3449 = vmatprep.subr.bf16.mxu1 %v6721_v19  ;;  %6230 = vmatprep.subr.bf16.mxu0 %v6747_v18  ;;  %v6752_v56 = vld [vmem:[#allocation7 + $0x80] sm:$0xff]  }
0x1b81   :  { %3298 = vadd.xlane.f32.xlu1 %v3291_v44  ;;  %3450 = vmatpush1.bf16.msra.mxu1 %v6719_v10  ;;  %v5944_v18 = vld [vmem:[%s8747_s13 + $0x1] ss:$0 sm:$0xff] }
0x1b82   :  { %3451 = vmatprep.subr.bf16.mxu1 %v6724_v12 }
0x1b83   :  { %6231 = vmatpush3.bf16.msra.mxu0 %v6748_v31 }
0x1b85   :  { %3452 = vmatpush1.bf16.msra.mxu1 %v6722_v11 }
0x1b86   :  { %3453 = vmatprep.subr.bf16.mxu1 %v6727_v33 }
0x1b89   :  { %3454 = vmatpush1.bf16.msra.mxu1 %v6725_v35 }
0x1b8a   :  { %3455 = vmatprep.subr.bf16.mxu1 %v6730_v15 }
0x1b8d   :  { %3456 = vmatpush1.bf16.msra.mxu1 %v6728_v50 }
0x1b8e   :  { %3457 = vmatprep.subr.bf16.mxu1 %v6733_v16 }
0x1b91   :  { %3458 = vmatpush1.bf16.msra.mxu1 %v6731_v51 }
0x1b92   :  { %3459 = vmatprep.subr.bf16.mxu1 %v6736_v14 }
0x1b95   :  { %3460 = vmatpush1.bf16.msra.mxu1 %v6734_v20 }
0x1c06   :  { %v3297_v24 = vpop.xlane.xlu0 %3296 }
0x1c07   :  { %v3300_v22 = vmul.f32 0.0078125, %v3297_v24 }
0x1c09   :  { %v3302_v5 = vsub.f32 %v3290_v26, %v3300_v22  ;;  %v6749_v26 = vld [vmem:[#allocation7 + $0xc8] sm:$0xff]  }
0x1c0a   :  { %v3299_v23 = vpop.xlane.xlu1 %3298  ;;  %6232 = vmatprep.subr.bf16.mxu0 %v6749_v26 }
0x1c0b   :  { %v3301_v7 = vmul.f32 0.0078125, %v3299_v23  ;;  %v3304_v29 = vmul.f32 %v3302_v5, %v3302_v5  ;;  %6233 = vmatpush3.bf16.msra.mxu0 %v6750_v40 }
0x1c0c   :  { %6234 = vmatprep.subr.bf16.mxu0 %v6751_v6 }
0x1c0d   :  { %v3303_v32 = vsub.f32 %v3291_v44, %v3301_v7  ;;  %3306 = vadd.xlane.f32.xlu0 %v3304_v29  ;;  %v5926_v44 = vld [vmem:[%s8745_s11 + $0x2] sm:$0x3] }
0x1c0e   :  { %v3358_v45 = vrot.slane %v5926_v44, %v7584_v61  ;;  %v3362_v13 = vrot.slane %v5926_v44, %v7574_v55 }
0x1c0f   :  { %v3305_v21 = vmul.f32 %v3303_v32, %v3303_v32  ;;  %6235 = vmatpush3.bf16.msra.mxu0 %v6752_v56 }
0x1c11   :  { %3308 = vadd.xlane.f32.xlu0 %v3305_v21 }
0x1c96   :  { %v3307_v17 = vpop.xlane.xlu0 %3306 }
0x1c97   :  { %v3310_v58 = vmul.f32 0.0078125, %v3307_v17 }
0x1c99   :  { %v3312_v25 = vadd.f32 1e-12, %v3310_v58 }
0x1c9a   :  { %v3309_v30 = vpop.xlane.xlu0 %3308 }
0x1c9b   :  { %6941 = vrsqrt.f32 %v3312_v25  ;;  %v3311_v36 = vmul.f32 0.0078125, %v3309_v30 }
0x1c9d   :  { %v3313_v37 = vadd.f32 1e-12, %v3311_v36 }
0x1c9f   :  { %6943 = vrsqrt.f32 %v3313_v37 }
0x1ca8   :  { %v6942_v38 = vpop.eup %6941 }
0x1ca9   :  { %v3316_v41 = vmul.f32 %v6942_v38, %v3302_v5 }
0x1cab   :  { %v3324_v47 = vmul.f32 %v5924_v42, %v3316_v41 }
0x1cac   :  { %v6944_v43 = vpop.eup %6943 }
0x1cad   :  { %v3317_v46 = vmul.f32 %v6944_v43, %v3303_v32  ;;  %v8107_v52 = vadd.f32 %v5925_v48, %v3324_v47 }
0x1caf   :  { %v3325_v49 = vmul.f32 %v5924_v42, %v3317_v46 }
0x1cb1   :  { %v8109_v53 = vadd.f32 %v5925_v48, %v3325_v49 }
0x1cb3   :  { %v3334_v59 = vpack.c.bf16 %v8109_v53, %v8107_v52 }
0x1cb5   :  { %3478 = vmatmul.mubr.bf16.vlgmr.msra.gmra.mxu1 %v3334_v59 }
0x1cb6   :  { %3995 = vmatprep.mubr.bf16.mxu1 %v7387_v27 }
0x1d75   :  { %v3479_v24 = vpop.f32.mrf.mxu1 }
0x1d76   :  { %v3480_v22 = vadd.f32 %v3479_v24, %v3358_v45 }
0x1d77   :  { %v3481_v5 = vpop.f32.mrf.mxu1 }
0x1d78   :  { %v3488_v23 = vmul.f32 %v3480_v22, %v3480_v22  ;;  %v3482_v7 = vadd.f32 %v3481_v5, %v3362_v13  ;;  %v6755_v5 = vld [vmem:[#allocation8 + $0xe4] ss:$16 sps:$4 sm:$0xff]  }
0x1d79   :  { %v3483_v29 = vpop.f32.mrf.mxu1  ;;  %3963 = vmatprep.subr.bf16.mxu1 %v6755_v5  ;;  %v8149_v5 = vld [vmem:[#allocation10 + $0xe8] ss:$16 sps:$4 sm:$0xff]  }
0x1d7a   :  { %v3492_v32 = vmul.f32 %v3488_v23, %v3480_v22  ;;  %v3489_v21 = vmul.f32 %v3482_v7, %v3482_v7  ;;  %v3484_v8 = vadd.f32 %v3483_v29, %v3358_v45  ;;  %v6756_v23 = vld [vmem:[#allocation8 + $0xe8] ss:$16 sps:$4 sm:$0xff]  }
0x1d7b   :  { %v3485_v9 = vpop.f32.mrf.mxu1 }
0x1d7c   :  { %v3496_v19 = vmul.f32 0.044715, %v3492_v32  ;;  %v3493_v10 = vmul.f32 %v3489_v21, %v3482_v7  ;;  %v3490_v11 = vmul.f32 %v3484_v8, %v3484_v8  ;;  %v3486_v12 = vadd.f32 %v3485_v9, %v3362_v13 }
0x1d7e   :  { %v3500_v33 = vadd.f32 %v3496_v19, %v3480_v22  ;;  %v3497_v35 = vmul.f32 0.044715, %v3493_v10  ;;  %v3494_v15 = vmul.f32 %v3490_v11, %v3484_v8  ;;  %v3491_v50 = vmul.f32 %v3486_v12, %v3486_v12  ;;  %v6761_v10 = vld [vmem:[#allocation8 + $0xc4] ss:$16 sps:$4 sm:$0xff]   ;;  %v6764_v11 = vld [vmem:[#allocation8 + $0xcc] ss:$16 sps:$4 sm:$0xff]  }
0x1d80   :  { %v3504_v16 = vmul.f32 0.7978846, %v3500_v33  ;;  %v3501_v51 = vadd.f32 %v3497_v35, %v3482_v7  ;;  %v3498_v14 = vmul.f32 0.044715, %v3494_v15  ;;  %v3495_v20 = vmul.f32 %v3491_v50, %v3486_v12  ;;  %v6762_v33 = vld [vmem:[#allocation8 + $0xc8] ss:$16 sps:$4 sm:$0xff]  }
0x1d81   :  { %v6767_v35 = vld [vmem:[#allocation8 + $0xa4] ss:$16 sps:$4 sm:$0xff]   ;;  %v6770_v15 = vld [vmem:[#allocation8 + $0xac] ss:$16 sps:$4 sm:$0xff]   ;;  %v6765_v50 = vld [vmem:[#allocation8 + $0xa0] ss:$16 sps:$4 sm:$0xff]  }
0x1d82   :  { %v3505_v17 = vmul.f32 0.7978846, %v3501_v51  ;;  %v3502_v58 = vadd.f32 %v3498_v14, %v3484_v8  ;;  %v3499_v25 = vmul.f32 0.044715, %v3495_v20  ;;  %6945 = vtanh.f32 %v3504_v16  ;;  %v6768_v16 = vld [vmem:[#allocation8 + $0xa8] ss:$16 sps:$4 sm:$0xff]  }
0x1d83   :  { %v6771_v51 = vld [vmem:[#allocation8 + $0x80] ss:$16 sps:$4 sm:$0xff]   ;;  %v6773_v14 = vld [vmem:[#allocation8 + $0x84] ss:$16 sps:$4 sm:$0xff]   ;;  %v6774_v20 = vld [vmem:[#allocation8 + $0x88] ss:$16 sps:$4 sm:$0xff]  }
0x1d84   :  { %6947 = vtanh.f32 %v3505_v17  ;;  %v3506_v30 = vmul.f32 0.7978846, %v3502_v58  ;;  %v3503_v36 = vadd.f32 %v3499_v25, %v3486_v12  ;;  %v6776_v17 = vld [vmem:[#allocation8 + $0x8c] ss:$16 sps:$4 sm:$0xff]   ;;  %v6779_v58 = vld [vmem:[#allocation8 + $0x64] ss:$16 sps:$4 sm:$0xff]  }
0x1d85   :  { %v6782_v25 = vld [vmem:[#allocation8 + $0x6c] ss:$16 sps:$4 sm:$0xff]  }
0x1d86   :  { %6949 = vtanh.f32 %v3506_v30  ;;  %v3507_v37 = vmul.f32 0.7978846, %v3503_v36  ;;  %v6777_v30 = vld [vmem:[#allocation8 + $0x60] ss:$16 sps:$4 sm:$0xff]   ;;  %v6780_v36 = vld [vmem:[#allocation8 + $0x68] ss:$16 sps:$4 sm:$0xff]  }
0x1d88   :  { %6951 = vtanh.f32 %v3507_v37  ;;  %v6785_v37 = vld [vmem:[#allocation8 + $0x44] ss:$16 sps:$4 sm:$0xff]  }
0x1d8f   :  { %v6946_v38 = vpop.eup %6945 }
0x1d90   :  { %v3512_v46 = vadd.f32 1.0, %v6946_v38  ;;  %v6788_v38 = vld [vmem:[#allocation8 + $0x4c] ss:$16 sps:$4 sm:$0xff]  }
0x1d91   :  { %v6948_v41 = vpop.eup %6947 }
0x1d92   :  { %v3513_v42 = vadd.f32 1.0, %v6948_v41  ;;  %v3516_v62 = vmul.f32 0.5, %v3512_v46  ;;  %v6783_v41 = vld [vmem:[#allocation8 + $0x40] ss:$16 sps:$4 sm:$0xff]   ;;  %v6794_v46 = vld [vmem:[#allocation8 + $0x2c] ss:$16 sps:$4 sm:$0xff]  }
0x1d93   :  { %v6950_v43 = vpop.eup %6949 }
0x1d94   :  { %v3514_v47 = vadd.f32 1.0, %v6950_v43  ;;  %v3517_v60 = vmul.f32 0.5, %v3513_v42  ;;  %v3520_v2 = vmul.f32 %v3516_v62, %v3480_v22  ;;  %v6753_v22 = vld [vmem:[#allocation8 + $0xe0] ss:$16 sps:$4 sm:$0xff]   ;;  %v6786_v42 = vld [vmem:[#allocation8 + $0x48] ss:$16 sps:$4 sm:$0xff]  }
0x1d95   :  { %v6952_v48 = vpop.eup %6951  ;;  %3964 = vmatpush1.bf16.msra.mxu1 %v6753_v22  ;;  %v6791_v43 = vld [vmem:[#allocation8 + $0x24] ss:$16 sps:$4 sm:$0xff]   ;;  %v6798_v62 = vld [vmem:[#allocation8 + $0x8] ss:$16 sps:$4 sm:$0xff]   ;;  %v8147_v22 = vld [vmem:[#allocation10 + $0xe0] ss:$16 sps:$4 sm:$0xff]  }
0x1d96   :  { %v3518_v49 = vmul.f32 0.5, %v3514_v47  ;;  %v3515_v59 = vadd.f32 1.0, %v6952_v48  ;;  %v3521_v34 = vmul.f32 %v3517_v60, %v3482_v7  ;;  %v6758_v7 = vld [vmem:[#allocation8 + $0xec] ss:$16 sps:$4 sm:$0xff]   ;;  %3965 = vmatprep.subr.bf16.mxu1 %v6761_v10  ;;  %v6789_v47 = vld [vmem:[#allocation8 + $0x20] ss:$16 sps:$4 sm:$0xff]  }
0x1d97   :  { %4006 = vmatprep.subr.bf16.mxu0 %v6758_v7  ;;  %v6792_v48 = vld [vmem:[#allocation8 + $0x28] ss:$16 sps:$4 sm:$0xff]   ;;  %v6795_v60 = vld [vmem:[#allocation8] ss:$16 sps:$4 sm:$0xff]   ;;  %v8151_v7 = vld [vmem:[#allocation10 + $0xc4] ss:$16 sps:$4 sm:$0xff]  }
0x1d98   :  { %v3519_v63 = vmul.f32 0.5, %v3515_v59  ;;  %v3522_v0 = vmul.f32 %v3518_v49, %v3484_v8  ;;  %v6797_v49 = vld [vmem:[#allocation8 + $0x4] ss:$16 sps:$4 sm:$0xff]   ;;  %v6800_v59 = vld [vmem:[#allocation8 + $0xc] ss:$16 sps:$4 sm:$0xff]  }
0x1d99   :  { %v8179_v10 = vld [vmem:[#allocation10 + $0x8c] ss:$16 sps:$4 sm:$0xff]  }
0x1d9a   :  { %v3523_v1 = vmul.f32 %v3519_v63, %v3486_v12  ;;  %v3524_v28 = vpack.c.bf16 %v3522_v0, %v3520_v2  ;;  %v6759_v12 = vld [vmem:[#allocation8 + $0xc0] ss:$16 sps:$4 sm:$0xff]   ;;  %v8133_v63 = vld [vmem:[#allocation10 + $0xe4] ss:$16 sps:$4 sm:$0xff]   ;;  %v8135_v0 = vld [vmem:[#allocation10 + $0xec] ss:$16 sps:$4 sm:$0xff]  }
0x1d9b   :  { %3966 = vmatpush1.bf16.msra.mxu1 %v6759_v12  ;;  %v8185_v12 = vld [vmem:[#allocation10 + $0x88] ss:$16 sps:$4 sm:$0xff]  }
0x1d9c   :  { %v3525_v3 = vpack.c.bf16 %v3523_v1, %v3521_v34  ;;  %3967 = vmatprep.subr.bf16.mxu1 %v6767_v35  ;;  %v8191_v35 = vld [vmem:[#allocation10 + $0x6c] ss:$16 sps:$4 sm:$0xff]  }
0x1d9e   :  { %3695 = vmatprep.mubr.bf16.mxu0 %v3525_v3 }
0x1d9f   :  { %3696 = vmatmul.mubr.bf16.vlgmr.msra.gmra.mxu0 %v3524_v28  ;;  %3968 = vmatpush1.bf16.msra.mxu1 %v6765_v50  ;;  %v8197_v50 = vld [vmem:[#allocation10 + $0x68] ss:$16 sps:$4 sm:$0xff]  }
0x1da0   :  { %4038 = vmatprep.mubr.bf16.mxu0 %v7387_v27  ;;  %4007 = vmatpush1.bf16.msra.mxu0 %v6756_v23 }
0x1da1   :  { %4008 = vmatprep.subr.bf16.mxu0 %v6764_v11  ;;  %3969 = vmatprep.subr.bf16.mxu1 %v6773_v14  ;;  %v8183_v11 = vld [vmem:[#allocation10 + $0x80] ss:$16 sps:$4 sm:$0xff]  }
0x1da2   :  { %v8207_v14 = vld [vmem:[#allocation10 + $0x40] ss:$16 sps:$4 sm:$0xff]  }
0x1da3   :  { %3970 = vmatpush1.bf16.msra.mxu1 %v6771_v51  ;;  %v8203_v51 = vld [vmem:[#allocation10 + $0x4c] ss:$16 sps:$4 sm:$0xff]  }
0x1da4   :  { %4009 = vmatpush1.bf16.msra.mxu0 %v6762_v33  ;;  %3971 = vmatprep.subr.bf16.mxu1 %v6779_v58  ;;  %v8189_v33 = vld [vmem:[#allocation10 + $0x64] ss:$16 sps:$4 sm:$0xff]   ;;  %v8215_v58 = vld [vmem:[#allocation10 + $0x2c] ss:$16 sps:$4 sm:$0xff]  }
0x1da5   :  { %4010 = vmatprep.subr.bf16.mxu0 %v6770_v15  ;;  %v8195_v15 = vld [vmem:[#allocation10 + $0x60] ss:$16 sps:$4 sm:$0xff]  }
0x1da7   :  { %3972 = vmatpush1.bf16.msra.mxu1 %v6777_v30  ;;  %v8221_v30 = vld [vmem:[#allocation10 + $0x28] ss:$16 sps:$4 sm:$0xff]  }
0x1da8   :  { %4011 = vmatpush1.bf16.msra.mxu0 %v6768_v16  ;;  %3973 = vmatprep.subr.bf16.mxu1 %v6785_v37  ;;  %v8201_v16 = vld [vmem:[#allocation10 + $0x44] ss:$16 sps:$4 sm:$0xff]   ;;  %v8227_v37 = vld [vmem:[#allocation10 + $0xc] ss:$16 sps:$4 sm:$0xff]  }
0x1da9   :  { %4012 = vmatprep.subr.bf16.mxu0 %v6776_v17  ;;  %v8213_v17 = vld [vmem:[#allocation10 + $0x24] ss:$16 sps:$4 sm:$0xff]  }
0x1dab   :  { %3974 = vmatpush1.bf16.msra.mxu1 %v6783_v41  ;;  %v8233_v41 = vld [vmem:[#allocation10 + $0x8] ss:$16 sps:$4 sm:$0xff]  }
0x1dac   :  { %4013 = vmatpush1.bf16.msra.mxu0 %v6774_v20  ;;  %3975 = vmatprep.subr.bf16.mxu1 %v6791_v43  ;;  %v8209_v20 = vld [vmem:[#allocation10 + $0x48] ss:$16 sps:$4 sm:$0xff]  }
0x1dad   :  { %4014 = vmatprep.subr.bf16.mxu0 %v6782_v25  ;;  %v8219_v25 = vld [vmem:[#allocation10 + $0x20] ss:$16 sps:$4 sm:$0xff]  }
0x1daf   :  { %3976 = vmatpush1.bf16.msra.mxu1 %v6789_v47 }
0x1db0   :  { %4015 = vmatpush1.bf16.msra.mxu0 %v6780_v36  ;;  %3977 = vmatprep.subr.bf16.mxu1 %v6797_v49  ;;  %v8225_v36 = vld [vmem:[#allocation10 + $0x4] ss:$16 sps:$4 sm:$0xff]  }
0x1db1   :  { %4016 = vmatprep.subr.bf16.mxu0 %v6788_v38  ;;  %v8231_v38 = vld [vmem:[#allocation10] ss:$16 sps:$4 sm:$0xff]  }
0x1db3   :  { %3978 = vmatpush1.bf16.msra.mxu1 %v6795_v60 }
0x1db4   :  { %4017 = vmatpush1.bf16.msra.mxu0 %v6786_v42  ;;  %4241 = vmatprep.subr.bf16.mxu1 %v8133_v63 }
0x1db5   :  { %4018 = vmatprep.subr.bf16.mxu0 %v6794_v46 }
0x1db8   :  { %4019 = vmatpush1.bf16.msra.mxu0 %v6792_v48  ;;  %v3781_v48 = vld [vmem:[%s8751_s17] sm:$0xf] }
0x1db9   :  { %4020 = vmatprep.subr.bf16.mxu0 %v6800_v59  ;;  %v3786_v60 = vrot.slane %v3781_v48, %v7584_v61 }
0x1dbc   :  { %4021 = vmatpush1.bf16.msra.mxu0 %v6798_v62  ;;  %v3790_v62 = vrot.slane %v3781_v48, %v7574_v55 }
0x1dbd   :  { %4282 = vmatprep.subr.bf16.mxu0 %v8135_v0 }
0x1e5f   :  { %v6236_v39 = vpop.f32.mrf.mxu0 }
0x1e61   :  { %v6237_v31 = vpop.f32.mrf.mxu0 }
0x1e62   :  { %v6238_v26 = vadd.f32 %v6237_v31, %v6236_v39 }
0x1e63   :  { %v6239_v40 = vpop.f32.mrf.mxu0 }
0x1e64   :  { %v3698_v6 = vadd.f32 %v6238_v26, %v5944_v18  ;;  %v5963_v26 = vld [vmem:[%s8748_s14 + $0x1] ss:$0 sm:$0xff] }
0x1e65   :  { %v6240_v56 = vpop.f32.mrf.mxu0 }
0x1e66   :  { %v6241_v44 = vadd.f32 %v6240_v56, %v6239_v40  ;;  %v3704_v45 = vadd.f32 %v3698_v6, %v8107_v52 }
0x1e68   :  { %v3701_v13 = vadd.f32 %v6241_v44, %v5944_v18  ;;  %3710 = vadd.xlane.f32.xlu0 %v3704_v45  ;;  %v5964_v44 = vld [vmem:[%s8749_s15 + $0x1] ss:$0 sm:$0xff] }
0x1e6a   :  { %v3705_v24 = vadd.f32 %v3701_v13, %v8109_v53 }
0x1e6c   :  { %3712 = vadd.xlane.f32.xlu1 %v3705_v24 }
0x1ef1   :  { %v3711_v29 = vpop.xlane.xlu0 %3710 }
0x1ef2   :  { %v3714_v32 = vmul.f32 0.0078125, %v3711_v29  ;;  %v8153_v29 = vld [vmem:[#allocation10 + $0xcc] ss:$16 sps:$4 sm:$0xff]  }
0x1ef4   :  { %v8125_v21 = vsub.f32 %v3704_v45, %v3714_v32  ;;  %v8157_v32 = vld [vmem:[#allocation10 + $0xc0] ss:$16 sps:$4 sm:$0xff]  }
0x1ef5   :  { %v3713_v8 = vpop.xlane.xlu1 %3712 }
0x1ef6   :  { %v3715_v9 = vmul.f32 0.0078125, %v3713_v8  ;;  %v3718_v52 = vmul.f32 %v8125_v21, %v8125_v21  ;;  %v8163_v8 = vld [vmem:[#allocation10 + $0xa4] ss:$16 sps:$4 sm:$0xff]  }
0x1ef8   :  { %v8129_v19 = vsub.f32 %v3705_v24, %v3715_v9  ;;  %3720 = vadd.xlane.f32.xlu0 %v3718_v52  ;;  %v8165_v9 = vld [vmem:[#allocation10 + $0xac] ss:$16 sps:$4 sm:$0xff]   ;;  %v8171_v52 = vld [vmem:[#allocation10 + $0xa0] ss:$16 sps:$4 sm:$0xff]  }
0x1efa   :  { %v3719_v53 = vmul.f32 %v8129_v19, %v8129_v19 }
0x1efc   :  { %3722 = vadd.xlane.f32.xlu1 %v3719_v53  ;;  %v8177_v53 = vld [vmem:[#allocation10 + $0x84] ss:$16 sps:$4 sm:$0xff]  }
0x1f81   :  { %v3721_v34 = vpop.xlane.xlu0 %3720 }
0x1f82   :  { %v3724_v1 = vmul.f32 0.0078125, %v3721_v34 }
0x1f84   :  { %v3726_v2 = vadd.f32 1e-12, %v3724_v1 }
0x1f85   :  { %v3723_v3 = vpop.xlane.xlu1 %3722 }
0x1f86   :  { %6953 = vrsqrt.f32 %v3726_v2  ;;  %v3725_v28 = vmul.f32 0.0078125, %v3723_v3 }
0x1f88   :  { %v3727_v39 = vadd.f32 1e-12, %v3725_v28 }
0x1f8a   :  { %6955 = vrsqrt.f32 %v3727_v39 }
0x1f93   :  { %v6954_v18 = vpop.eup %6953 }
0x1f94   :  { %v3730_v31 = vmul.f32 %v6954_v18, %v8125_v21  ;;  %v8159_v21 = vld [vmem:[#allocation10 + $0xc8] ss:$16 sps:$4 sm:$0xff]  }
0x1f96   :  { %v3738_v56 = vmul.f32 %v5963_v26, %v3730_v31 }
0x1f97   :  { %v6956_v40 = vpop.eup %6955 }
0x1f98   :  { %v3731_v6 = vmul.f32 %v6956_v40, %v8129_v19  ;;  %v3746_v13 = vadd.f32 %v5964_v44, %v3738_v56  ;;  %v8173_v19 = vld [vmem:[#allocation10 + $0xa8] ss:$16 sps:$4 sm:$0xff]  }
0x1f9a   :  { %v3739_v45 = vmul.f32 %v5963_v26, %v3731_v6 }
0x1f9c   :  { %v3747_v24 = vadd.f32 %v5964_v44, %v3739_v45 }
0x1f9e   :  { %v3748_v23 = vpack.c.bf16 %v3747_v24, %v3746_v13 }
0x1fa0   :  { %3996 = vmatmul.mubr.bf16.vlgmr.msra.gmra.mxu1 %v3748_v23  ;;  %4039 = vmatmul.mubr.bf16.vlgmr.msra.gmra.mxu0 %v3748_v23  ;;  %v3794_v23 = vrot.slane %v3781_v48, %v7580_v57 }
0x1fa1   :  { %4242 = vmatpush1.bf16.msra.mxu1 %v8147_v22  ;;  %4283 = vmatpush1.bf16.msra.mxu0 %v8149_v5 }
0x1fa2   :  { %4243 = vmatprep.subr.bf16.mxu1 %v8151_v7  ;;  %4284 = vmatprep.subr.bf16.mxu0 %v8153_v29 }
0x1fa3   :  { %4273 = vmatprep.mubr.bf16.mxu1 %v7387_v27  ;;  %4314 = vmatprep.mubr.bf16.mxu0 %v7387_v27 }
0x1fa5   :  { %4244 = vmatpush1.bf16.msra.mxu1 %v8157_v32  ;;  %4285 = vmatpush1.bf16.msra.mxu0 %v8159_v21 }
0x1fa6   :  { %4245 = vmatprep.subr.bf16.mxu1 %v8163_v8  ;;  %4286 = vmatprep.subr.bf16.mxu0 %v8165_v9 }
0x1fa9   :  { %4246 = vmatpush1.bf16.msra.mxu1 %v8171_v52  ;;  %4287 = vmatpush1.bf16.msra.mxu0 %v8173_v19 }
0x1faa   :  { %4247 = vmatprep.subr.bf16.mxu1 %v8177_v53  ;;  %4288 = vmatprep.subr.bf16.mxu0 %v8179_v10 }
0x1fad   :  { %4248 = vmatpush1.bf16.msra.mxu1 %v8183_v11  ;;  %4289 = vmatpush1.bf16.msra.mxu0 %v8185_v12 }
0x1fae   :  { %4249 = vmatprep.subr.bf16.mxu1 %v8189_v33  ;;  %4290 = vmatprep.subr.bf16.mxu0 %v8191_v35 }
0x1fb1   :  { %4250 = vmatpush1.bf16.msra.mxu1 %v8195_v15  ;;  %4291 = vmatpush1.bf16.msra.mxu0 %v8197_v50 }
0x1fb2   :  { %4251 = vmatprep.subr.bf16.mxu1 %v8201_v16  ;;  %4292 = vmatprep.subr.bf16.mxu0 %v8203_v51 }
0x1fb5   :  { %4252 = vmatpush1.bf16.msra.mxu1 %v8207_v14  ;;  %4293 = vmatpush1.bf16.msra.mxu0 %v8209_v20 }
0x1fb6   :  { %4253 = vmatprep.subr.bf16.mxu1 %v8213_v17  ;;  %4294 = vmatprep.subr.bf16.mxu0 %v8215_v58 }
0x1fb9   :  { %4254 = vmatpush1.bf16.msra.mxu1 %v8219_v25  ;;  %4295 = vmatpush1.bf16.msra.mxu0 %v8221_v30 }
0x1fba   :  { %4255 = vmatprep.subr.bf16.mxu1 %v8225_v36  ;;  %4296 = vmatprep.subr.bf16.mxu0 %v8227_v37 }
0x1fbd   :  { %4256 = vmatpush1.bf16.msra.mxu1 %v8231_v38  ;;  %4297 = vmatpush1.bf16.msra.mxu0 %v8233_v41 }
0x1fbe   :  { %4406 = vmatprep.subr.bf16.mxu1 %v8133_v63  ;;  %4447 = vmatprep.subr.bf16.mxu0 %v8135_v0 }
0x1fc0   :  { %4274 = vmatmul.mubr.bf16.vlgmr.msra.gmra.mxu1 %v7387_v27  ;;  %4315 = vmatmul.mubr.bf16.vlgmr.msra.gmra.mxu0 %v7387_v27 }
0x1fc1   :  { %4407 = vmatpush1.bf16.msra.mxu1 %v8147_v22  ;;  %4448 = vmatpush1.bf16.msra.mxu0 %v8149_v5 }
0x1fc2   :  { %4408 = vmatprep.subr.bf16.mxu1 %v8151_v7  ;;  %4449 = vmatprep.subr.bf16.mxu0 %v8153_v29 }
0x1fc3   :  { %4438 = vmatprep.mubr.bf16.mxu1 %v7387_v27  ;;  %4479 = vmatprep.mubr.bf16.mxu0 %v7387_v27 }
0x1fc5   :  { %4409 = vmatpush1.bf16.msra.mxu1 %v8157_v32  ;;  %4450 = vmatpush1.bf16.msra.mxu0 %v8159_v21 }
0x1fc6   :  { %4410 = vmatprep.subr.bf16.mxu1 %v8163_v8  ;;  %4451 = vmatprep.subr.bf16.mxu0 %v8165_v9 }
0x1fc9   :  { %4411 = vmatpush1.bf16.msra.mxu1 %v8171_v52  ;;  %4452 = vmatpush1.bf16.msra.mxu0 %v8173_v19 }
0x1fca   :  { %4412 = vmatprep.subr.bf16.mxu1 %v8177_v53  ;;  %4453 = vmatprep.subr.bf16.mxu0 %v8179_v10 }
0x1fcd   :  { %4413 = vmatpush1.bf16.msra.mxu1 %v8183_v11  ;;  %4454 = vmatpush1.bf16.msra.mxu0 %v8185_v12 }
0x1fce   :  { %4414 = vmatprep.subr.bf16.mxu1 %v8189_v33  ;;  %4455 = vmatprep.subr.bf16.mxu0 %v8191_v35 }
0x1fd1   :  { %4415 = vmatpush1.bf16.msra.mxu1 %v8195_v15  ;;  %4456 = vmatpush1.bf16.msra.mxu0 %v8197_v50 }
0x1fd2   :  { %4416 = vmatprep.subr.bf16.mxu1 %v8201_v16  ;;  %4457 = vmatprep.subr.bf16.mxu0 %v8203_v51 }
0x1fd5   :  { %4417 = vmatpush1.bf16.msra.mxu1 %v8207_v14  ;;  %4458 = vmatpush1.bf16.msra.mxu0 %v8209_v20 }
0x1fd6   :  { %4418 = vmatprep.subr.bf16.mxu1 %v8213_v17  ;;  %4459 = vmatprep.subr.bf16.mxu0 %v8215_v58 }
0x1fd9   :  { %4419 = vmatpush1.bf16.msra.mxu1 %v8219_v25  ;;  %4460 = vmatpush1.bf16.msra.mxu0 %v8221_v30 }
0x1fda   :  { %4420 = vmatprep.subr.bf16.mxu1 %v8225_v36  ;;  %4461 = vmatprep.subr.bf16.mxu0 %v8227_v37 }
0x1fdd   :  { %4421 = vmatpush1.bf16.msra.mxu1 %v8231_v38  ;;  %4462 = vmatpush1.bf16.msra.mxu0 %v8233_v41 }
0x1fde   :  { %4576 = vmatprep.subr.bf16.mxu1 %v8133_v63  ;;  %4617 = vmatprep.subr.bf16.mxu0 %v8135_v0 }
0x2060   :  { %v3997_v42 = vpop.f32.mrf.mxu1  ;;  %v4040_v43 = vpop.f32.mrf.mxu0 }
0x2061   :  { %v8282_v2 = vadd.f32 %v3997_v42, %v3786_v60 }
0x2062   :  { %v3999_v46 = vpop.f32.mrf.mxu1  ;;  %v4042_v47 = vpop.f32.mrf.mxu0 }
0x2063   :  { %v8287_v26 = vadd.f32 %v3999_v46, %v3790_v62 }
0x2064   :  { %v4001_v49 = vpop.f32.mrf.mxu1  ;;  %v4044_v59 = vpop.f32.mrf.mxu0 }
0x2065   :  { %v8284_v39 = vadd.f32 %v4001_v49, %v3786_v60 }
0x2066   :  { %v4003_v34 = vpop.f32.mrf.mxu1  ;;  %v4046_v1 = vpop.f32.mrf.mxu0 }
0x2067   :  { %v8290_v44 = vadd.f32 %v4003_v34, %v3790_v62  ;;  %v8296_v34 = vadd.f32 %v4040_v43, %v3794_v23 }
0x2080   :  { %v4275_v3 = vpop.f32.mrf.mxu1  ;;  %v4316_v28 = vpop.f32.mrf.mxu0 }
0x2081   :  { %v4327_v18 = vrot.slane %v4275_v3, 1  ;;  %v4339_v31 = vadd.f32 %v4275_v3, %v8282_v2  ;;  %v4341_v57 = vadd.f32 %v4316_v28, %v8296_v34 }
0x2082   :  { %v4277_v40 = vpop.f32.mrf.mxu1  ;;  %v4318_v6 = vpop.f32.mrf.mxu0 }
0x2083   :  { %v4343_v56 = vadd.f32 %v4327_v18, %v8284_v39  ;;  %v6029_v61 = vmul.f32 -1.442695, %v4339_v31  ;;  %v4328_v55 = vrot.slane %v4277_v40, 1  ;;  %v4340_v45 = vadd.f32 %v4277_v40, %v8287_v26 }
0x2084   :  { %v4279_v13 = vpop.f32.mrf.mxu1  ;;  %v4320_v24 = vpop.f32.mrf.mxu0  ;;  %v4329_v18 = vrot.slane %v4316_v28, 1  ;;  %v8298_v31 = vadd.f32 %v4044_v59, %v3794_v23  ;;  %v3798_v40 = vrot.slane %v3781_v48, %v3797_v4 }
0x2085   :  { %6957 = vpow2.f32 %v6029_v61  ;;  %v6032_v42 = vmul.f32 -1.442695, %v4343_v56  ;;  %v4344_v49 = vadd.f32 %v4328_v55, %v8290_v44  ;;  %v6030_v46 = vmul.f32 -1.442695, %v4340_v45 }
0x2086   :  { %v4280_v60 = vpop.f32.mrf.mxu1  ;;  %v4321_v3 = vpop.f32.mrf.mxu0  ;;  %v4345_v56 = vadd.f32 %v4329_v18, %v8298_v31  ;;  %v4330_v61 = vrot.slane %v4318_v6, 1  ;;  %v8302_v55 = vadd.f32 %v4042_v47, %v3798_v40  ;;  %v6031_v45 = vmul.f32 -1.442695, %v4341_v57 }
0x2087   :  { %6959 = vpow2.f32 %v6032_v42  ;;  %v6033_v62 = vmul.f32 -1.442695, %v4344_v49  ;;  %v8304_v13 = vadd.f32 %v4046_v1, %v3798_v40 }
0x2088   :  { %6961 = vpow2.f32 %v6030_v46  ;;  %v6034_v54 = vmul.f32 -1.442695, %v4345_v56  ;;  %v4342_v24 = vadd.f32 %v4318_v6, %v8302_v55 }
0x2089   :  { %6963 = vpow2.f32 %v6033_v62  ;;  %v4346_v42 = vadd.f32 %v4330_v61, %v8304_v13 }
0x208a   :  { %6965 = vpow2.f32 %v6031_v45 }
0x208b   :  { %6967 = vpow2.f32 %v6034_v54 }
0x208c   :  { %6969 = vtanh.f32 %v4342_v24 }
0x208d   :  { %6971 = vtanh.f32 %v4346_v42 }
0x2092   :  { %v6958_v43 = vpop.eup %6957 }
0x2093   :  { %v4365_v59 = vadd.f32 1.0, %v6958_v43 }
0x2094   :  { %v6960_v23 = vpop.eup %6959 }
0x2095   :  { %v4368_v4 = vadd.f32 1.0, %v6960_v23  ;;  %v6962_v48 = vpop.eup %6961  ;;  %6973 = vrcp.f32 %v4365_v59 }
0x2096   :  { %v6964_v28 = vpop.eup %6963  ;;  %v4366_v47 = vadd.f32 1.0, %v6962_v48 }
0x2097   :  { %6975 = vrcp.f32 %v4368_v4  ;;  %v4369_v1 = vadd.f32 1.0, %v6964_v28  ;;  %v6966_v49 = vpop.eup %6965 }
0x2098   :  { %6977 = vrcp.f32 %v4366_v47  ;;  %v6968_v6 = vpop.eup %6967  ;;  %v4367_v62 = vadd.f32 1.0, %v6966_v49 }
0x2099   :  { %6979 = vrcp.f32 %v4369_v1  ;;  %v6970_v46 = vpop.eup %6969  ;;  %v4370_v57 = vadd.f32 1.0, %v6968_v6 }
0x209a   :  { %v6972_v60 = vpop.eup %6971  ;;  %6981 = vrcp.f32 %v4367_v62 }
0x209b   :  { %6983 = vrcp.f32 %v4370_v57 }
0x20a2   :  { %v6974_v3 = vpop.eup %6973 }
0x20a3   :  { %v4387_v45 = vmul.f32 %v6974_v3, %v6970_v46 }
0x20a4   :  { %v6976_v18 = vpop.eup %6975 }
0x20a5   :  { %v6978_v40 = vpop.eup %6977  ;;  %v4388_v24 = vmul.f32 %v6976_v18, %v6972_v60 }
0x20a6   :  { %v6980_v56 = vpop.eup %6979  ;;  %v4385_v61 = vmul.f32 0.0, %v6978_v40 }
0x20a7   :  { %v4386_v54 = vmul.f32 0.0, %v6980_v56  ;;  %v6982_v59 = vpop.eup %6981 }
0x20a8   :  { %v8308_v43 = vadd.f32 %v4387_v45, %v4385_v61  ;;  %v6984_v23 = vpop.eup %6983 }
0x20a9   :  { %v8310_v42 = vadd.f32 %v4388_v24, %v4386_v54 }
0x20aa   :  { %6985 = vtanh.f32 %v8308_v43 }
0x20ab   :  { %6987 = vtanh.f32 %v8310_v42 }
0x20b7   :  { %v6986_v4 = vpop.eup %6985 }
0x20b8   :  { %v6988_v48 = vpop.eup %6987  ;;  %v4393_v28 = vmul.f32 %v6986_v4, %v6982_v59 }
0x20b9   :  { %v4394_v47 = vmul.f32 %v6988_v48, %v6984_v23 }
0x20ba   :  { %v4395_v1 = vpack.c.bf16 %v4393_v28, %v4393_v28 }
0x20bb   :  { %v4396_v49 = vpack.c.bf16 %v4394_v47, %v4394_v47 }
0x20bc   :  { %v4399_v46 = vunpack.c.l.b16 %v4395_v1 }
0x20bd   :  { %v4400_v6 = vunpack.c.l.b16 %v4396_v49 }
0x20bf   :  { %v4401_v60 = vrot.slane %v4400_v6, 7 }
0x20c1   :  { %v4403_v3 = vsel %vm4402_vm6, %v4401_v60, %v4399_v46 }
0x20c2   :  { %v4404_v18 = vpack.c.b16 %v4403_v3, %v4403_v3 }
0x20c4   :  { %4439 = vmatmul.mubr.bf16.vlgmr.msra.gmra.mxu1 %v4404_v18  ;;  %4480 = vmatmul.mubr.bf16.vlgmr.msra.gmra.mxu0 %v4404_v18 }
0x20c5   :  { %4577 = vmatpush1.bf16.msra.mxu1 %v8147_v22  ;;  %4618 = vmatpush1.bf16.msra.mxu0 %v8149_v5 }
0x20c6   :  { %4578 = vmatprep.subr.bf16.mxu1 %v8151_v7  ;;  %4619 = vmatprep.subr.bf16.mxu0 %v8153_v29 }
0x20c7   :  { %4608 = vmatprep.mubr.bf16.mxu1 %v7387_v27  ;;  %4649 = vmatprep.mubr.bf16.mxu0 %v7387_v27 }
0x20c9   :  { %4579 = vmatpush1.bf16.msra.mxu1 %v8157_v32  ;;  %4620 = vmatpush1.bf16.msra.mxu0 %v8159_v21 }
0x20ca   :  { %4580 = vmatprep.subr.bf16.mxu1 %v8163_v8  ;;  %4621 = vmatprep.subr.bf16.mxu0 %v8165_v9 }
0x20cd   :  { %4581 = vmatpush1.bf16.msra.mxu1 %v8171_v52  ;;  %4622 = vmatpush1.bf16.msra.mxu0 %v8173_v19 }
0x20ce   :  { %4582 = vmatprep.subr.bf16.mxu1 %v8177_v53  ;;  %4623 = vmatprep.subr.bf16.mxu0 %v8179_v10 }
0x20d1   :  { %4583 = vmatpush1.bf16.msra.mxu1 %v8183_v11  ;;  %4624 = vmatpush1.bf16.msra.mxu0 %v8185_v12 }
0x20d2   :  { %4584 = vmatprep.subr.bf16.mxu1 %v8189_v33  ;;  %4625 = vmatprep.subr.bf16.mxu0 %v8191_v35 }
0x20d5   :  { %4585 = vmatpush1.bf16.msra.mxu1 %v8195_v15  ;;  %4626 = vmatpush1.bf16.msra.mxu0 %v8197_v50 }
0x20d6   :  { %4586 = vmatprep.subr.bf16.mxu1 %v8201_v16  ;;  %4627 = vmatprep.subr.bf16.mxu0 %v8203_v51 }
0x20d9   :  { %4587 = vmatpush1.bf16.msra.mxu1 %v8207_v14  ;;  %4628 = vmatpush1.bf16.msra.mxu0 %v8209_v20 }
0x20da   :  { %4588 = vmatprep.subr.bf16.mxu1 %v8213_v17  ;;  %4629 = vmatprep.subr.bf16.mxu0 %v8215_v58 }
0x20dd   :  { %4589 = vmatpush1.bf16.msra.mxu1 %v8219_v25  ;;  %4630 = vmatpush1.bf16.msra.mxu0 %v8221_v30 }
0x20de   :  { %4590 = vmatprep.subr.bf16.mxu1 %v8225_v36  ;;  %4631 = vmatprep.subr.bf16.mxu0 %v8227_v37 }
0x20e1   :  { %4591 = vmatpush1.bf16.msra.mxu1 %v8231_v38  ;;  %4632 = vmatpush1.bf16.msra.mxu0 %v8233_v41 }
0x20e2   :  { %4751 = vmatprep.subr.bf16.mxu1 %v8133_v63  ;;  %4792 = vmatprep.subr.bf16.mxu0 %v8135_v0 }
0x2184   :  { %v4440_v62 = vpop.f32.mrf.mxu1  ;;  %v4481_v40 = vpop.f32.mrf.mxu0 }
0x2185   :  { %v4492_v57 = vrot.slane %v4440_v62, 7  ;;  %v4508_v56 = vadd.f32 %v4440_v62, %v8284_v39  ;;  %v4494_v46 = vrot.slane %v4481_v40, 7  ;;  %v4510_v3 = vadd.f32 %v4481_v40, %v8298_v31 }
0x2186   :  { %v4442_v61 = vpop.f32.mrf.mxu1  ;;  %v4483_v45 = vpop.f32.mrf.mxu0 }
0x2187   :  { %v4504_v54 = vadd.f32 %v4492_v57, %v8282_v2  ;;  %v6038_v24 = vmul.f32 -1.442695, %v4508_v56  ;;  %v4493_v59 = vrot.slane %v4442_v61, 7  ;;  %v4509_v23 = vadd.f32 %v4442_v61, %v8290_v44 }
0x2188   :  { %v4444_v4 = vpop.f32.mrf.mxu1  ;;  %v4485_v48 = vpop.f32.mrf.mxu0  ;;  %v4506_v18 = vadd.f32 %v4494_v46, %v8296_v34  ;;  %v4495_v62 = vrot.slane %v4483_v45, 7  ;;  %v6040_v57 = vmul.f32 -1.442695, %v4510_v3 }
0x2189   :  { %v6035_v28 = vmul.f32 -1.442695, %v4504_v54  ;;  %6989 = vpow2.f32 %v6038_v24  ;;  %v4505_v47 = vadd.f32 %v4493_v59, %v8287_v26  ;;  %v6039_v1 = vmul.f32 -1.442695, %v4509_v23 }
0x218a   :  { %v4445_v49 = vpop.f32.mrf.mxu1  ;;  %v4486_v6 = vpop.f32.mrf.mxu0  ;;  %v6037_v56 = vmul.f32 -1.442695, %v4506_v18  ;;  %v4507_v61 = vadd.f32 %v4495_v62, %v8302_v55  ;;  %v4511_v24 = vadd.f32 %v4483_v45, %v8304_v13  ;;  %v4553_v18 = vrot.slane %v8310_v42, 7 }
0x218b   :  { %6991 = vpow2.f32 %v6035_v28  ;;  %v6036_v60 = vmul.f32 -1.442695, %v4505_v47 }
0x218c   :  { %6993 = vpow2.f32 %v6039_v1 }
0x218d   :  { %6995 = vpow2.f32 %v6036_v60 }
0x218e   :  { %6997 = vpow2.f32 %v6040_v57  ;;  %v4552_v57 = vrot.slane %v8308_v43, 7 }
0x218f   :  { %6999 = vpow2.f32 %v6037_v56 }
0x2190   :  { %7001 = vtanh.f32 %v4507_v61 }
0x2191   :  { %7003 = vtanh.f32 %v4511_v24 }
0x2196   :  { %v6990_v54 = vpop.eup %6989 }
0x2197   :  { %v4533_v59 = vadd.f32 1.0, %v6990_v54 }
0x2198   :  { %v6992_v23 = vpop.eup %6991 }
0x2199   :  { %v4530_v4 = vadd.f32 1.0, %v6992_v23  ;;  %v6994_v48 = vpop.eup %6993  ;;  %7005 = vrcp.f32 %v4533_v59 }
0x219a   :  { %v6996_v28 = vpop.eup %6995  ;;  %v4534_v40 = vadd.f32 1.0, %v6994_v48 }
0x219b   :  { %7007 = vrcp.f32 %v4530_v4  ;;  %v4531_v47 = vadd.f32 1.0, %v6996_v28  ;;  %v6998_v1 = vpop.eup %6997 }
0x219c   :  { %7009 = vrcp.f32 %v4534_v40  ;;  %v7000_v49 = vpop.eup %6999  ;;  %v4535_v3 = vadd.f32 1.0, %v6998_v1 }
0x219d   :  { %7011 = vrcp.f32 %v4531_v47  ;;  %v7002_v6 = vpop.eup %7001  ;;  %v4532_v56 = vadd.f32 1.0, %v7000_v49 }
0x219e   :  { %v7004_v46 = vpop.eup %7003  ;;  %7013 = vrcp.f32 %v4535_v3 }
0x219f   :  { %7015 = vrcp.f32 %v4532_v56 }
0x21a6   :  { %v7006_v45 = vpop.eup %7005 }
0x21a7   :  { %v4559_v24 = vmul.f32 %v7006_v45, %v7004_v46 }
0x21a8   :  { %v7008_v60 = vpop.eup %7007 }
0x21a9   :  { %v7010_v62 = vpop.eup %7009  ;;  %v4558_v23 = vmul.f32 %v7008_v60, %v7002_v6 }
0x21aa   :  { %v7012_v61 = vpop.eup %7011  ;;  %v4557_v54 = vmul.f32 %v7010_v62, %v4553_v18 }
0x21ab   :  { %v4556_v59 = vmul.f32 %v7012_v61, %v4552_v57  ;;  %v7014_v42 = vpop.eup %7013 }
0x21ac   :  { %v8359_v4 = vadd.f32 %v4559_v24, %v4557_v54  ;;  %v7016_v28 = vpop.eup %7015 }
0x21ad   :  { %v8361_v48 = vadd.f32 %v4558_v23, %v4556_v59 }
0x21ae   :  { %7017 = vtanh.f32 %v8359_v4 }
0x21af   :  { %7019 = vtanh.f32 %v8361_v48 }
0x21bb   :  { %v7018_v40 = vpop.eup %7017 }
0x21bc   :  { %v7020_v43 = vpop.eup %7019  ;;  %v4565_v47 = vmul.f32 %v7018_v40, %v7014_v42 }
0x21bd   :  { %v4564_v1 = vmul.f32 %v7020_v43, %v7016_v28 }
0x21be   :  { %v4567_v46 = vpack.c.bf16 %v4565_v47, %v4565_v47 }
0x21bf   :  { %v4566_v49 = vpack.c.bf16 %v4564_v1, %v4564_v1 }
0x21c0   :  { %v4571_v6 = vunpack.c.l.b16 %v4567_v46 }
0x21c1   :  { %v4570_v45 = vunpack.c.l.b16 %v4566_v49 }
0x21c3   :  { %v4572_v60 = vrot.slane %v4570_v45, 1 }
0x21c5   :  { %v4573_v3 = vsel %vm4402_vm6, %v4571_v6, %v4572_v60 }
0x21c6   :  { %v4574_v18 = vpack.c.b16 %v4573_v3, %v4573_v3 }
0x21c8   :  { %4609 = vmatmul.mubr.bf16.vlgmr.msra.gmra.mxu1 %v4574_v18  ;;  %4650 = vmatmul.mubr.bf16.vlgmr.msra.gmra.mxu0 %v4574_v18 }
0x21c9   :  { %4752 = vmatpush1.bf16.msra.mxu1 %v8147_v22  ;;  %4793 = vmatpush1.bf16.msra.mxu0 %v8149_v5 }
0x21ca   :  { %4753 = vmatprep.subr.bf16.mxu1 %v8151_v7  ;;  %4794 = vmatprep.subr.bf16.mxu0 %v8153_v29 }
0x21cb   :  { %4783 = vmatprep.mubr.bf16.mxu1 %v7387_v27  ;;  %4824 = vmatprep.mubr.bf16.mxu0 %v7387_v27 }
0x21cd   :  { %4754 = vmatpush1.bf16.msra.mxu1 %v8157_v32  ;;  %4795 = vmatpush1.bf16.msra.mxu0 %v8159_v21 }
0x21ce   :  { %4755 = vmatprep.subr.bf16.mxu1 %v8163_v8  ;;  %4796 = vmatprep.subr.bf16.mxu0 %v8165_v9 }
0x21d1   :  { %4756 = vmatpush1.bf16.msra.mxu1 %v8171_v52  ;;  %4797 = vmatpush1.bf16.msra.mxu0 %v8173_v19 }
0x21d2   :  { %4757 = vmatprep.subr.bf16.mxu1 %v8177_v53  ;;  %4798 = vmatprep.subr.bf16.mxu0 %v8179_v10 }
0x21d5   :  { %4758 = vmatpush1.bf16.msra.mxu1 %v8183_v11  ;;  %4799 = vmatpush1.bf16.msra.mxu0 %v8185_v12 }
0x21d6   :  { %4759 = vmatprep.subr.bf16.mxu1 %v8189_v33  ;;  %4800 = vmatprep.subr.bf16.mxu0 %v8191_v35 }
0x21d9   :  { %4760 = vmatpush1.bf16.msra.mxu1 %v8195_v15  ;;  %4801 = vmatpush1.bf16.msra.mxu0 %v8197_v50 }
0x21da   :  { %4761 = vmatprep.subr.bf16.mxu1 %v8201_v16  ;;  %4802 = vmatprep.subr.bf16.mxu0 %v8203_v51 }
0x21dd   :  { %4762 = vmatpush1.bf16.msra.mxu1 %v8207_v14  ;;  %4803 = vmatpush1.bf16.msra.mxu0 %v8209_v20 }
0x21de   :  { %4763 = vmatprep.subr.bf16.mxu1 %v8213_v17  ;;  %4804 = vmatprep.subr.bf16.mxu0 %v8215_v58 }
0x21e1   :  { %4764 = vmatpush1.bf16.msra.mxu1 %v8219_v25  ;;  %4805 = vmatpush1.bf16.msra.mxu0 %v8221_v30 }
0x21e2   :  { %4765 = vmatprep.subr.bf16.mxu1 %v8225_v36  ;;  %4806 = vmatprep.subr.bf16.mxu0 %v8227_v37 }
0x21e5   :  { %4766 = vmatpush1.bf16.msra.mxu1 %v8231_v38  ;;  %4807 = vmatpush1.bf16.msra.mxu0 %v8233_v41 }
0x21e6   :  { %4926 = vmatprep.subr.bf16.mxu1 %v8133_v63  ;;  %4967 = vmatprep.subr.bf16.mxu0 %v8135_v0 }
0x2288   :  { %v4610_v62 = vpop.f32.mrf.mxu1  ;;  %v4651_v57 = vpop.f32.mrf.mxu0 }
0x2289   :  { %v4662_v56 = vrot.slane %v4610_v62, 6  ;;  %v4666_v61 = vrot.slane %v4610_v62, 7  ;;  %v4664_v18 = vrot.slane %v4651_v57, 6  ;;  %v4668_v62 = vrot.slane %v4651_v57, 7 }
0x228a   :  { %v4612_v54 = vpop.f32.mrf.mxu1  ;;  %v4653_v24 = vpop.f32.mrf.mxu0 }
0x228b   :  { %v4678_v59 = vadd.f32 %v4662_v56, %v8282_v2  ;;  %v4682_v23 = vadd.f32 %v4666_v61, %v8284_v39  ;;  %v4663_v42 = vrot.slane %v4612_v54, 6  ;;  %v4667_v28 = vrot.slane %v4612_v54, 7 }
0x228c   :  { %v4614_v40 = vpop.f32.mrf.mxu1  ;;  %v4655_v43 = vpop.f32.mrf.mxu0  ;;  %v4680_v56 = vadd.f32 %v4664_v18, %v8296_v34  ;;  %v4684_v61 = vadd.f32 %v4668_v62, %v8298_v31  ;;  %v4665_v54 = vrot.slane %v4653_v24, 6 }
0x228d   :  { %v6041_v47 = vmul.f32 -1.442695, %v4678_v59  ;;  %v6044_v1 = vmul.f32 -1.442695, %v4682_v23  ;;  %v4679_v49 = vadd.f32 %v4663_v42, %v8287_v26  ;;  %v4683_v46 = vadd.f32 %v4667_v28, %v8290_v44 }
0x228e   :  { %v4615_v45 = vpop.f32.mrf.mxu1  ;;  %v4656_v6 = vpop.f32.mrf.mxu0  ;;  %v4669_v59 = vrot.slane %v4653_v24, 7  ;;  %v6043_v23 = vmul.f32 -1.442695, %v4680_v56  ;;  %v6046_v42 = vmul.f32 -1.442695, %v4684_v61  ;;  %v4681_v28 = vadd.f32 %v4665_v54, %v8302_v55 }
0x228f   :  { %7021 = vpow2.f32 %v6041_v47  ;;  %v6042_v60 = vmul.f32 -1.442695, %v4679_v49  ;;  %v6045_v3 = vmul.f32 -1.442695, %v4683_v46  ;;  %v4726_v61 = vrot.slane %v8361_v48, 7 }
0x2290   :  { %7023 = vpow2.f32 %v6044_v1  ;;  %v4685_v43 = vadd.f32 %v4669_v59, %v8304_v13 }
0x2291   :  { %7025 = vpow2.f32 %v6042_v60 }
0x2292   :  { %7027 = vpow2.f32 %v6045_v3 }
0x2293   :  { %7029 = vpow2.f32 %v6043_v23  ;;  %v4727_v23 = vrot.slane %v8359_v4, 7 }
0x2294   :  { %7031 = vpow2.f32 %v6046_v42 }
0x2295   :  { %7033 = vtanh.f32 %v4681_v28 }
0x2296   :  { %7035 = vtanh.f32 %v4685_v43 }
0x229c   :  { %v7022_v40 = vpop.eup %7021 }
0x229d   :  { %v7024_v47 = vpop.eup %7023  ;;  %v4704_v1 = vadd.f32 1.0, %v7022_v40 }
0x229e   :  { %v4707_v49 = vadd.f32 1.0, %v7024_v47  ;;  %v7026_v57 = vpop.eup %7025 }
0x229f   :  { %v7028_v46 = vpop.eup %7027  ;;  %7037 = vrcp.f32 %v4704_v1  ;;  %v4705_v45 = vadd.f32 1.0, %v7026_v57 }
0x22a0   :  { %7039 = vrcp.f32 %v4707_v49  ;;  %v4708_v24 = vadd.f32 1.0, %v7028_v46  ;;  %v7030_v6 = vpop.eup %7029 }
0x22a1   :  { %7041 = vrcp.f32 %v4705_v45  ;;  %v7032_v60 = vpop.eup %7031  ;;  %v4706_v54 = vadd.f32 1.0, %v7030_v6 }
0x22a2   :  { %7043 = vrcp.f32 %v4708_v24  ;;  %v7034_v3 = vpop.eup %7033  ;;  %v4709_v42 = vadd.f32 1.0, %v7032_v60 }
0x22a3   :  { %v7036_v18 = vpop.eup %7035  ;;  %7045 = vrcp.f32 %v4706_v54 }
0x22a4   :  { %7047 = vrcp.f32 %v4709_v42 }
0x22ac   :  { %v7038_v62 = vpop.eup %7037 }
0x22ad   :  { %v7040_v56 = vpop.eup %7039  ;;  %v4732_v43 = vmul.f32 %v7038_v62, %v7034_v3 }
0x22ae   :  { %v7042_v59 = vpop.eup %7041  ;;  %v4733_v1 = vmul.f32 %v7040_v56, %v7036_v18 }
0x22af   :  { %v7044_v28 = vpop.eup %7043  ;;  %v4730_v40 = vmul.f32 %v7042_v59, %v4726_v61 }
0x22b0   :  { %v4731_v47 = vmul.f32 %v7044_v28, %v4727_v23  ;;  %v7046_v48 = vpop.eup %7045 }
0x22b1   :  { %v8410_v49 = vadd.f32 %v4732_v43, %v4730_v40  ;;  %v7048_v46 = vpop.eup %7047 }
0x22b2   :  { %v8412_v57 = vadd.f32 %v4733_v1, %v4731_v47 }
0x22b3   :  { %7049 = vtanh.f32 %v8410_v49 }
0x22b4   :  { %7051 = vtanh.f32 %v8412_v57 }
0x22c0   :  { %v7050_v45 = vpop.eup %7049 }
0x22c1   :  { %v7052_v4 = vpop.eup %7051  ;;  %v4738_v24 = vmul.f32 %v7050_v45, %v7046_v48 }
0x22c2   :  { %v4739_v6 = vmul.f32 %v7052_v4, %v7048_v46 }
0x22c3   :  { %v4740_v60 = vpack.c.bf16 %v4738_v24, %v4738_v24 }
0x22c4   :  { %v4741_v3 = vpack.c.bf16 %v4739_v6, %v4739_v6  ;;  %v4901_v6 = vrot.slane %v8410_v49, 7 }
0x22c5   :  { %v4744_v62 = vunpack.c.l.b16 %v4740_v60 }
0x22c6   :  { %v4745_v18 = vunpack.c.l.b16 %v4741_v3 }
0x22c7   :  { %v4746_v56 = vrot.slane %v4744_v62, 2  ;;  %v4902_v62 = vrot.slane %v8412_v57, 7 }
0x22c8   :  { %v4747_v61 = vrot.slane %v4745_v18, 1 }
0x22ca   :  { %v4748_v54 = vsel %vm4402_vm6, %v4747_v61, %v4746_v56 }
0x22cb   :  { %v4749_v59 = vpack.c.b16 %v4748_v54, %v4748_v54 }
0x22cd   :  { %4784 = vmatmul.mubr.bf16.vlgmr.msra.gmra.mxu1 %v4749_v59  ;;  %4825 = vmatmul.mubr.bf16.vlgmr.msra.gmra.mxu0 %v4749_v59 }
0x22ce   :  { %4927 = vmatpush1.bf16.msra.mxu1 %v8147_v22  ;;  %4968 = vmatpush1.bf16.msra.mxu0 %v8149_v5 }
0x22cf   :  { %4928 = vmatprep.subr.bf16.mxu1 %v8151_v7  ;;  %4969 = vmatprep.subr.bf16.mxu0 %v8153_v29 }
0x22d0   :  { %4958 = vmatprep.mubr.bf16.mxu1 %v7387_v27  ;;  %4999 = vmatprep.mubr.bf16.mxu0 %v7387_v27 }
0x22d2   :  { %4929 = vmatpush1.bf16.msra.mxu1 %v8157_v32  ;;  %4970 = vmatpush1.bf16.msra.mxu0 %v8159_v21 }
0x22d3   :  { %4930 = vmatprep.subr.bf16.mxu1 %v8163_v8  ;;  %4971 = vmatprep.subr.bf16.mxu0 %v8165_v9 }
0x22d6   :  { %4931 = vmatpush1.bf16.msra.mxu1 %v8171_v52  ;;  %4972 = vmatpush1.bf16.msra.mxu0 %v8173_v19 }
0x22d7   :  { %4932 = vmatprep.subr.bf16.mxu1 %v8177_v53  ;;  %4973 = vmatprep.subr.bf16.mxu0 %v8179_v10 }
0x22da   :  { %4933 = vmatpush1.bf16.msra.mxu1 %v8183_v11  ;;  %4974 = vmatpush1.bf16.msra.mxu0 %v8185_v12 }
0x22db   :  { %4934 = vmatprep.subr.bf16.mxu1 %v8189_v33  ;;  %4975 = vmatprep.subr.bf16.mxu0 %v8191_v35 }
0x22de   :  { %4935 = vmatpush1.bf16.msra.mxu1 %v8195_v15  ;;  %4976 = vmatpush1.bf16.msra.mxu0 %v8197_v50 }
0x22df   :  { %4936 = vmatprep.subr.bf16.mxu1 %v8201_v16  ;;  %4977 = vmatprep.subr.bf16.mxu0 %v8203_v51 }
0x22e2   :  { %4937 = vmatpush1.bf16.msra.mxu1 %v8207_v14  ;;  %4978 = vmatpush1.bf16.msra.mxu0 %v8209_v20 }
0x22e3   :  { %4938 = vmatprep.subr.bf16.mxu1 %v8213_v17  ;;  %4979 = vmatprep.subr.bf16.mxu0 %v8215_v58 }
0x22e6   :  { %4939 = vmatpush1.bf16.msra.mxu1 %v8219_v25  ;;  %4980 = vmatpush1.bf16.msra.mxu0 %v8221_v30 }
0x22e7   :  { %4940 = vmatprep.subr.bf16.mxu1 %v8225_v36  ;;  %4981 = vmatprep.subr.bf16.mxu0 %v8227_v37 }
0x22ea   :  { %4941 = vmatpush1.bf16.msra.mxu1 %v8231_v38  ;;  %4982 = vmatpush1.bf16.msra.mxu0 %v8233_v41 }
0x22eb   :  { %5101 = vmatprep.subr.bf16.mxu1 %v8133_v63  ;;  %5142 = vmatprep.subr.bf16.mxu0 %v8135_v0 }
0x238d   :  { %v4785_v22 = vpop.f32.mrf.mxu1  ;;  %v4826_v5 = vpop.f32.mrf.mxu0 }
0x238e   :  { %v4837_v7 = vrot.slane %v4785_v22, 5  ;;  %v4841_v29 = vrot.slane %v4785_v22, 6  ;;  %v4839_v16 = vrot.slane %v4826_v5, 5  ;;  %v4843_v51 = vrot.slane %v4826_v5, 6 }
0x238f   :  { %v4787_v32 = vpop.f32.mrf.mxu1  ;;  %v4828_v21 = vpop.f32.mrf.mxu0 }
0x2390   :  { %v4853_v8 = vadd.f32 %v4837_v7, %v8282_v2  ;;  %v4857_v9 = vadd.f32 %v4841_v29, %v8284_v39  ;;  %v4838_v52 = vrot.slane %v4787_v32, 5  ;;  %v4842_v19 = vrot.slane %v4787_v32, 6 }
0x2391   :  { %v4789_v53 = vpop.f32.mrf.mxu1  ;;  %v4830_v10 = vpop.f32.mrf.mxu0  ;;  %v4855_v14 = vadd.f32 %v4839_v16, %v8296_v34  ;;  %v4859_v20 = vadd.f32 %v4843_v51, %v8298_v31  ;;  %v4840_v17 = vrot.slane %v4828_v21, 5  ;;  %v4844_v58 = vrot.slane %v4828_v21, 6  ;;  %v8485_v16 = vld [vmem:[#allocation10 + $0xc8] ss:$16 sps:$4 sm:$0xff]   ;;  %v8488_v51 = vld [vmem:[#allocation10 + $0xa4] ss:$16 sps:$4 sm:$0xff]  }
0x2392   :  { %v6047_v11 = vmul.f32 -1.442695, %v4853_v8  ;;  %v6050_v12 = vmul.f32 -1.442695, %v4857_v9  ;;  %v4854_v63 = vadd.f32 %v4838_v52, %v8287_v26  ;;  %v4858_v0 = vadd.f32 %v4842_v19, %v8290_v44 }
0x2393   :  { %v4790_v33 = vpop.f32.mrf.mxu1  ;;  %v4831_v35 = vpop.f32.mrf.mxu0  ;;  %v6049_v25 = vmul.f32 -1.442695, %v4855_v14  ;;  %v6052_v30 = vmul.f32 -1.442695, %v4859_v20  ;;  %v4856_v36 = vadd.f32 %v4840_v17, %v8302_v55  ;;  %v4860_v38 = vadd.f32 %v4844_v58, %v8304_v13  ;;  %v8491_v14 = vld [vmem:[#allocation10 + $0xac] ss:$16 sps:$4 sm:$0xff]  }
0x2394   :  { %7053 = vpow2.f32 %v6047_v11  ;;  %v6048_v15 = vmul.f32 -1.442695, %v4854_v63  ;;  %v6051_v50 = vmul.f32 -1.442695, %v4858_v0  ;;  %v8468_v0 = vld [vmem:[#allocation10 + $0xe0] ss:$16 sps:$4 sm:$0xff]  }
0x2395   :  { %7055 = vpow2.f32 %v6050_v12  ;;  %v8471_v33 = vld [vmem:[#allocation10 + $0xe8] ss:$16 sps:$4 sm:$0xff]   ;;  %v8474_v35 = vld [vmem:[#allocation10 + $0xc4] ss:$16 sps:$4 sm:$0xff]   ;;  %v8494_v20 = vld [vmem:[#allocation10 + $0xa0] ss:$16 sps:$4 sm:$0xff]  }
0x2396   :  { %7057 = vpow2.f32 %v6048_v15  ;;  %v8477_v15 = vld [vmem:[#allocation10 + $0xcc] ss:$16 sps:$4 sm:$0xff]   ;;  %v8497_v17 = vld [vmem:[#allocation10 + $0xa8] ss:$16 sps:$4 sm:$0xff]   ;;  %v8500_v58 = vld [vmem:[#allocation10 + $0x84] ss:$16 sps:$4 sm:$0xff]  }
0x2397   :  { %7059 = vpow2.f32 %v6051_v50  ;;  %v8482_v50 = vld [vmem:[#allocation10 + $0xc0] ss:$16 sps:$4 sm:$0xff]  }
0x2398   :  { %7061 = vpow2.f32 %v6049_v25  ;;  %v8503_v25 = vld [vmem:[#allocation10 + $0x8c] ss:$16 sps:$4 sm:$0xff]  }
0x2399   :  { %7063 = vpow2.f32 %v6052_v30  ;;  %v8506_v30 = vld [vmem:[#allocation10 + $0x80] ss:$16 sps:$4 sm:$0xff]  }
0x239a   :  { %7065 = vtanh.f32 %v4856_v36  ;;  %v8509_v36 = vld [vmem:[#allocation10 + $0x88] ss:$16 sps:$4 sm:$0xff]  }
0x239b   :  { %7067 = vtanh.f32 %v4860_v38  ;;  %v8515_v38 = vld [vmem:[#allocation10 + $0x6c] ss:$16 sps:$4 sm:$0xff]  }
0x23a1   :  { %v7054_v37 = vpop.eup %7053 }
0x23a2   :  { %v7056_v41 = vpop.eup %7055  ;;  %v4879_v23 = vadd.f32 1.0, %v7054_v37  ;;  %v8512_v37 = vld [vmem:[#allocation10 + $0x64] ss:$16 sps:$4 sm:$0xff]  }
0x23a3   :  { %v4882_v42 = vadd.f32 1.0, %v7056_v41  ;;  %v7058_v28 = vpop.eup %7057  ;;  %v8518_v41 = vld [vmem:[#allocation10 + $0x60] ss:$16 sps:$4 sm:$0xff]  }
0x23a4   :  { %v7060_v40 = vpop.eup %7059  ;;  %7069 = vrcp.f32 %v4879_v23  ;;  %v4880_v43 = vadd.f32 1.0, %v7058_v28  ;;  %v8521_v23 = vld [vmem:[#allocation10 + $0x68] ss:$16 sps:$4 sm:$0xff]   ;;  %v8527_v28 = vld [vmem:[#allocation10 + $0x4c] ss:$16 sps:$4 sm:$0xff]  }
0x23a5   :  { %7071 = vrcp.f32 %v4882_v42  ;;  %v4883_v47 = vadd.f32 1.0, %v7060_v40  ;;  %v7062_v1 = vpop.eup %7061  ;;  %v8524_v42 = vld [vmem:[#allocation10 + $0x44] ss:$16 sps:$4 sm:$0xff]   ;;  %v8530_v40 = vld [vmem:[#allocation10 + $0x40] ss:$16 sps:$4 sm:$0xff]  }
0x23a6   :  { %7073 = vrcp.f32 %v4880_v43  ;;  %v7064_v48 = vpop.eup %7063  ;;  %v4881_v60 = vadd.f32 1.0, %v7062_v1  ;;  %v8533_v43 = vld [vmem:[#allocation10 + $0x48] ss:$16 sps:$4 sm:$0xff]   ;;  %v8539_v1 = vld [vmem:[#allocation10 + $0x2c] ss:$16 sps:$4 sm:$0xff]  }
0x23a7   :  { %7075 = vrcp.f32 %v4883_v47  ;;  %v7066_v46 = vpop.eup %7065  ;;  %v4884_v18 = vadd.f32 1.0, %v7064_v48  ;;  %v8536_v47 = vld [vmem:[#allocation10 + $0x24] ss:$16 sps:$4 sm:$0xff]   ;;  %v8542_v48 = vld [vmem:[#allocation10 + $0x20] ss:$16 sps:$4 sm:$0xff]  }
0x23a8   :  { %v7068_v45 = vpop.eup %7067  ;;  %7077 = vrcp.f32 %v4881_v60  ;;  %v8560_v60 = vld [vmem:[#allocation10 + $0xe4] ss:$16 sps:$4 sm:$0xff]  }
0x23a9   :  { %7079 = vrcp.f32 %v4884_v18 }
0x23b1   :  { %v7070_v4 = vpop.eup %7069 }
0x23b2   :  { %v7072_v24 = vpop.eup %7071  ;;  %v4907_v54 = vmul.f32 %v7070_v4, %v7066_v46  ;;  %v8545_v46 = vld [vmem:[#allocation10 + $0x28] ss:$16 sps:$4 sm:$0xff]   ;;  %v8551_v4 = vld [vmem:[#allocation10 + $0xc] ss:$16 sps:$4 sm:$0xff]  }
0x23b3   :  { %v7074_v3 = vpop.eup %7073  ;;  %v4908_v22 = vmul.f32 %v7072_v24, %v7068_v45  ;;  %v8548_v45 = vld [vmem:[#allocation10 + $0x4] ss:$16 sps:$4 sm:$0xff]   ;;  %v8554_v24 = vld [vmem:[#allocation10] ss:$16 sps:$4 sm:$0xff]  }
0x23b4   :  { %v7076_v56 = vpop.eup %7075  ;;  %v4905_v61 = vmul.f32 %v7074_v3, %v4901_v6  ;;  %v8557_v6 = vld [vmem:[#allocation10 + $0x8] ss:$16 sps:$4 sm:$0xff]   ;;  %v8563_v3 = vld [vmem:[#allocation10 + $0xec] ss:$16 sps:$4 sm:$0xff]  }
0x23b5   :  { %v4906_v59 = vmul.f32 %v7076_v56, %v4902_v62  ;;  %v7078_v49 = vpop.eup %7077 }
0x23b6   :  { %v8461_v5 = vadd.f32 %v4907_v54, %v4905_v61  ;;  %v7080_v29 = vpop.eup %7079 }
0x23b7   :  { %v8463_v7 = vadd.f32 %v4908_v22, %v4906_v59 }
0x23b8   :  { %7081 = vtanh.f32 %v8461_v5 }
0x23b9   :  { %7083 = vtanh.f32 %v8463_v7 }
0x23c5   :  { %v7082_v32 = vpop.eup %7081 }
0x23c6   :  { %v7084_v57 = vpop.eup %7083  ;;  %v4913_v21 = vmul.f32 %v7082_v32, %v7078_v49 }
0x23c7   :  { %v4914_v8 = vmul.f32 %v7084_v57, %v7080_v29 }
0x23c8   :  { %v4915_v9 = vpack.c.bf16 %v4913_v21, %v4913_v21 }
0x23c9   :  { %v4916_v52 = vpack.c.bf16 %v4914_v8, %v4914_v8 }
0x23ca   :  { %v4919_v19 = vunpack.c.l.b16 %v4915_v9 }
0x23cb   :  { %v4920_v53 = vunpack.c.l.b16 %v4916_v52 }
0x23cc   :  { %v4921_v10 = vrot.slane %v4919_v19, 3 }
0x23cd   :  { %v4922_v11 = vrot.slane %v4920_v53, 2 }
0x23cf   :  { %v4923_v12 = vsel %vm4402_vm6, %v4922_v11, %v4921_v10 }
0x23d0   :  { %v4924_v63 = vpack.c.b16 %v4923_v12, %v4923_v12 }
0x23d2   :  { %4959 = vmatmul.mubr.bf16.vlgmr.msra.gmra.mxu1 %v4924_v63  ;;  %5000 = vmatmul.mubr.bf16.vlgmr.msra.gmra.mxu0 %v4924_v63 }
0x23d3   :  { %5102 = vmatpush1.bf16.msra.mxu1 %v8468_v0  ;;  %5143 = vmatpush1.bf16.msra.mxu0 %v8471_v33 }
0x23d4   :  { %5103 = vmatprep.subr.bf16.mxu1 %v8474_v35  ;;  %5144 = vmatprep.subr.bf16.mxu0 %v8477_v15 }
0x23d5   :  { %5133 = vmatprep.mubr.bf16.mxu1 %v7387_v27  ;;  %5174 = vmatprep.mubr.bf16.mxu0 %v7387_v27 }
0x23d7   :  { %5104 = vmatpush1.bf16.msra.mxu1 %v8482_v50  ;;  %5145 = vmatpush1.bf16.msra.mxu0 %v8485_v16 }
0x23d8   :  { %5105 = vmatprep.subr.bf16.mxu1 %v8488_v51  ;;  %5146 = vmatprep.subr.bf16.mxu0 %v8491_v14 }
0x23db   :  { %5106 = vmatpush1.bf16.msra.mxu1 %v8494_v20  ;;  %5147 = vmatpush1.bf16.msra.mxu0 %v8497_v17 }
0x23dc   :  { %5107 = vmatprep.subr.bf16.mxu1 %v8500_v58  ;;  %5148 = vmatprep.subr.bf16.mxu0 %v8503_v25 }
0x23df   :  { %5108 = vmatpush1.bf16.msra.mxu1 %v8506_v30  ;;  %5149 = vmatpush1.bf16.msra.mxu0 %v8509_v36 }
0x23e0   :  { %5109 = vmatprep.subr.bf16.mxu1 %v8512_v37  ;;  %5150 = vmatprep.subr.bf16.mxu0 %v8515_v38 }
0x23e3   :  { %5110 = vmatpush1.bf16.msra.mxu1 %v8518_v41  ;;  %5151 = vmatpush1.bf16.msra.mxu0 %v8521_v23 }
0x23e4   :  { %5111 = vmatprep.subr.bf16.mxu1 %v8524_v42  ;;  %5152 = vmatprep.subr.bf16.mxu0 %v8527_v28 }
0x23e7   :  { %5112 = vmatpush1.bf16.msra.mxu1 %v8530_v40  ;;  %5153 = vmatpush1.bf16.msra.mxu0 %v8533_v43 }
0x23e8   :  { %5113 = vmatprep.subr.bf16.mxu1 %v8536_v47  ;;  %5154 = vmatprep.subr.bf16.mxu0 %v8539_v1 }
0x23eb   :  { %5114 = vmatpush1.bf16.msra.mxu1 %v8542_v48  ;;  %5155 = vmatpush1.bf16.msra.mxu0 %v8545_v46 }
0x23ec   :  { %5115 = vmatprep.subr.bf16.mxu1 %v8548_v45  ;;  %5156 = vmatprep.subr.bf16.mxu0 %v8551_v4 }
0x23ef   :  { %5116 = vmatpush1.bf16.msra.mxu1 %v8554_v24  ;;  %5157 = vmatpush1.bf16.msra.mxu0 %v8557_v6 }
0x23f0   :  { %5276 = vmatprep.subr.bf16.mxu1 %v8560_v60  ;;  %5317 = vmatprep.subr.bf16.mxu0 %v8563_v3 }
0x2492   :  { %v4960_v62 = vpop.f32.mrf.mxu1  ;;  %v5001_v18 = vpop.f32.mrf.mxu0 }
0x2493   :  { %v5012_v56 = vrot.slane %v4960_v62, 4  ;;  %v5016_v61 = vrot.slane %v4960_v62, 5  ;;  %v5014_v63 = vrot.slane %v5001_v18, 4  ;;  %v5018_v62 = vrot.slane %v5001_v18, 5 }
0x2494   :  { %v4962_v54 = vpop.f32.mrf.mxu1  ;;  %v5003_v59 = vpop.f32.mrf.mxu0 }
0x2495   :  { %v5028_v22 = vadd.f32 %v5012_v56, %v8282_v2  ;;  %v5032_v49 = vadd.f32 %v5016_v61, %v8284_v39  ;;  %v5013_v29 = vrot.slane %v4962_v54, 4  ;;  %v5017_v32 = vrot.slane %v4962_v54, 5 }
0x2496   :  { %v4964_v57 = vpop.f32.mrf.mxu1  ;;  %v5005_v21 = vpop.f32.mrf.mxu0  ;;  %v5030_v56 = vadd.f32 %v5014_v63, %v8296_v34  ;;  %v5034_v61 = vadd.f32 %v5018_v62, %v8298_v31  ;;  %v5015_v54 = vrot.slane %v5003_v59, 4 }
0x2497   :  { %v6053_v8 = vmul.f32 -1.442695, %v5028_v22  ;;  %v6056_v9 = vmul.f32 -1.442695, %v5032_v49  ;;  %v5029_v52 = vadd.f32 %v5013_v29, %v8287_v26  ;;  %v5033_v19 = vadd.f32 %v5017_v32, %v8290_v44 }
0x2498   :  { %v4965_v53 = vpop.f32.mrf.mxu1  ;;  %v5006_v10 = vpop.f32.mrf.mxu0  ;;  %v5019_v22 = vrot.slane %v5003_v59, 5  ;;  %v6055_v49 = vmul.f32 -1.442695, %v5030_v56  ;;  %v6058_v29 = vmul.f32 -1.442695, %v5034_v61  ;;  %v5031_v32 = vadd.f32 %v5015_v54, %v8302_v55 }
0x2499   :  { %7085 = vpow2.f32 %v6053_v8  ;;  %v6054_v11 = vmul.f32 -1.442695, %v5029_v52  ;;  %v6057_v12 = vmul.f32 -1.442695, %v5033_v19  ;;  %v5076_v61 = vrot.slane %v8461_v5, 7 }
0x249a   :  { %7087 = vpow2.f32 %v6056_v9  ;;  %v5035_v21 = vadd.f32 %v5019_v22, %v8304_v13 }
0x249b   :  { %7089 = vpow2.f32 %v6054_v11 }
0x249c   :  { %7091 = vpow2.f32 %v6057_v12 }
0x249d   :  { %7093 = vpow2.f32 %v6055_v49  ;;  %v5077_v49 = vrot.slane %v8463_v7, 7 }
0x249e   :  { %7095 = vpow2.f32 %v6058_v29 }
0x249f   :  { %7097 = vtanh.f32 %v5031_v32 }
0x24a0   :  { %7099 = vtanh.f32 %v5035_v21 }
0x24a6   :  { %v7086_v57 = vpop.eup %7085 }
0x24a7   :  { %v7088_v8 = vpop.eup %7087  ;;  %v5054_v9 = vadd.f32 1.0, %v7086_v57 }
0x24a8   :  { %v5057_v52 = vadd.f32 1.0, %v7088_v8  ;;  %v7090_v18 = vpop.eup %7089 }
0x24a9   :  { %v7092_v19 = vpop.eup %7091  ;;  %7101 = vrcp.f32 %v5054_v9  ;;  %v5055_v53 = vadd.f32 1.0, %v7090_v18 }
0x24aa   :  { %7103 = vrcp.f32 %v5057_v52  ;;  %v5058_v59 = vadd.f32 1.0, %v7092_v19  ;;  %v7094_v10 = vpop.eup %7093 }
0x24ab   :  { %7105 = vrcp.f32 %v5055_v53  ;;  %v7096_v11 = vpop.eup %7095  ;;  %v5056_v54 = vadd.f32 1.0, %v7094_v10 }
0x24ac   :  { %7107 = vrcp.f32 %v5058_v59  ;;  %v7098_v12 = vpop.eup %7097  ;;  %v5059_v29 = vadd.f32 1.0, %v7096_v11 }
0x24ad   :  { %v7100_v63 = vpop.eup %7099  ;;  %7109 = vrcp.f32 %v5056_v54 }
0x24ae   :  { %7111 = vrcp.f32 %v5059_v29 }
0x24b6   :  { %v7102_v62 = vpop.eup %7101 }
0x24b7   :  { %v7104_v56 = vpop.eup %7103  ;;  %v5082_v21 = vmul.f32 %v7102_v62, %v7098_v12 }
0x24b8   :  { %v7106_v22 = vpop.eup %7105  ;;  %v5083_v9 = vmul.f32 %v7104_v56, %v7100_v63 }
0x24b9   :  { %v7108_v32 = vpop.eup %7107  ;;  %v5080_v57 = vmul.f32 %v7106_v22, %v5076_v61 }
0x24ba   :  { %v5081_v8 = vmul.f32 %v7108_v32, %v5077_v49  ;;  %v7110_v5 = vpop.eup %7109 }
0x24bb   :  { %v8576_v52 = vadd.f32 %v5082_v21, %v5080_v57  ;;  %v7112_v19 = vpop.eup %7111 }
0x24bc   :  { %v8578_v18 = vadd.f32 %v5083_v9, %v5081_v8 }
0x24bd   :  { %7113 = vtanh.f32 %v8576_v52 }
0x24be   :  { %7115 = vtanh.f32 %v8578_v18 }
0x24ca   :  { %v7114_v53 = vpop.eup %7113 }
0x24cb   :  { %v7116_v7 = vpop.eup %7115  ;;  %v5088_v59 = vmul.f32 %v7114_v53, %v7110_v5 }
0x24cc   :  { %v5089_v10 = vmul.f32 %v7116_v7, %v7112_v19 }
0x24cd   :  { %v5090_v11 = vpack.c.bf16 %v5088_v59, %v5088_v59 }
0x24ce   :  { %v5091_v12 = vpack.c.bf16 %v5089_v10, %v5089_v10 }
0x24cf   :  { %v5094_v62 = vunpack.c.l.b16 %v5090_v11 }
0x24d0   :  { %v5095_v63 = vunpack.c.l.b16 %v5091_v12 }
0x24d1   :  { %v5096_v56 = vrot.slane %v5094_v62, 4 }
0x24d2   :  { %v5097_v61 = vrot.slane %v5095_v63, 3 }
0x24d4   :  { %v5098_v54 = vsel %vm4402_vm6, %v5097_v61, %v5096_v56 }
0x24d5   :  { %v5099_v22 = vpack.c.b16 %v5098_v54, %v5098_v54 }
0x24d7   :  { %5134 = vmatmul.mubr.bf16.vlgmr.msra.gmra.mxu1 %v5099_v22  ;;  %5175 = vmatmul.mubr.bf16.vlgmr.msra.gmra.mxu0 %v5099_v22 }
0x24d8   :  { %5277 = vmatpush1.bf16.msra.mxu1 %v8468_v0  ;;  %5318 = vmatpush1.bf16.msra.mxu0 %v8471_v33 }
0x24d9   :  { %5278 = vmatprep.subr.bf16.mxu1 %v8474_v35  ;;  %5319 = vmatprep.subr.bf16.mxu0 %v8477_v15 }
0x24da   :  { %5308 = vmatprep.mubr.bf16.mxu1 %v7387_v27  ;;  %5349 = vmatprep.mubr.bf16.mxu0 %v7387_v27 }
0x24dc   :  { %5279 = vmatpush1.bf16.msra.mxu1 %v8482_v50  ;;  %5320 = vmatpush1.bf16.msra.mxu0 %v8485_v16 }
0x24dd   :  { %5280 = vmatprep.subr.bf16.mxu1 %v8488_v51  ;;  %5321 = vmatprep.subr.bf16.mxu0 %v8491_v14 }
0x24e0   :  { %5281 = vmatpush1.bf16.msra.mxu1 %v8494_v20  ;;  %5322 = vmatpush1.bf16.msra.mxu0 %v8497_v17 }
0x24e1   :  { %5282 = vmatprep.subr.bf16.mxu1 %v8500_v58  ;;  %5323 = vmatprep.subr.bf16.mxu0 %v8503_v25 }
0x24e4   :  { %5283 = vmatpush1.bf16.msra.mxu1 %v8506_v30  ;;  %5324 = vmatpush1.bf16.msra.mxu0 %v8509_v36 }
0x24e5   :  { %5284 = vmatprep.subr.bf16.mxu1 %v8512_v37  ;;  %5325 = vmatprep.subr.bf16.mxu0 %v8515_v38 }
0x24e8   :  { %5285 = vmatpush1.bf16.msra.mxu1 %v8518_v41  ;;  %5326 = vmatpush1.bf16.msra.mxu0 %v8521_v23 }
0x24e9   :  { %5286 = vmatprep.subr.bf16.mxu1 %v8524_v42  ;;  %5327 = vmatprep.subr.bf16.mxu0 %v8527_v28 }
0x24ec   :  { %5287 = vmatpush1.bf16.msra.mxu1 %v8530_v40  ;;  %5328 = vmatpush1.bf16.msra.mxu0 %v8533_v43 }
0x24ed   :  { %5288 = vmatprep.subr.bf16.mxu1 %v8536_v47  ;;  %5329 = vmatprep.subr.bf16.mxu0 %v8539_v1 }
0x24f0   :  { %5289 = vmatpush1.bf16.msra.mxu1 %v8542_v48  ;;  %5330 = vmatpush1.bf16.msra.mxu0 %v8545_v46 }
0x24f1   :  { %5290 = vmatprep.subr.bf16.mxu1 %v8548_v45  ;;  %5331 = vmatprep.subr.bf16.mxu0 %v8551_v4 }
0x24f4   :  { %5291 = vmatpush1.bf16.msra.mxu1 %v8554_v24  ;;  %5332 = vmatpush1.bf16.msra.mxu0 %v8557_v6 }
0x24f5   :  { %5451 = vmatprep.subr.bf16.mxu1 %v8560_v60  ;;  %5492 = vmatprep.subr.bf16.mxu0 %v8563_v3 }
0x2597   :  { %v5135_v49 = vpop.f32.mrf.mxu1  ;;  %v5176_v29 = vpop.f32.mrf.mxu0 }
0x2598   :  { %v5187_v32 = vrot.slane %v5135_v49, 3  ;;  %v5191_v57 = vrot.slane %v5135_v49, 4  ;;  %v5189_v61 = vrot.slane %v5176_v29, 3  ;;  %v5193_v54 = vrot.slane %v5176_v29, 4 }
0x2599   :  { %v5137_v21 = vpop.f32.mrf.mxu1  ;;  %v5178_v8 = vpop.f32.mrf.mxu0 }
0x259a   :  { %v5203_v9 = vadd.f32 %v5187_v32, %v8282_v2  ;;  %v5207_v5 = vadd.f32 %v5191_v57, %v8284_v39  ;;  %v5188_v19 = vrot.slane %v5137_v21, 3  ;;  %v5192_v53 = vrot.slane %v5137_v21, 4 }
0x259b   :  { %v5139_v7 = vpop.f32.mrf.mxu1  ;;  %v5180_v59 = vpop.f32.mrf.mxu0  ;;  %v5205_v22 = vadd.f32 %v5189_v61, %v8296_v34  ;;  %v5209_v49 = vadd.f32 %v5193_v54, %v8298_v31  ;;  %v5190_v32 = vrot.slane %v5178_v8, 3  ;;  %v5194_v57 = vrot.slane %v5178_v8, 4 }
0x259c   :  { %v6059_v10 = vmul.f32 -1.442695, %v5203_v9  ;;  %v6062_v11 = vmul.f32 -1.442695, %v5207_v5  ;;  %v5204_v60 = vadd.f32 %v5188_v19, %v8287_v26  ;;  %v5208_v3 = vadd.f32 %v5192_v53, %v8290_v44 }
0x259d   :  { %v5140_v12 = vpop.f32.mrf.mxu1  ;;  %v5181_v62 = vpop.f32.mrf.mxu0  ;;  %v6061_v21 = vmul.f32 -1.442695, %v5205_v22  ;;  %v6064_v9 = vmul.f32 -1.442695, %v5209_v49  ;;  %v5206_v5 = vadd.f32 %v5190_v32, %v8302_v55  ;;  %v5210_v53 = vadd.f32 %v5194_v57, %v8304_v13 }
0x259e   :  { %7117 = vpow2.f32 %v6059_v10  ;;  %v6060_v63 = vmul.f32 -1.442695, %v5204_v60  ;;  %v6063_v56 = vmul.f32 -1.442695, %v5208_v3  ;;  %v5251_v54 = vrot.slane %v8576_v52, 7 }
0x259f   :  { %7119 = vpow2.f32 %v6062_v11  ;;  %v5252_v32 = vrot.slane %v8578_v18, 7 }
0x25a0   :  { %7121 = vpow2.f32 %v6060_v63 }
0x25a1   :  { %7123 = vpow2.f32 %v6063_v56 }
0x25a2   :  { %7125 = vpow2.f32 %v6061_v21 }
0x25a3   :  { %7127 = vpow2.f32 %v6064_v9 }
0x25a4   :  { %7129 = vtanh.f32 %v5206_v5 }
0x25a5   :  { %7131 = vtanh.f32 %v5210_v53 }
0x25ab   :  { %v7118_v19 = vpop.eup %7117 }
0x25ac   :  { %v7120_v7 = vpop.eup %7119  ;;  %v5229_v59 = vadd.f32 1.0, %v7118_v19 }
0x25ad   :  { %v5232_v10 = vadd.f32 1.0, %v7120_v7  ;;  %v7122_v29 = vpop.eup %7121 }
0x25ae   :  { %v7124_v11 = vpop.eup %7123  ;;  %7133 = vrcp.f32 %v5229_v59  ;;  %v5230_v60 = vadd.f32 1.0, %v7122_v29 }
0x25af   :  { %7135 = vrcp.f32 %v5232_v10  ;;  %v5233_v8 = vadd.f32 1.0, %v7124_v11  ;;  %v7126_v3 = vpop.eup %7125 }
0x25b0   :  { %7137 = vrcp.f32 %v5230_v60  ;;  %v7128_v12 = vpop.eup %7127  ;;  %v5231_v22 = vadd.f32 1.0, %v7126_v3 }
0x25b1   :  { %7139 = vrcp.f32 %v5233_v8  ;;  %v7130_v62 = vpop.eup %7129  ;;  %v5234_v57 = vadd.f32 1.0, %v7128_v12 }
0x25b2   :  { %v7132_v63 = vpop.eup %7131  ;;  %7141 = vrcp.f32 %v5231_v22 }
0x25b3   :  { %7143 = vrcp.f32 %v5234_v57 }
0x25bb   :  { %v7134_v56 = vpop.eup %7133 }
0x25bc   :  { %v7136_v61 = vpop.eup %7135  ;;  %v5257_v5 = vmul.f32 %v7134_v56, %v7130_v62 }
0x25bd   :  { %v7138_v49 = vpop.eup %7137  ;;  %v5258_v53 = vmul.f32 %v7136_v61, %v7132_v63 }
0x25be   :  { %v7140_v21 = vpop.eup %7139  ;;  %v5255_v9 = vmul.f32 %v7138_v49, %v5251_v54 }
0x25bf   :  { %v5256_v19 = vmul.f32 %v7140_v21, %v5252_v32  ;;  %v7142_v52 = vpop.eup %7141 }
0x25c0   :  { %v8627_v7 = vadd.f32 %v5257_v5, %v5255_v9  ;;  %v7144_v10 = vpop.eup %7143 }
0x25c1   :  { %v8629_v59 = vadd.f32 %v5258_v53, %v5256_v19 }
0x25c2   :  { %7145 = vtanh.f32 %v8627_v7 }
0x25c3   :  { %7147 = vtanh.f32 %v8629_v59 }
0x25cf   :  { %v7146_v29 = vpop.eup %7145 }
0x25d0   :  { %v7148_v18 = vpop.eup %7147  ;;  %v5263_v11 = vmul.f32 %v7146_v29, %v7142_v52 }
0x25d1   :  { %v5264_v60 = vmul.f32 %v7148_v18, %v7144_v10 }
0x25d2   :  { %v5265_v8 = vpack.c.bf16 %v5263_v11, %v5263_v11 }
0x25d3   :  { %v5266_v3 = vpack.c.bf16 %v5264_v60, %v5264_v60  ;;  %v5426_v60 = vrot.slane %v8627_v7, 7 }
0x25d4   :  { %v5269_v12 = vunpack.c.l.b16 %v5265_v8 }
0x25d5   :  { %v5270_v62 = vunpack.c.l.b16 %v5266_v3 }
0x25d6   :  { %v5271_v63 = vrot.slane %v5269_v12, 5  ;;  %v5427_v12 = vrot.slane %v8629_v59, 7 }
0x25d7   :  { %v5272_v56 = vrot.slane %v5270_v62, 4 }
0x25d9   :  { %v5273_v61 = vsel %vm4402_vm6, %v5272_v56, %v5271_v63 }
0x25da   :  { %v5274_v54 = vpack.c.b16 %v5273_v61, %v5273_v61 }
0x25dc   :  { %5309 = vmatmul.mubr.bf16.vlgmr.msra.gmra.mxu1 %v5274_v54  ;;  %5350 = vmatmul.mubr.bf16.vlgmr.msra.gmra.mxu0 %v5274_v54 }
0x25dd   :  { %5452 = vmatpush1.bf16.msra.mxu1 %v8468_v0  ;;  %5493 = vmatpush1.bf16.msra.mxu0 %v8471_v33 }
0x25de   :  { %5453 = vmatprep.subr.bf16.mxu1 %v8474_v35  ;;  %5494 = vmatprep.subr.bf16.mxu0 %v8477_v15 }
0x25df   :  { %5483 = vmatprep.mubr.bf16.mxu1 %v7387_v27  ;;  %5524 = vmatprep.mubr.bf16.mxu0 %v7387_v27  ;;  %v8772_v27 = vmov 0.0  }
0x25e1   :  { %5454 = vmatpush1.bf16.msra.mxu1 %v8482_v50  ;;  %5495 = vmatpush1.bf16.msra.mxu0 %v8485_v16 }
0x25e2   :  { %5455 = vmatprep.subr.bf16.mxu1 %v8488_v51  ;;  %5496 = vmatprep.subr.bf16.mxu0 %v8491_v14 }
0x25e5   :  { %5456 = vmatpush1.bf16.msra.mxu1 %v8494_v20  ;;  %5497 = vmatpush1.bf16.msra.mxu0 %v8497_v17 }
0x25e6   :  { %5457 = vmatprep.subr.bf16.mxu1 %v8500_v58  ;;  %5498 = vmatprep.subr.bf16.mxu0 %v8503_v25 }
0x25e9   :  { %5458 = vmatpush1.bf16.msra.mxu1 %v8506_v30  ;;  %5499 = vmatpush1.bf16.msra.mxu0 %v8509_v36 }
0x25ea   :  { %5459 = vmatprep.subr.bf16.mxu1 %v8512_v37  ;;  %5500 = vmatprep.subr.bf16.mxu0 %v8515_v38 }
0x25ed   :  { %5460 = vmatpush1.bf16.msra.mxu1 %v8518_v41  ;;  %5501 = vmatpush1.bf16.msra.mxu0 %v8521_v23 }
0x25ee   :  { %5461 = vmatprep.subr.bf16.mxu1 %v8524_v42  ;;  %5502 = vmatprep.subr.bf16.mxu0 %v8527_v28 }
0x25f1   :  { %5462 = vmatpush1.bf16.msra.mxu1 %v8530_v40  ;;  %5503 = vmatpush1.bf16.msra.mxu0 %v8533_v43 }
0x25f2   :  { %5463 = vmatprep.subr.bf16.mxu1 %v8536_v47  ;;  %5504 = vmatprep.subr.bf16.mxu0 %v8539_v1 }
0x25f5   :  { %5464 = vmatpush1.bf16.msra.mxu1 %v8542_v48  ;;  %5505 = vmatpush1.bf16.msra.mxu0 %v8545_v46 }
0x25f6   :  { %5465 = vmatprep.subr.bf16.mxu1 %v8548_v45  ;;  %5506 = vmatprep.subr.bf16.mxu0 %v8551_v4 }
0x25f9   :  { %5466 = vmatpush1.bf16.msra.mxu1 %v8554_v24  ;;  %5507 = vmatpush1.bf16.msra.mxu0 %v8557_v6 }
0x25fa   :  { %6523 = vmatprep.subr.bf16.mxu1 %v8772_v27 }
0x269c   :  { %v5310_v0 = vpop.f32.mrf.mxu1  ;;  %v5351_v33 = vpop.f32.mrf.mxu0 }
0x269d   :  { %v5362_v35 = vrot.slane %v5310_v0, 2  ;;  %v5366_v15 = vrot.slane %v5310_v0, 3  ;;  %v5364_v40 = vrot.slane %v5351_v33, 2  ;;  %v5368_v43 = vrot.slane %v5351_v33, 3 }
0x269e   :  { %v5312_v50 = vpop.f32.mrf.mxu1  ;;  %v5353_v16 = vpop.f32.mrf.mxu0 }
0x269f   :  { %v5378_v51 = vadd.f32 %v5362_v35, %v8282_v2  ;;  %v5382_v14 = vadd.f32 %v5366_v15, %v8284_v39  ;;  %v5363_v20 = vrot.slane %v5312_v50, 2  ;;  %v5367_v17 = vrot.slane %v5312_v50, 3 }
0x26a0   :  { %v5314_v58 = vpop.f32.mrf.mxu1  ;;  %v5355_v25 = vpop.f32.mrf.mxu0  ;;  %v5380_v47 = vadd.f32 %v5364_v40, %v8296_v34  ;;  %v5384_v1 = vadd.f32 %v5368_v43, %v8298_v31  ;;  %v5365_v48 = vrot.slane %v5353_v16, 2  ;;  %v5369_v46 = vrot.slane %v5353_v16, 3  ;;  %v6854_v40 = vld [vmem:[%s8753_s19 + $0x10] sm:$0xff]   ;;  %v6855_v43 = vld [vmem:[%s8753_s19 + $0x8] sm:$0xff]  }
0x26a1   :  { %v6065_v30 = vmul.f32 -1.442695, %v5378_v51  ;;  %v6068_v36 = vmul.f32 -1.442695, %v5382_v14  ;;  %v5379_v37 = vadd.f32 %v5363_v20, %v8287_v26  ;;  %v5383_v38 = vadd.f32 %v5367_v17, %v8290_v44 }
0x26a2   :  { %v5315_v41 = vpop.f32.mrf.mxu1  ;;  %v5356_v23 = vpop.f32.mrf.mxu0  ;;  %v6067_v45 = vmul.f32 -1.442695, %v5380_v47  ;;  %v6070_v4 = vmul.f32 -1.442695, %v5384_v1  ;;  %v5381_v24 = vadd.f32 %v5365_v48, %v8302_v55  ;;  %v5385_v22 = vadd.f32 %v5369_v46, %v8304_v13  ;;  %v6856_v47 = vld [vmem:[%s8753_s19] sm:$0xff]  }
0x26a3   :  { %7149 = vpow2.f32 %v6065_v30  ;;  %v6066_v42 = vmul.f32 -1.442695, %v5379_v37  ;;  %v6069_v28 = vmul.f32 -1.442695, %v5383_v38  ;;  %v6849_v38 = vld [vmem:[%s8753_s19 + $0x38] sm:$0xff]   ;;  %v6850_v41 = vld [vmem:[%s8753_s19 + $0x30] sm:$0xff]  }
0x26a4   :  { %7151 = vpow2.f32 %v6068_v36  ;;  %v6851_v23 = vld [vmem:[%s8753_s19 + $0x28] sm:$0xff]  }
0x26a5   :  { %7153 = vpow2.f32 %v6066_v42  ;;  %v6852_v42 = vld [vmem:[%s8753_s19 + $0x20] sm:$0xff]  }
0x26a6   :  { %7155 = vpow2.f32 %v6069_v28  ;;  %v6853_v28 = vld [vmem:[%s8753_s19 + $0x18] sm:$0xff]  }
0x26a7   :  { %7157 = vpow2.f32 %v6067_v45 }
0x26a8   :  { %7159 = vpow2.f32 %v6070_v4 }
0x26a9   :  { %7161 = vtanh.f32 %v5381_v24 }
0x26aa   :  { %7163 = vtanh.f32 %v5385_v22 }
0x26b0   :  { %v7150_v6 = vpop.eup %7149 }
0x26b1   :  { %v7152_v49 = vpop.eup %7151  ;;  %v5404_v32 = vadd.f32 1.0, %v7150_v6 }
0x26b2   :  { %v5407_v57 = vadd.f32 1.0, %v7152_v49  ;;  %v7154_v21 = vpop.eup %7153 }
0x26b3   :  { %v7156_v9 = vpop.eup %7155  ;;  %7165 = vrcp.f32 %v5404_v32  ;;  %v5405_v5 = vadd.f32 1.0, %v7154_v21 }
0x26b4   :  { %7167 = vrcp.f32 %v5407_v57  ;;  %v5408_v19 = vadd.f32 1.0, %v7156_v9  ;;  %v7158_v53 = vpop.eup %7157 }
0x26b5   :  { %7169 = vrcp.f32 %v5405_v5  ;;  %v7160_v52 = vpop.eup %7159  ;;  %v5406_v8 = vadd.f32 1.0, %v7158_v53 }
0x26b6   :  { %7171 = vrcp.f32 %v5408_v19  ;;  %v7162_v10 = vpop.eup %7161  ;;  %v5409_v62 = vadd.f32 1.0, %v7160_v52 }
0x26b7   :  { %v7164_v29 = vpop.eup %7163  ;;  %7173 = vrcp.f32 %v5406_v8 }
0x26b8   :  { %7175 = vrcp.f32 %v5409_v62 }
0x26c0   :  { %v7166_v18 = vpop.eup %7165 }
0x26c1   :  { %v7168_v11 = vpop.eup %7167  ;;  %v5432_v61 = vmul.f32 %v7166_v18, %v7162_v10 }
0x26c2   :  { %v7170_v3 = vpop.eup %7169  ;;  %v5433_v0 = vmul.f32 %v7168_v11, %v7164_v29 }
0x26c3   :  { %v7172_v63 = vpop.eup %7171  ;;  %v5430_v56 = vmul.f32 %v7170_v3, %v5426_v60 }
0x26c4   :  { %v5431_v54 = vmul.f32 %v7172_v63, %v5427_v12  ;;  %v7174_v7 = vpop.eup %7173 }
0x26c5   :  { %v8677_v33 = vadd.f32 %v5432_v61, %v5430_v56  ;;  %v7176_v15 = vpop.eup %7175 }
0x26c6   :  { %v8679_v35 = vadd.f32 %v5433_v0, %v5431_v54 }
0x26c7   :  { %7177 = vtanh.f32 %v8677_v33 }
0x26c8   :  { %7179 = vtanh.f32 %v8679_v35 }
0x26d4   :  { %v7178_v50 = vpop.eup %7177 }
0x26d5   :  { %v7180_v59 = vpop.eup %7179  ;;  %v5438_v16 = vmul.f32 %v7178_v50, %v7174_v7 }
0x26d6   :  { %v5439_v51 = vmul.f32 %v7180_v59, %v7176_v15 }
0x26d7   :  { %v5440_v14 = vpack.c.bf16 %v5438_v16, %v5438_v16  ;;  %v5601_v16 = vrot.slane %v8677_v33, 7 }
0x26d8   :  { %v5441_v20 = vpack.c.bf16 %v5439_v51, %v5439_v51 }
0x26d9   :  { %v5444_v17 = vunpack.c.l.b16 %v5440_v14 }
0x26da   :  { %v5445_v58 = vunpack.c.l.b16 %v5441_v20  ;;  %v5602_v20 = vrot.slane %v8679_v35, 7 }
0x26db   :  { %v5446_v25 = vrot.slane %v5444_v17, 6 }
0x26dc   :  { %v5447_v30 = vrot.slane %v5445_v58, 5 }
0x26de   :  { %v5448_v36 = vsel %vm4402_vm6, %v5447_v30, %v5446_v25 }
0x26df   :  { %v5449_v37 = vpack.c.b16 %v5448_v36, %v5448_v36 }
0x26e1   :  { %5484 = vmatmul.mubr.bf16.vlgmr.msra.gmra.mxu1 %v5449_v37  ;;  %5525 = vmatmul.mubr.bf16.vlgmr.msra.gmra.mxu0 %v5449_v37 }
0x26e2   :  { %6539 = vmatprep.mubr.msk.bf16.mxu1 %vm7388_vm0, %v8772_v27  ;;  %6524 = vmatpush3.bf16.msra.mxu1 %v6849_v38 }
0x26e3   :  { %6525 = vmatprep.subr.bf16.mxu1 %v8772_v27 }
0x26e6   :  { %6526 = vmatpush3.bf16.msra.mxu1 %v6850_v41 }
0x26e7   :  { %6527 = vmatprep.subr.bf16.mxu1 %v8772_v27 }
0x26ea   :  { %6528 = vmatpush3.bf16.msra.mxu1 %v6851_v23 }
0x26eb   :  { %6529 = vmatprep.subr.bf16.mxu1 %v8772_v27 }
0x26ee   :  { %6530 = vmatpush3.bf16.msra.mxu1 %v6852_v42 }
0x26ef   :  { %6531 = vmatprep.subr.bf16.mxu1 %v8772_v27 }
0x26f2   :  { %6532 = vmatpush3.bf16.msra.mxu1 %v6853_v28 }
0x26f3   :  { %6533 = vmatprep.subr.bf16.mxu1 %v8772_v27 }
0x26f6   :  { %6534 = vmatpush3.bf16.msra.mxu1 %v6854_v40 }
0x26f7   :  { %6535 = vmatprep.subr.bf16.mxu1 %v8772_v27 }
0x26fa   :  { %6536 = vmatpush3.bf16.msra.mxu1 %v6855_v43 }
0x26fb   :  { %6537 = vmatprep.subr.bf16.mxu1 %v8772_v27 }
0x26fe   :  { %6538 = vmatpush3.bf16.msra.mxu1 %v6856_v47 }
0x27a1   :  { %v5485_v1 = vpop.f32.mrf.mxu1  ;;  %v5526_v48 = vpop.f32.mrf.mxu0 }
0x27a2   :  { %v5537_v46 = vrot.slane %v5485_v1, 1  ;;  %v5541_v45 = vrot.slane %v5485_v1, 2  ;;  %v5539_v18 = vrot.slane %v5526_v48, 1 }
0x27a3   :  { %v5487_v4 = vpop.f32.mrf.mxu1  ;;  %v5528_v24 = vpop.f32.mrf.mxu0 }
0x27a4   :  { %v5553_v6 = vadd.f32 %v5537_v46, %v8282_v2  ;;  %v5557_v22 = vadd.f32 %v5541_v45, %v8284_v39  ;;  %v5538_v49 = vrot.slane %v5487_v4, 1  ;;  %v5542_v32 = vrot.slane %v5487_v4, 2 }
0x27a5   :  { %v5489_v57 = vpop.f32.mrf.mxu1  ;;  %v5530_v21 = vpop.f32.mrf.mxu0  ;;  %v5543_v2 = vrot.slane %v5526_v48, 2  ;;  %v5555_v39 = vadd.f32 %v5539_v18, %v8296_v34  ;;  %v5540_v60 = vrot.slane %v5528_v24, 1  ;;  %v5544_v8 = vrot.slane %v5528_v24, 2 }
0x27a6   :  { %v6071_v9 = vmul.f32 -1.442695, %v5553_v6  ;;  %v6074_v5 = vmul.f32 -1.442695, %v5557_v22  ;;  %v5554_v19 = vadd.f32 %v5538_v49, %v8287_v26  ;;  %v5558_v27 = vadd.f32 %v5542_v32, %v8290_v44  ;;  %v6077_v6 = vld [vmem:[%s8754_s20] ss:$0 sm:$0xff] }
0x27a7   :  { %v5490_v53 = vpop.f32.mrf.mxu1  ;;  %v5531_v52 = vpop.f32.mrf.mxu0  ;;  %v5559_v11 = vadd.f32 %v5543_v2, %v8298_v31  ;;  %v6073_v3 = vmul.f32 -1.442695, %v5555_v39  ;;  %v5556_v44 = vadd.f32 %v5540_v60, %v8302_v55  ;;  %v5560_v62 = vadd.f32 %v5544_v8, %v8304_v13 }
0x27a8   :  { %7181 = vpow2.f32 %v6071_v9  ;;  %v6072_v10 = vmul.f32 -1.442695, %v5554_v19  ;;  %v6075_v29 = vmul.f32 -1.442695, %v5558_v27 }
0x27a9   :  { %7183 = vpow2.f32 %v6074_v5  ;;  %v6076_v26 = vmul.f32 -1.442695, %v5559_v11 }
0x27aa   :  { %7185 = vpow2.f32 %v6072_v10 }
0x27ab   :  { %7187 = vpow2.f32 %v6075_v29 }
0x27ac   :  { %7189 = vpow2.f32 %v6073_v3 }
0x27ad   :  { %7191 = vpow2.f32 %v6076_v26 }
0x27ae   :  { %7193 = vtanh.f32 %v5556_v44 }
0x27af   :  { %7195 = vtanh.f32 %v5560_v62 }
0x27b5   :  { %v7182_v12 = vpop.eup %7181 }
0x27b6   :  { %v7184_v63 = vpop.eup %7183  ;;  %v5579_v56 = vadd.f32 1.0, %v7182_v12 }
0x27b7   :  { %v5582_v61 = vadd.f32 1.0, %v7184_v63  ;;  %v7186_v54 = vpop.eup %7185 }
0x27b8   :  { %v7188_v34 = vpop.eup %7187  ;;  %7197 = vrcp.f32 %v5579_v56  ;;  %v5580_v31 = vadd.f32 1.0, %v7186_v54 }
0x27b9   :  { %7199 = vrcp.f32 %v5582_v61  ;;  %v5583_v0 = vadd.f32 1.0, %v7188_v34  ;;  %v7190_v7 = vpop.eup %7189 }
0x27ba   :  { %7201 = vrcp.f32 %v5580_v31  ;;  %v7192_v55 = vpop.eup %7191  ;;  %v5581_v51 = vadd.f32 1.0, %v7190_v7 }
0x27bb   :  { %7203 = vrcp.f32 %v5583_v0  ;;  %v7194_v15 = vpop.eup %7193  ;;  %v5584_v17 = vadd.f32 1.0, %v7192_v55 }
0x27bc   :  { %v7196_v50 = vpop.eup %7195  ;;  %7205 = vrcp.f32 %v5581_v51 }
0x27bd   :  { %7207 = vrcp.f32 %v5584_v17 }
0x27c5   :  { %v7198_v13 = vpop.eup %7197 }
0x27c6   :  { %v7200_v59 = vpop.eup %7199  ;;  %v5607_v30 = vmul.f32 %v7198_v13, %v7194_v15 }
0x27c7   :  { %v7202_v14 = vpop.eup %7201  ;;  %v5608_v37 = vmul.f32 %v7200_v59, %v7196_v50 }
0x27c8   :  { %v7204_v58 = vpop.eup %7203  ;;  %v5605_v25 = vmul.f32 %v7202_v14, %v5601_v16 }
0x27c9   :  { %v5606_v36 = vmul.f32 %v7204_v58, %v5602_v20  ;;  %v7206_v23 = vpop.eup %7205 }
0x27ca   :  { %v5609_v38 = vadd.f32 %v5607_v30, %v5605_v25  ;;  %v7208_v42 = vpop.eup %7207 }
0x27cb   :  { %v5610_v41 = vadd.f32 %v5608_v37, %v5606_v36 }
0x27cc   :  { %7209 = vtanh.f32 %v5609_v38 }
0x27cd   :  { %7211 = vtanh.f32 %v5610_v41 }
0x27d9   :  { %v7210_v28 = vpop.eup %7209 }
0x27da   :  { %v7212_v33 = vpop.eup %7211  ;;  %v5613_v40 = vmul.f32 %v7210_v28, %v7206_v23 }
0x27db   :  { %v5614_v43 = vmul.f32 %v7212_v33, %v7208_v42 }
0x27dc   :  { %v5615_v47 = vpack.c.bf16 %v5613_v40, %v5613_v40 }
0x27dd   :  { %v5616_v35 = vpack.c.bf16 %v5614_v43, %v5614_v43 }
0x27de   :  { %v5642_v1 = vunpack.c.l.b16 %v5615_v47 }
0x27df   :  { %v5643_v48 = vunpack.c.l.b16 %v5616_v35 }
0x27e0   :  { %v5644_v46 = vrot.slane %v5642_v1, 7 }
0x27e1   :  { %v5645_v45 = vrot.slane %v5643_v48, 6 }
0x27e3   :  { %v5646_v4 = vsel %vm4402_vm6, %v5645_v45, %v5644_v46 }
0x27e4   :  { %v5647_v24 = vpack.c.b16 %v5646_v4, %v5646_v4 }
0x27e6   :  { %6540 = vmatmul.mubr.bf16.vlgmr.msra.gmra.mxu1 %v5647_v24 }
0x28a6   :  { %v5731_v22 = vpop.f32.mrf.mxu1 }
0x28a7   :  { %v5732_v49 = vadd.f32 %v6077_v6, %v5731_v22 }
0x28a8   :  { %v6541_v32 = vpop.f32.mrf.mxu1 }
0x28a9   :  { %5737 = vst [vmem:[#allocation11] sm:$0x3] %v5732_v49 }
0x28aa   :  { %v5734_v57 = vpop.f32.mrf.mxu1 }
0x28ab   :  { %7356 = shalt.err (!%p7353_p1)
}
0x28ac   :  { %5747 = dma.vmem_to_hbm [thread:$0]  %s5745_s8, 32, %s8755_s21, [#allocation4]   ;;  %v6542_v21 = vpop.f32.mrf.mxu1 }
0x28ad   :  { %7371 = dma.done.wait [#allocation4], 32  }
0x28ae   :  { %7372 = vsyncadd [#allocation4], 4294967264 }
0x28af   :  { %5751 = vsyncpa [#allocation3], 1 }
0x28b0   :  { %5752 = vsyncpa [#allocation6], 1 }
0x28b1   :  { %5753 = vsyncpa [#allocation9], 1 }
0x28b2   :  { %5754 = vsyncpa [#allocation4], 1 }

</bundles_post_ra>
